<compile_context>
chip_gen: v6e
topology: v6e:2x2x1
jax: 0.10.0
libtpu: 0.0.40
codegen_flags: <defaults>
</compile_context>

<pallas_src>
import functools

import numpy as np
import jax
import jax.numpy as jnp
from jax.experimental import pallas as pl
from jax.experimental.pallas import tpu as pltpu


# ----------------------------------------------------------------------------
# Host-side precomputation
# ----------------------------------------------------------------------------
@functools.lru_cache(maxsize=None)
def _decay_matrix_np(L: int, lamda: float) -> np.ndarray:
    """(1 - lamda)^p weights exactly as in the reference attentionword().

    NOTE: the |i-j|+1 exponent for j>i on "middle" rows reproduces the
    reference's asymmetric quirk on purpose -- do not "fix" it.
    """
    i = np.arange(L)[:, None]
    j = np.arange(L)[None, :]
    e = np.abs(i - j) - 1
    middle = (i > 0) & (i < L - 1)
    e = np.where(middle & (j > i), np.abs(i - j) + 1, e)
    d = np.power(1.0 - lamda, e.astype(np.float64))
    d[i == j] = 0.0                        # diagonal handled by the additive mask
    return d.astype(np.float32)


@functools.lru_cache(maxsize=None)
def _negdiag_np(L: int) -> np.ndarray:
    """Additive mask excluding the removed word j == i from the softmax."""
    return np.where(np.eye(L, dtype=bool), np.float32(-1e30),
                    np.float32(0.0)).astype(np.float32)


def _tpu_generation() -> str:
    try:
        kind = jax.devices()[0].device_kind.lower()
    except Exception:
        return "unknown"
    if ("v5 lite" in kind) or ("v5e" in kind) or ("v5lite" in kind):
        return "v5e"
    if "v6" in kind:
        return "v6e"
    if "v7" in kind:
        return "v7x"
    return "unknown"


def _pick_row_tile(L: int, cap: int) -> int:
    """Largest divisor of L that is <= cap, preferring multiples of 8."""
    cap = int(max(1, min(L, cap)))
    best, best8 = 1, 0
    for d in range(1, L + 1):
        if L % d == 0 and d <= cap:
            best = d
            if d % 8 == 0:
                best8 = d
    return best8 if best8 else best


# ----------------------------------------------------------------------------
# Fused forward
# ----------------------------------------------------------------------------
def forward_pallas(ids, params, *, precision="auto", lane_axis="auto",
                   row_tile=None):
    # TODO(synk): the embedding gather stays an XLA gather; it could be fused
    # via PrefetchScalarGridSpec(num_scalar_prefetch=1) at production B*L.
    gen = _tpu_generation()
    embed_tab = params["embed"]
    emb = embed_tab[ids].astype(jnp.float32)                       # (B, L, E)
    B, L = ids.shape
    E = int(embed_tab.shape[1])
    H = int(params["b1"].shape[0])

    if precision == "f32":
        mm_dtype = jnp.float32                   # MXU operand dtype
        score_dtype = jnp.float32                # pairwise tanh-stage dtype
    else:  # "auto": bf16 MXU operands everywhere (bf16-native MXU on all gens),
        # bf16 element-wise scoring only where the VPU/EUP is bf16-capable.
        mm_dtype = jnp.bfloat16
        score_dtype = jnp.bfloat16 if gen in ("v6e", "v7x") else jnp.float32
    mmb = jnp.dtype(mm_dtype).itemsize
    sb = jnp.dtype(score_dtype).itemsize

    # ---- batch blocking: Bb per grid step so matmul M = Bb*L >= 128 ---------
    Bb = min(B, max(1, -(-128 // L)))
    nblk = -(-B // Bb)
    if gen == "v7x" and nblk == 1 and B >= 2:
        Bb = -(-B // 2)                          # >=2 grid steps -> use both TCs
        nblk = -(-B // Bb)
    B_pad = nblk * Bb
    if B_pad != B:
        emb = jnp.pad(emb, ((0, B_pad - B), (0, 0), (0, 0)))

    # ---- attention parameters ------------------------------------------------
    W1 = params["W1"].astype(jnp.float32)                          # (2E, H)
    w1ab = jnp.concatenate([W1[:E], W1[E:]], axis=1).astype(mm_dtype)  # (E, 2H)
    b1 = params["b1"].reshape(1, H).astype(jnp.float32)
    w2 = params["w2"].reshape(1, H).astype(jnp.float32)
    # b2 (attlinear2 bias) cancels in the softmax -> not passed to the kernel.
    decay = jnp.asarray(_decay_matrix_np(L, float(params["lamda"])))   # (L, L)
    negdiag = jnp.asarray(_negdiag_np(L))                              # (L, L)

    # lane layout for the O(B*L^2*H) pairwise stage: put whichever of H / L
    # fills more of the 128-wide lane axis on lanes.
    if lane_axis == "auto":
        lane_over_L = min(L, 128) > min(H, 128)
    else:
        lane_over_L = (lane_axis == "l")

    # query-row tile: divisor of L, generation-aware VMEM budget, >=8 floor.
    row_budget = {"v7x": 3 << 20, "v6e": 12 << 20, "v5e": 12 << 20}.get(gen, 4 << 20)
    per_row = max(1, Bb * L * H * sb * 3)        # t + exp/alpha temporaries
    cap = max(8, row_budget // per_row)
    if row_tile is not None:
        cap = min(cap, int(row_tile))
    Ti = _pick_row_tile(L, cap)
    n_tiles = L // Ti

    # ---- conv parameters: K-accumulated matmuls (no Kmax-duplicated im2col) --
    convs = params["convs"]
    Ks = [int(W.shape[0]) for (W, _) in convs]
    Kmax, Kmin = max(Ks), min(Ks)
    C = int(convs[0][0].shape[2])
    nf = len(convs)
    nfC = nf * C
    F2 = 2 * E
    Pmax = L - Kmin + 1
    Lpad = Pmax + Kmax - 1
    wk_parts = []
    for k in range(Kmax):
        cols = [(W[k].astype(jnp.float32) if k < int(W.shape[0])
                 else jnp.zeros((F2, C), jnp.float32)) for (W, _) in convs]
        wk_parts.append(jnp.concatenate(cols, axis=1))
    wk_all = jnp.stack(wk_parts, axis=0).astype(mm_dtype)          # (Kmax, F2, nfC)
    # invalid-position mask (positions past L-K for each filter) with the conv
    # biases folded in -> one additive constant.
    pm = np.zeros((Pmax, nfC), np.float32)
    for f, K in enumerate(Ks):
        pm[L - K + 1:, f * C:(f + 1) * C] = -1e30
    pmb = jnp.asarray(pm) + jnp.concatenate(
        [b.astype(jnp.float32) for (_, b) in convs]).reshape(1, nfC)

    # ---- final linear, lane-dense (multiple-of-128) output width ------------
    Wl = params["Wl"].astype(jnp.float32)
    bl = params["bl"].astype(jnp.float32)
    NC = int(bl.shape[0])
    NCpad = ((NC + 127) // 128) * 128
    Wlp = jnp.zeros((nfC, NCpad), jnp.float32).at[:, :NC].set(Wl).astype(mm_dtype)
    blp = jnp.zeros((1, NCpad), jnp.float32).at[:, :NC].set(bl)

    # ---- VMEM limit from the actual working set (clamped per generation) ----
    weight_bytes = ((E * 2 * H + Kmax * F2 * nfC + nfC * NCpad) * mmb
                    + (2 * L * L + Pmax * nfC + NCpad + 2 * H) * 4)
    block_bytes = (2 * Bb * L * E * 4                      # emb block (dbl buf)
                   + 2 * Bb * NCpad * 4                    # out block
                   + Bb * L * (H * sb + E * 4)             # a / attemb scratch
                   + Bb * L * (E * (4 + mmb) + 2 * H * 4)  # embb + cast + proj
                   + Bb * Lpad * F2 * (4 + mmb)            # xnew (f32 + cast)
                   + 3 * Bb * Ti * L * H * max(sb, 4)      # pairwise temporaries
                   + 3 * Bb * Pmax * nfC * 4               # conv acc + temps
                   + Bb * Pmax * F2 * mmb)                 # shifted slice
    est = 2 * weight_bytes + block_bytes
    vmem_cap = {"v7x": 56 << 20, "v6e": 100 << 20, "v5e": 100 << 20}.get(gen, 48 << 20)
    vmem_limit = int(min(vmem_cap, max(32 << 20, 2 * est)))

    # -------------------------------------------------------------------------
    # Kernel body
    # -------------------------------------------------------------------------
    def kernel(emb_ref, w1ab_ref, b1_ref, w2_ref, decay_ref, negdiag_ref,
               wk_ref, pmb_ref, wl_ref, bl_ref, out_ref, *scratch):
        embb = emb_ref[...]                                        # (Bb, L, E) f32
        embb_mm = embb.astype(mm_dtype)                            # hoisted cast

        # fused query/key projection: ONE (Bb*L, E) @ (E, 2H) matmul
        proj = jnp.dot(embb_mm.reshape(Bb * L, E), w1ab_ref[...],
                       preferred_element_type=jnp.float32)         # (Bb*L, 2H)
        a_val = (proj[:, :H] + b1_ref[...]).reshape(Bb, L, H)       # query half
        bp_val = proj[:, H:].reshape(Bb, L, H)                      # key half
        if lane_over_L:
            bp_b = jnp.transpose(bp_val, (0, 2, 1)).astype(score_dtype)  # (Bb,H,L)
            w2_b = w2_ref[...].reshape(1, 1, H, 1).astype(score_dtype)
        else:
            bp_b = bp_val.astype(score_dtype)                            # (Bb,L,H)
            w2_b = w2_ref[...].reshape(1, 1, 1, H).astype(score_dtype)

        def attend_rows(a_t, dec, neg):
            # a_t: (Bb, tl, H) score_dtype; dec/neg: (tl, L) f32
            if lane_over_L:                                         # lanes = L
                t = jnp.tanh(a_t[:, :, :, None] + bp_b[:, None, :, :])   # (Bb,tl,H,L)
                s = jnp.sum(t * w2_b, axis=2, dtype=jnp.float32)         # (Bb,tl,L)
            else:                                                   # lanes = H
                t = jnp.tanh(a_t[:, :, None, :] + bp_b[:, None, :, :])   # (Bb,tl,L,H)
                s = jnp.sum(t * w2_b, axis=-1, dtype=jnp.float32)        # (Bb,tl,L)
            s = s * dec[None, :, :] + neg[None, :, :]   # decay scale + exclude j==i
            s = s - jnp.max(s, axis=-1, keepdims=True)
            p = jnp.exp(s)
            alpha = p * (1.0 / jnp.sum(p, axis=-1, keepdims=True))
            return jnp.einsum("bql,ble->bqe", alpha.astype(mm_dtype), embb_mm,
                              preferred_element_type=jnp.float32)   # (Bb, tl, E)

        if n_tiles == 1:
            attemb = attend_rows(a_val.astype(score_dtype),
                                 decay_ref[...], negdiag_ref[...])  # (Bb, L, E)
        else:
            a_scr, attemb_scr = scratch
            a_scr[...] = a_val.astype(score_dtype)

            @pl.loop(0, n_tiles)
            def _(it):
                r0 = it * Ti
                if Ti % 8 == 0:
                    r0 = pl.multiple_of(r0, 8)
                attemb_scr[:, pl.ds(r0, Ti), :] = attend_rows(
                    a_scr[:, pl.ds(r0, Ti), :],
                    decay_ref[pl.ds(r0, Ti), :],
                    negdiag_ref[pl.ds(r0, Ti), :])

            attemb = attemb_scr[...]

        # --- concat + Conv1d(k=3/4/5) as Kmax accumulated matmuls + max pool --
        xnew = jnp.concatenate([embb, attemb], axis=2)              # (Bb, L, 2E)
        if Lpad > L:
            xnew = jnp.concatenate(
                [xnew, jnp.zeros((Bb, Lpad - L, F2), xnew.dtype)], axis=1)
        xnew = xnew.astype(mm_dtype)
        conv = pmb_ref[...][None, :, :].astype(jnp.float32)         # bias + mask
        for k in range(Kmax):                                       # Kmax small, static
            xk = xnew[:, k:k + Pmax, :].reshape(Bb * Pmax, F2)
            conv = conv + jnp.dot(xk, wk_ref[k],
                                  preferred_element_type=jnp.float32
                                  ).reshape(Bb, Pmax, nfC)
        feat = jnp.max(conv, axis=1)                                # (Bb, nfC)

        # TODO(synk): nn.Dropout(0.5) is identity in eval mode; training-mode
        # dropout is not modeled.
        logits = jnp.dot(feat.astype(mm_dtype), wl_ref[...],
                         preferred_element_type=jnp.float32) + bl_ref[...]
        out_ref[0] = logits                                         # (Bb, NCpad)

    # -------------------------------------------------------------------------
    # pallas_call wrapper (with a fallback if pipeline_mode=Buffered is rejected)
    # -------------------------------------------------------------------------
    out_shape = jax.ShapeDtypeStruct((nblk, Bb, NCpad), jnp.float32)
    scratch_shapes = ([] if n_tiles == 1 else
                      [pltpu.VMEM((Bb, L, H), score_dtype),
                       pltpu.VMEM((Bb, L, E), jnp.float32)])

    def _invoke(use_buffered):
        def cspec(shape):
            nd = len(shape)
            imap = lambda g: (0,) * nd           # constant across grid steps
            if use_buffered:
                # weights never change across grid steps -> single buffer.
                return pl.BlockSpec(shape, imap,
                                    pipeline_mode=pl.Buffered(buffer_count=1))
            return pl.BlockSpec(shape, imap)

        in_specs = [
            pl.BlockSpec((Bb, L, E), lambda g: (g, 0, 0)),          # emb (per block)
            cspec((E, 2 * H)),                                      # fused W1
            cspec((1, H)),                                          # b1
            cspec((1, H)),                                          # w2
            cspec((L, L)),                                          # decay
            cspec((L, L)),                                          # diag exclusion
            cspec((Kmax, F2, nfC)),                                 # conv weights
            cspec((Pmax, nfC)),                                     # pos mask + bias
            cspec((nfC, NCpad)),                                    # final linear W
            cspec((1, NCpad)),                                      # final linear b
        ]
        return pl.pallas_call(
            kernel,
            out_shape=out_shape,
            grid=(nblk,),
            in_specs=in_specs,
            out_specs=pl.BlockSpec((1, Bb, NCpad), lambda g: (g, 0, 0)),
            scratch_shapes=scratch_shapes,
            compiler_params=pltpu.CompilerParams(
                dimension_semantics=("parallel",),      # batch blocks independent
                vmem_limit_bytes=vmem_limit),
        )(emb, w1ab, b1, w2, decay, negdiag, wk_all, pmb, Wlp, blp)

    try:
        out = _invoke(True)
    except Exception:
        out = _invoke(False)

    return out.reshape(B_pad, NCpad)[:B, :NC]


# ----------------------------------------------------------------------------
# Pure-JAX reference, mirroring the PyTorch code statement-by-statement.
# ----------------------------------------------------------------------------
def ref_forward(ids, params):
    lamda = params["lamda"]
    emb = params["embed"][ids].astype(jnp.float32)                 # (B, L, E)
    Bsz, L, E = emb.shape
    H = params["b1"].shape[0]
    outs = []
    for i in range(L):
        inp1 = jnp.repeat(emb[:, i:i + 1, :], L - 1, axis=1)
        inp2 = jnp.concatenate([emb[:, :i, :], emb[:, i + 1:, :]], axis=1)
        inp = jnp.concatenate([inp1, inp2], axis=2).reshape(-1, 2 * E)
        attout = jnp.tanh(inp @ params["W1"] + params["b1"]).reshape(Bsz, L - 1, H)
        if i == 0:
            score = jnp.stack([(1.0 - lamda) ** (abs(i - idx) - 1) * attout[:, idx - 1]
                               for idx in range(i + 1, L)], axis=1)
        elif i == L - 1:
            score = jnp.stack([(1.0 - lamda) ** (abs(i - idx) - 1) * attout[:, idx]
                               for idx in range(0, i)], axis=1)
        else:
            s1 = jnp.stack([(1.0 - lamda) ** abs(i - idx - 1) * attout[:, idx]
                            for idx in range(0, i)], axis=1)
            s2 = jnp.stack([(1.0 - lamda) ** abs(i - idx - 1) * attout[:, idx - 1]
                            for idx in range(i + 1, L)], axis=1)
            score = jnp.concatenate([s1, s2], axis=1)
        sc = (score.reshape(-1, H) @ params["w2"][:, None] + params["b2"]).reshape(Bsz, L - 1)
        alpha = jax.nn.softmax(sc, axis=1)
        outs.append(jnp.sum(alpha[:, :, None] * inp2, axis=1))
    attemb = jnp.stack(outs, axis=1)                               # (B, L, E)
    xnew = jnp.concatenate([emb, attemb], axis=2)                  # (B, L, 2E)
    feats = []
    for (W, bconv) in params["convs"]:
        K = W.shape[0]
        P = L - K + 1
        o = jnp.stack([sum(xnew[:, p + k, :] @ W[k] for k in range(K)) + bconv
                       for p in range(P)], axis=1)                 # (B, P, C)
        feats.append(jnp.max(o, axis=1))                           # (B, C)
    feat = jnp.concatenate(feats, axis=1)                          # (B, 3C)
    return feat @ params["Wl"] + params["bl"]


# ----------------------------------------------------------------------------
if __name__ == "__main__":
    def make_params(key, E, H, C, NC, V, lamda):
        keys = jax.random.split(key, 12)
        return {
            "lamda": lamda,
            "embed": jax.random.normal(keys[0], (V, E), jnp.float32),
            "W1": 0.1 * jax.random.normal(keys[1], (2 * E, H), jnp.float32),   # attlinear1.T
            "b1": 0.1 * jax.random.normal(keys[2], (H,), jnp.float32),
            "w2": 0.1 * jax.random.normal(keys[3], (H,), jnp.float32),         # attlinear2.T
            "b2": 0.1 * jax.random.normal(keys[4], (), jnp.float32),
            "convs": [                                                          # (K, 2E, C)
                (0.1 * jax.random.normal(keys[5], (3, 2 * E, C), jnp.float32),
                 0.1 * jax.random.normal(keys[6], (C,), jnp.float32)),
                (0.1 * jax.random.normal(keys[7], (4, 2 * E, C), jnp.float32),
                 0.1 * jax.random.normal(keys[8], (C,), jnp.float32)),
                (0.1 * jax.random.normal(keys[9], (5, 2 * E, C), jnp.float32),
                 0.1 * jax.random.normal(keys[10], (C,), jnp.float32)),
            ],
            "Wl": 0.1 * jax.random.normal(keys[11], (3 * C, NC), jnp.float32),  # linear.T
            "bl": jnp.zeros((NC,), jnp.float32),
        }

    # batch, maxlen, embeddim, atthidden, channels, numclasses, vocab
    B, L, E, H, C, NC, V = 2, 8, 32, 32, 16, 4, 50

    params = make_params(jax.random.PRNGKey(0), E, H, C, NC, V, 0.2)
    ids = jax.random.randint(jax.random.PRNGKey(1), (B, L), 0, V)
    ref = jax.block_until_ready(ref_forward(ids, params))

    # 1) strict f32 validation (auto lane layout -> H on lanes here)
    out = jax.block_until_ready(forward_pallas(ids, params, precision="f32"))
    assert out.shape == (B, NC)
    np.testing.assert_allclose(np.asarray(out), np.asarray(ref), rtol=1e-3, atol=1e-3)

    # 2) strict f32 validation of the L-on-lanes scoring layout
    out = jax.block_until_ready(
        forward_pallas(ids, params, precision="f32", lane_axis="l"))
    np.testing.assert_allclose(np.asarray(out), np.asarray(ref), rtol=1e-3, atol=1e-3)

    # 3) per-generation perf path: bf16 MXU operands (+ bf16 scoring on v6e/v7x)
    out = jax.block_until_ready(forward_pallas(ids, params, precision="auto"))
    np.testing.assert_allclose(np.asarray(out), np.asarray(ref), rtol=1e-1, atol=1.5e-1)

    # 4) longer sequence exercising the multi-tile pl.loop attention path
    B2, L2 = 2, 48
    params2 = make_params(jax.random.PRNGKey(2), E, H, C, NC, V, 0.3)
    ids2 = jax.random.randint(jax.random.PRNGKey(3), (B2, L2), 0, V)
    ref2 = jax.block_until_ready(ref_forward(ids2, params2))
    out2 = jax.block_until_ready(
        forward_pallas(ids2, params2, precision="f32", row_tile=16))
    np.testing.assert_allclose(np.asarray(out2), np.asarray(ref2), rtol=1e-3, atol=1e-3)
    out2 = jax.block_until_ready(
        forward_pallas(ids2, params2, precision="f32", row_tile=16, lane_axis="h"))
    np.testing.assert_allclose(np.asarray(out2), np.asarray(ref2), rtol=1e-3, atol=1e-3)

    print("KERNEL_OK")
</pallas_src>

<mosaic_0001>
module attributes {stable_mosaic.version = 11 : i64} {
  func.func @kernel(%arg0: i32, %arg1: memref<2x8x32xf32, #tpu.memory_space<vmem>>, %arg2: memref<32x64xf32, #tpu.memory_space<vmem>>, %arg3: memref<1x32xf32, #tpu.memory_space<vmem>>, %arg4: memref<1x32xf32, #tpu.memory_space<vmem>>, %arg5: memref<8x8xf32, #tpu.memory_space<vmem>>, %arg6: memref<8x8xf32, #tpu.memory_space<vmem>>, %arg7: memref<5x64x48xf32, #tpu.memory_space<vmem>>, %arg8: memref<6x48xf32, #tpu.memory_space<vmem>>, %arg9: memref<48x128xf32, #tpu.memory_space<vmem>>, %arg10: memref<1x128xf32, #tpu.memory_space<vmem>>, %arg11: memref<1x2x128xf32, #tpu.memory_space<vmem>>) attributes {dimension_semantics = [#tpu.dimension_semantics<parallel>], iteration_bounds = array<i64: 1>, scalar_prefetch = 0 : i64, scratch_operands = 0 : i64, tpu.core_type = #tpu.core_type<tc>, window_params = [{transform_indices = @transform_0, window_bounds = array<i64: 2, 8, 32>}, {pipeline_mode = #tpu.pipeline_mode<synchronous>, transform_indices = @transform_1, window_bounds = array<i64: 32, 64>}, {pipeline_mode = #tpu.pipeline_mode<synchronous>, transform_indices = @transform_2, window_bounds = array<i64: 1, 32>}, {pipeline_mode = #tpu.pipeline_mode<synchronous>, transform_indices = @transform_3, window_bounds = array<i64: 1, 32>}, {pipeline_mode = #tpu.pipeline_mode<synchronous>, transform_indices = @transform_4, window_bounds = array<i64: 8, 8>}, {pipeline_mode = #tpu.pipeline_mode<synchronous>, transform_indices = @transform_5, window_bounds = array<i64: 8, 8>}, {pipeline_mode = #tpu.pipeline_mode<synchronous>, transform_indices = @transform_6, window_bounds = array<i64: 5, 64, 48>}, {pipeline_mode = #tpu.pipeline_mode<synchronous>, transform_indices = @transform_7, window_bounds = array<i64: 6, 48>}, {pipeline_mode = #tpu.pipeline_mode<synchronous>, transform_indices = @transform_8, window_bounds = array<i64: 48, 128>}, {pipeline_mode = #tpu.pipeline_mode<synchronous>, transform_indices = @transform_9, window_bounds = array<i64: 1, 128>}, {transform_indices = @transform_10, window_bounds = array<i64: 1, 2, 128>}]} {
    %c0 = arith.constant 0 : index
    %c0_0 = arith.constant 0 : index
    %c0_1 = arith.constant 0 : index
    %0 = vector.load %arg1[%c0, %c0_0, %c0_1] : memref<2x8x32xf32, #tpu.memory_space<vmem>>, vector<2x8x32xf32>
    %1 = vector.shape_cast %0 : vector<2x8x32xf32> to vector<16x32xf32>
    %c0_2 = arith.constant 0 : index
    %c0_3 = arith.constant 0 : index
    %2 = vector.load %arg2[%c0_2, %c0_3] : memref<32x64xf32, #tpu.memory_space<vmem>>, vector<32x64xf32>
    %cst = arith.constant dense<0.000000e+00> : vector<16x64xf32>
    %3 = tpu.matmul %1, %2, %cst {dimension_numbers = #tpu.dot_dimension_numbers<[1], [0], [0], [1], [0, 0, 1, 1], [], []>} : vector<16x32xf32>, vector<32x64xf32>, vector<16x64xf32> -> vector<16x64xf32>
    %4 = vector.extract_strided_slice %3 {offsets = [0, 0], sizes = [16, 32], strides = [1, 1]} : vector<16x64xf32> to vector<16x32xf32>
    %c0_4 = arith.constant 0 : index
    %c0_5 = arith.constant 0 : index
    %5 = vector.load %arg3[%c0_4, %c0_5] : memref<1x32xf32, #tpu.memory_space<vmem>>, vector<1x32xf32>
    %6 = vector.broadcast %5 : vector<1x32xf32> to vector<16x32xf32>
    %7 = arith.addf %4, %6 : vector<16x32xf32>
    %8 = vector.shape_cast %7 : vector<16x32xf32> to vector<2x8x32xf32>
    %9 = vector.extract_strided_slice %3 {offsets = [0, 32], sizes = [16, 32], strides = [1, 1]} : vector<16x64xf32> to vector<16x32xf32>
    %10 = vector.shape_cast %9 : vector<16x32xf32> to vector<2x8x32xf32>
    %c0_6 = arith.constant 0 : index
    %c0_7 = arith.constant 0 : index
    %11 = vector.load %arg4[%c0_6, %c0_7] : memref<1x32xf32, #tpu.memory_space<vmem>>, vector<1x32xf32>
    %12 = vector.shape_cast %11 : vector<1x32xf32> to vector<1x1x1x32xf32>
    %c0_8 = arith.constant 0 : index
    %c0_9 = arith.constant 0 : index
    %13 = vector.load %arg5[%c0_8, %c0_9] : memref<8x8xf32, #tpu.memory_space<vmem>>, vector<8x8xf32>
    %c0_10 = arith.constant 0 : index
    %c0_11 = arith.constant 0 : index
    %14 = vector.load %arg6[%c0_10, %c0_11] : memref<8x8xf32, #tpu.memory_space<vmem>>, vector<8x8xf32>
    %15 = vector.shape_cast %8 : vector<2x8x32xf32> to vector<2x8x1x32xf32>
    %16 = vector.shape_cast %10 : vector<2x8x32xf32> to vector<2x1x8x32xf32>
    %17 = vector.broadcast %15 : vector<2x8x1x32xf32> to vector<2x8x8x32xf32>
    %18 = vector.broadcast %16 : vector<2x1x8x32xf32> to vector<2x8x8x32xf32>
    %19 = arith.addf %17, %18 : vector<2x8x8x32xf32>
    %20 = math.tanh %19 : vector<2x8x8x32xf32>
    %21 = vector.broadcast %12 : vector<1x1x1x32xf32> to vector<2x8x8x32xf32>
    %22 = arith.mulf %20, %21 : vector<2x8x8x32xf32>
    %cst_12 = arith.constant dense<0.000000e+00> : vector<2x8x8xf32>
    %23 = vector.multi_reduction <add>, %22, %cst_12 [3] : vector<2x8x8x32xf32> to vector<2x8x8xf32>
    %24 = vector.shape_cast %13 : vector<8x8xf32> to vector<1x8x8xf32>
    %25 = vector.broadcast %24 : vector<1x8x8xf32> to vector<2x8x8xf32>
    %26 = arith.mulf %23, %25 : vector<2x8x8xf32>
    %27 = vector.shape_cast %14 : vector<8x8xf32> to vector<1x8x8xf32>
    %28 = vector.broadcast %27 : vector<1x8x8xf32> to vector<2x8x8xf32>
    %29 = arith.addf %26, %28 : vector<2x8x8xf32>
    %cst_13 = arith.constant dense<0xFF800000> : vector<2x8xf32>
    %30 = vector.multi_reduction <maximumf>, %29, %cst_13 [2] : vector<2x8x8xf32> to vector<2x8xf32>
    %31 = vector.shape_cast %30 : vector<2x8xf32> to vector<2x8x1xf32>
    %32 = vector.broadcast %31 : vector<2x8x1xf32> to vector<2x8x8xf32>
    %33 = arith.subf %29, %32 : vector<2x8x8xf32>
    %34 = math.exp %33 : vector<2x8x8xf32>
    %cst_14 = arith.constant dense<0.000000e+00> : vector<2x8xf32>
    %35 = vector.multi_reduction <add>, %34, %cst_14 [2] : vector<2x8x8xf32> to vector<2x8xf32>
    %36 = vector.shape_cast %35 : vector<2x8xf32> to vector<2x8x1xf32>
    %cst_15 = arith.constant 1.000000e+00 : f32
    %37 = vector.broadcast %cst_15 : f32 to vector<2x8x1xf32>
    %38 = arith.divf %37, %36 : vector<2x8x1xf32>
    %39 = vector.broadcast %38 : vector<2x8x1xf32> to vector<2x8x8xf32>
    %40 = arith.mulf %34, %39 : vector<2x8x8xf32>
    "tpu.trace_start"() <{level = 10 : i32, message = "bql,ble->bqe"}> : () -> ()
    %cst_16 = arith.constant dense<0.000000e+00> : vector<2x8x32xf32>
    %41 = tpu.matmul %40, %0, %cst_16 {dimension_numbers = #tpu.dot_dimension_numbers<[2], [1], [1], [2], [0, 0, 0, 1, 1, 2], [0], [0]>} : vector<2x8x8xf32>, vector<2x8x32xf32>, vector<2x8x32xf32> -> vector<2x8x32xf32>
    "tpu.trace_stop"() : () -> ()
    %42 = tpu.concatenate %0, %41 in 2 : vector<2x8x32xf32>, vector<2x8x32xf32> -> vector<2x8x64xf32>
    %cst_17 = arith.constant 0.000000e+00 : f32
    %43 = vector.broadcast %cst_17 : f32 to vector<2x2x64xf32>
    %44 = tpu.concatenate %42, %43 in 1 : vector<2x8x64xf32>, vector<2x2x64xf32> -> vector<2x10x64xf32>
    %c0_18 = arith.constant 0 : index
    %c0_19 = arith.constant 0 : index
    %45 = vector.load %arg8[%c0_18, %c0_19] : memref<6x48xf32, #tpu.memory_space<vmem>>, vector<6x48xf32>
    %46 = vector.shape_cast %45 : vector<6x48xf32> to vector<1x6x48xf32>
    %47 = vector.extract_strided_slice %44 {offsets = [0, 0, 0], sizes = [2, 6, 64], strides = [1, 1, 1]} : vector<2x10x64xf32> to vector<2x6x64xf32>
    %48 = vector.shape_cast %47 : vector<2x6x64xf32> to vector<12x64xf32>
    %c0_20 = arith.constant 0 : index
    %c0_21 = arith.constant 0 : index
    %c0_22 = arith.constant 0 : index
    %49 = vector.load %arg7[%c0_20, %c0_21, %c0_22] : memref<5x64x48xf32, #tpu.memory_space<vmem>>, vector<1x64x48xf32>
    %50 = vector.shape_cast %49 : vector<1x64x48xf32> to vector<64x48xf32>
    %cst_23 = arith.constant dense<0.000000e+00> : vector<12x48xf32>
    %51 = tpu.matmul %48, %50, %cst_23 {dimension_numbers = #tpu.dot_dimension_numbers<[1], [0], [0], [1], [0, 0, 1, 1], [], []>} : vector<12x64xf32>, vector<64x48xf32>, vector<12x48xf32> -> vector<12x48xf32>
    %52 = vector.shape_cast %51 : vector<12x48xf32> to vector<2x6x48xf32>
    %53 = vector.broadcast %46 : vector<1x6x48xf32> to vector<2x6x48xf32>
    %54 = arith.addf %53, %52 : vector<2x6x48xf32>
    %55 = vector.extract_strided_slice %44 {offsets = [0, 1, 0], sizes = [2, 6, 64], strides = [1, 1, 1]} : vector<2x10x64xf32> to vector<2x6x64xf32>
    %56 = vector.shape_cast %55 : vector<2x6x64xf32> to vector<12x64xf32>
    %c1 = arith.constant 1 : index
    %c0_24 = arith.constant 0 : index
    %c0_25 = arith.constant 0 : index
    %57 = vector.load %arg7[%c1, %c0_24, %c0_25] : memref<5x64x48xf32, #tpu.memory_space<vmem>>, vector<1x64x48xf32>
    %58 = vector.shape_cast %57 : vector<1x64x48xf32> to vector<64x48xf32>
    %cst_26 = arith.constant dense<0.000000e+00> : vector<12x48xf32>
    %59 = tpu.matmul %56, %58, %cst_26 {dimension_numbers = #tpu.dot_dimension_numbers<[1], [0], [0], [1], [0, 0, 1, 1], [], []>} : vector<12x64xf32>, vector<64x48xf32>, vector<12x48xf32> -> vector<12x48xf32>
    %60 = vector.shape_cast %59 : vector<12x48xf32> to vector<2x6x48xf32>
    %61 = arith.addf %54, %60 : vector<2x6x48xf32>
    %62 = vector.extract_strided_slice %44 {offsets = [0, 2, 0], sizes = [2, 6, 64], strides = [1, 1, 1]} : vector<2x10x64xf32> to vector<2x6x64xf32>
    %63 = vector.shape_cast %62 : vector<2x6x64xf32> to vector<12x64xf32>
    %c2 = arith.constant 2 : index
    %c0_27 = arith.constant 0 : index
    %c0_28 = arith.constant 0 : index
    %64 = vector.load %arg7[%c2, %c0_27, %c0_28] : memref<5x64x48xf32, #tpu.memory_space<vmem>>, vector<1x64x48xf32>
    %65 = vector.shape_cast %64 : vector<1x64x48xf32> to vector<64x48xf32>
    %cst_29 = arith.constant dense<0.000000e+00> : vector<12x48xf32>
    %66 = tpu.matmul %63, %65, %cst_29 {dimension_numbers = #tpu.dot_dimension_numbers<[1], [0], [0], [1], [0, 0, 1, 1], [], []>} : vector<12x64xf32>, vector<64x48xf32>, vector<12x48xf32> -> vector<12x48xf32>
    %67 = vector.shape_cast %66 : vector<12x48xf32> to vector<2x6x48xf32>
    %68 = arith.addf %61, %67 : vector<2x6x48xf32>
    %69 = vector.extract_strided_slice %44 {offsets = [0, 3, 0], sizes = [2, 6, 64], strides = [1, 1, 1]} : vector<2x10x64xf32> to vector<2x6x64xf32>
    %70 = vector.shape_cast %69 : vector<2x6x64xf32> to vector<12x64xf32>
    %c3 = arith.constant 3 : index
    %c0_30 = arith.constant 0 : index
    %c0_31 = arith.constant 0 : index
    %71 = vector.load %arg7[%c3, %c0_30, %c0_31] : memref<5x64x48xf32, #tpu.memory_space<vmem>>, vector<1x64x48xf32>
    %72 = vector.shape_cast %71 : vector<1x64x48xf32> to vector<64x48xf32>
    %cst_32 = arith.constant dense<0.000000e+00> : vector<12x48xf32>
    %73 = tpu.matmul %70, %72, %cst_32 {dimension_numbers = #tpu.dot_dimension_numbers<[1], [0], [0], [1], [0, 0, 1, 1], [], []>} : vector<12x64xf32>, vector<64x48xf32>, vector<12x48xf32> -> vector<12x48xf32>
    %74 = vector.shape_cast %73 : vector<12x48xf32> to vector<2x6x48xf32>
    %75 = arith.addf %68, %74 : vector<2x6x48xf32>
    %76 = vector.extract_strided_slice %44 {offsets = [0, 4, 0], sizes = [2, 6, 64], strides = [1, 1, 1]} : vector<2x10x64xf32> to vector<2x6x64xf32>
    %77 = vector.shape_cast %76 : vector<2x6x64xf32> to vector<12x64xf32>
    %c4 = arith.constant 4 : index
    %c0_33 = arith.constant 0 : index
    %c0_34 = arith.constant 0 : index
    %78 = vector.load %arg7[%c4, %c0_33, %c0_34] : memref<5x64x48xf32, #tpu.memory_space<vmem>>, vector<1x64x48xf32>
    %79 = vector.shape_cast %78 : vector<1x64x48xf32> to vector<64x48xf32>
    %cst_35 = arith.constant dense<0.000000e+00> : vector<12x48xf32>
    %80 = tpu.matmul %77, %79, %cst_35 {dimension_numbers = #tpu.dot_dimension_numbers<[1], [0], [0], [1], [0, 0, 1, 1], [], []>} : vector<12x64xf32>, vector<64x48xf32>, vector<12x48xf32> -> vector<12x48xf32>
    %81 = vector.shape_cast %80 : vector<12x48xf32> to vector<2x6x48xf32>
    %82 = arith.addf %75, %81 : vector<2x6x48xf32>
    %cst_36 = arith.constant dense<0xFF800000> : vector<2x48xf32>
    %83 = vector.multi_reduction <maximumf>, %82, %cst_36 [1] : vector<2x6x48xf32> to vector<2x48xf32>
    %c0_37 = arith.constant 0 : index
    %c0_38 = arith.constant 0 : index
    %84 = vector.load %arg9[%c0_37, %c0_38] : memref<48x128xf32, #tpu.memory_space<vmem>>, vector<48x128xf32>
    %cst_39 = arith.constant dense<0.000000e+00> : vector<2x128xf32>
    %85 = tpu.matmul %83, %84, %cst_39 {dimension_numbers = #tpu.dot_dimension_numbers<[1], [0], [0], [1], [0, 0, 1, 1], [], []>} : vector<2x48xf32>, vector<48x128xf32>, vector<2x128xf32> -> vector<2x128xf32>
    %c0_40 = arith.constant 0 : index
    %c0_41 = arith.constant 0 : index
    %86 = vector.load %arg10[%c0_40, %c0_41] : memref<1x128xf32, #tpu.memory_space<vmem>>, vector<1x128xf32>
    %87 = vector.broadcast %86 : vector<1x128xf32> to vector<2x128xf32>
    %88 = arith.addf %85, %87 : vector<2x128xf32>
    %c0_42 = arith.constant 0 : index
    %c0_43 = arith.constant 0 : index
    %c0_44 = arith.constant 0 : index
    %89 = vector.load %arg11[%c0_42, %c0_43, %c0_44] : memref<1x2x128xf32, #tpu.memory_space<vmem>>, vector<1x2x128xf32>
    %90 = vector.shape_cast %89 : vector<1x2x128xf32> to vector<2x128xf32>
    %91 = vector.shape_cast %88 : vector<2x128xf32> to vector<1x2x128xf32>
    tpu.vector_store %arg11[%c0_42, %c0_43, %c0_44], %91 {strides = array<i32>} : memref<1x2x128xf32, #tpu.memory_space<vmem>>, vector<1x2x128xf32>,
    return
  }
  func.func @transform_0(%arg0: i32) -> (i32, i32, i32) {
    %c0_i32 = arith.constant 0 : i32
    %c0_i32_0 = arith.constant 0 : i32
    %c0_i32_1 = arith.constant 0 : i32
    return %arg0, %c0_i32, %c0_i32_0 : i32, i32, i32
  }
  func.func @transform_1(%arg0: i32) -> (i32, i32) {
    %c0_i32 = arith.constant 0 : i32
    %c0_i32_0 = arith.constant 0 : i32
    %c0_i32_1 = arith.constant 0 : i32
    return %c0_i32, %c0_i32_0 : i32, i32
  }
  func.func @transform_2(%arg0: i32) -> (i32, i32) {
    %c0_i32 = arith.constant 0 : i32
    %c0_i32_0 = arith.constant 0 : i32
    %c0_i32_1 = arith.constant 0 : i32
    return %c0_i32, %c0_i32_0 : i32, i32
  }
  func.func @transform_3(%arg0: i32) -> (i32, i32) {
    %c0_i32 = arith.constant 0 : i32
    %c0_i32_0 = arith.constant 0 : i32
    %c0_i32_1 = arith.constant 0 : i32
    return %c0_i32, %c0_i32_0 : i32, i32
  }
  func.func @transform_4(%arg0: i32) -> (i32, i32) {
    %c0_i32 = arith.constant 0 : i32
    %c0_i32_0 = arith.constant 0 : i32
    %c0_i32_1 = arith.constant 0 : i32
    return %c0_i32, %c0_i32_0 : i32, i32
  }
  func.func @transform_5(%arg0: i32) -> (i32, i32) {
    %c0_i32 = arith.constant 0 : i32
    %c0_i32_0 = arith.constant 0 : i32
    %c0_i32_1 = arith.constant 0 : i32
    return %c0_i32, %c0_i32_0 : i32, i32
  }
  func.func @transform_6(%arg0: i32) -> (i32, i32, i32) {
    %c0_i32 = arith.constant 0 : i32
    %c0_i32_0 = arith.constant 0 : i32
    %c0_i32_1 = arith.constant 0 : i32
    %c0_i32_2 = arith.constant 0 : i32
    return %c0_i32, %c0_i32_0, %c0_i32_1 : i32, i32, i32
  }
  func.func @transform_7(%arg0: i32) -> (i32, i32) {
    %c0_i32 = arith.constant 0 : i32
    %c0_i32_0 = arith.constant 0 : i32
    %c0_i32_1 = arith.constant 0 : i32
    return %c0_i32, %c0_i32_0 : i32, i32
  }
  func.func @transform_8(%arg0: i32) -> (i32, i32) {
    %c0_i32 = arith.constant 0 : i32
    %c0_i32_0 = arith.constant 0 : i32
    %c0_i32_1 = arith.constant 0 : i32
    return %c0_i32, %c0_i32_0 : i32, i32
  }
  func.func @transform_9(%arg0: i32) -> (i32, i32) {
    %c0_i32 = arith.constant 0 : i32
    %c0_i32_0 = arith.constant 0 : i32
    %c0_i32_1 = arith.constant 0 : i32
    return %c0_i32, %c0_i32_0 : i32, i32
  }
  func.func @transform_10(%arg0: i32) -> (i32, i32, i32) {
    %c0_i32 = arith.constant 0 : i32
    %c0_i32_0 = arith.constant 0 : i32
    %c0_i32_1 = arith.constant 0 : i32
    return %arg0, %c0_i32, %c0_i32_0 : i32, i32, i32
  }
}

module attributes {stable_mosaic.version = 11 : i64} {
  func.func @kernel(%arg0: i32, %arg1: memref<2x8x32xf32, #tpu.memory_space<vmem>>, %arg2: memref<32x64xf32, #tpu.memory_space<vmem>>, %arg3: memref<1x32xf32, #tpu.memory_space<vmem>>, %arg4: memref<1x32xf32, #tpu.memory_space<vmem>>, %arg5: memref<8x8xf32, #tpu.memory_space<vmem>>, %arg6: memref<8x8xf32, #tpu.memory_space<vmem>>, %arg7: memref<5x64x48xf32, #tpu.memory_space<vmem>>, %arg8: memref<6x48xf32, #tpu.memory_space<vmem>>, %arg9: memref<48x128xf32, #tpu.memory_space<vmem>>, %arg10: memref<1x128xf32, #tpu.memory_space<vmem>>, %arg11: memref<1x2x128xf32, #tpu.memory_space<vmem>>) attributes {dimension_semantics = [#tpu.dimension_semantics<parallel>], iteration_bounds = array<i64: 1>, scalar_prefetch = 0 : i64, scratch_operands = 0 : i64, tpu.core_type = #tpu.core_type<tc>, window_params = [{transform_indices = @transform_0, window_bounds = array<i64: 2, 8, 32>}, {pipeline_mode = #tpu.pipeline_mode<synchronous>, transform_indices = @transform_1, window_bounds = array<i64: 32, 64>}, {pipeline_mode = #tpu.pipeline_mode<synchronous>, transform_indices = @transform_2, window_bounds = array<i64: 1, 32>}, {pipeline_mode = #tpu.pipeline_mode<synchronous>, transform_indices = @transform_3, window_bounds = array<i64: 1, 32>}, {pipeline_mode = #tpu.pipeline_mode<synchronous>, transform_indices = @transform_4, window_bounds = array<i64: 8, 8>}, {pipeline_mode = #tpu.pipeline_mode<synchronous>, transform_indices = @transform_5, window_bounds = array<i64: 8, 8>}, {pipeline_mode = #tpu.pipeline_mode<synchronous>, transform_indices = @transform_6, window_bounds = array<i64: 5, 64, 48>}, {pipeline_mode = #tpu.pipeline_mode<synchronous>, transform_indices = @transform_7, window_bounds = array<i64: 6, 48>}, {pipeline_mode = #tpu.pipeline_mode<synchronous>, transform_indices = @transform_8, window_bounds = array<i64: 48, 128>}, {pipeline_mode = #tpu.pipeline_mode<synchronous>, transform_indices = @transform_9, window_bounds = array<i64: 1, 128>}, {transform_indices = @transform_10, window_bounds = array<i64: 1, 2, 128>}]} {
    %c0 = arith.constant 0 : index
    %c0_0 = arith.constant 0 : index
    %c0_1 = arith.constant 0 : index
    %0 = vector.load %arg1[%c0, %c0_0, %c0_1] : memref<2x8x32xf32, #tpu.memory_space<vmem>>, vector<2x8x32xf32>
    %1 = vector.shape_cast %0 : vector<2x8x32xf32> to vector<16x32xf32>
    %c0_2 = arith.constant 0 : index
    %c0_3 = arith.constant 0 : index
    %2 = vector.load %arg2[%c0_2, %c0_3] : memref<32x64xf32, #tpu.memory_space<vmem>>, vector<32x64xf32>
    %cst = arith.constant dense<0.000000e+00> : vector<16x64xf32>
    %3 = tpu.matmul %1, %2, %cst {dimension_numbers = #tpu.dot_dimension_numbers<[1], [0], [0], [1], [0, 0, 1, 1], [], []>} : vector<16x32xf32>, vector<32x64xf32>, vector<16x64xf32> -> vector<16x64xf32>
    %4 = vector.extract_strided_slice %3 {offsets = [0, 0], sizes = [16, 32], strides = [1, 1]} : vector<16x64xf32> to vector<16x32xf32>
    %c0_4 = arith.constant 0 : index
    %c0_5 = arith.constant 0 : index
    %5 = vector.load %arg3[%c0_4, %c0_5] : memref<1x32xf32, #tpu.memory_space<vmem>>, vector<1x32xf32>
    %6 = vector.broadcast %5 : vector<1x32xf32> to vector<16x32xf32>
    %7 = arith.addf %4, %6 : vector<16x32xf32>
    %8 = vector.shape_cast %7 : vector<16x32xf32> to vector<2x8x32xf32>
    %9 = vector.extract_strided_slice %3 {offsets = [0, 32], sizes = [16, 32], strides = [1, 1]} : vector<16x64xf32> to vector<16x32xf32>
    %10 = vector.shape_cast %9 : vector<16x32xf32> to vector<2x8x32xf32>
    %c0_6 = arith.constant 0 : index
    %c0_7 = arith.constant 0 : index
    %11 = vector.load %arg4[%c0_6, %c0_7] : memref<1x32xf32, #tpu.memory_space<vmem>>, vector<1x32xf32>
    %12 = vector.shape_cast %11 : vector<1x32xf32> to vector<1x1x1x32xf32>
    %c0_8 = arith.constant 0 : index
    %c0_9 = arith.constant 0 : index
    %13 = vector.load %arg5[%c0_8, %c0_9] : memref<8x8xf32, #tpu.memory_space<vmem>>, vector<8x8xf32>
    %c0_10 = arith.constant 0 : index
    %c0_11 = arith.constant 0 : index
    %14 = vector.load %arg6[%c0_10, %c0_11] : memref<8x8xf32, #tpu.memory_space<vmem>>, vector<8x8xf32>
    %15 = vector.shape_cast %8 : vector<2x8x32xf32> to vector<2x8x1x32xf32>
    %16 = vector.shape_cast %10 : vector<2x8x32xf32> to vector<2x1x8x32xf32>
    %17 = vector.broadcast %15 : vector<2x8x1x32xf32> to vector<2x8x8x32xf32>
    %18 = vector.broadcast %16 : vector<2x1x8x32xf32> to vector<2x8x8x32xf32>
    %19 = arith.addf %17, %18 : vector<2x8x8x32xf32>
    %20 = math.tanh %19 : vector<2x8x8x32xf32>
    %21 = vector.broadcast %12 : vector<1x1x1x32xf32> to vector<2x8x8x32xf32>
    %22 = arith.mulf %20, %21 : vector<2x8x8x32xf32>
    %cst_12 = arith.constant dense<0.000000e+00> : vector<2x8x8xf32>
    %23 = vector.multi_reduction <add>, %22, %cst_12 [3] : vector<2x8x8x32xf32> to vector<2x8x8xf32>
    %24 = vector.shape_cast %13 : vector<8x8xf32> to vector<1x8x8xf32>
    %25 = vector.broadcast %24 : vector<1x8x8xf32> to vector<2x8x8xf32>
    %26 = arith.mulf %23, %25 : vector<2x8x8xf32>
    %27 = vector.shape_cast %14 : vector<8x8xf32> to vector<1x8x8xf32>
    %28 = vector.broadcast %27 : vector<1x8x8xf32> to vector<2x8x8xf32>
    %29 = arith.addf %26, %28 : vector<2x8x8xf32>
    %cst_13 = arith.constant dense<0xFF800000> : vector<2x8xf32>
    %30 = vector.multi_reduction <maximumf>, %29, %cst_13 [2] : vector<2x8x8xf32> to vector<2x8xf32>
    %31 = vector.shape_cast %30 : vector<2x8xf32> to vector<2x8x1xf32>
    %32 = vector.broadcast %31 : vector<2x8x1xf32> to vector<2x8x8xf32>
    %33 = arith.subf %29, %32 : vector<2x8x8xf32>
    %34 = math.exp %33 : vector<2x8x8xf32>
    %cst_14 = arith.constant dense<0.000000e+00> : vector<2x8xf32>
    %35 = vector.multi_reduction <add>, %34, %cst_14 [2] : vector<2x8x8xf32> to vector<2x8xf32>
    %36 = vector.shape_cast %35 : vector<2x8xf32> to vector<2x8x1xf32>
    %cst_15 = arith.constant 1.000000e+00 : f32
    %37 = vector.broadcast %cst_15 : f32 to vector<2x8x1xf32>
    %38 = arith.divf %37, %36 : vector<2x8x1xf32>
    %39 = vector.broadcast %38 : vector<2x8x1xf32> to vector<2x8x8xf32>
    %40 = arith.mulf %34, %39 : vector<2x8x8xf32>
    "tpu.trace_start"() <{level = 10 : i32, message = "bql,ble->bqe"}> : () -> ()
    %cst_16 = arith.constant dense<0.000000e+00> : vector<2x8x32xf32>
    %41 = tpu.matmul %40, %0, %cst_16 {dimension_numbers = #tpu.dot_dimension_numbers<[2], [1], [1], [2], [0, 0, 0, 1, 1, 2], [0], [0]>} : vector<2x8x8xf32>, vector<2x8x32xf32>, vector<2x8x32xf32> -> vector<2x8x32xf32>
    "tpu.trace_stop"() : () -> ()
    %42 = tpu.concatenate %0, %41 in 2 : vector<2x8x32xf32>, vector<2x8x32xf32> -> vector<2x8x64xf32>
    %cst_17 = arith.constant 0.000000e+00 : f32
    %43 = vector.broadcast %cst_17 : f32 to vector<2x2x64xf32>
    %44 = tpu.concatenate %42, %43 in 1 : vector<2x8x64xf32>, vector<2x2x64xf32> -> vector<2x10x64xf32>
    %c0_18 = arith.constant 0 : index
    %c0_19 = arith.constant 0 : index
    %45 = vector.load %arg8[%c0_18, %c0_19] : memref<6x48xf32, #tpu.memory_space<vmem>>, vector<6x48xf32>
    %46 = vector.shape_cast %45 : vector<6x48xf32> to vector<1x6x48xf32>
    %47 = vector.extract_strided_slice %44 {offsets = [0, 0, 0], sizes = [2, 6, 64], strides = [1, 1, 1]} : vector<2x10x64xf32> to vector<2x6x64xf32>
    %48 = vector.shape_cast %47 : vector<2x6x64xf32> to vector<12x64xf32>
    %c0_20 = arith.constant 0 : index
    %c0_21 = arith.constant 0 : index
    %c0_22 = arith.constant 0 : index
    %49 = vector.load %arg7[%c0_20, %c0_21, %c0_22] : memref<5x64x48xf32, #tpu.memory_space<vmem>>, vector<1x64x48xf32>
    %50 = vector.shape_cast %49 : vector<1x64x48xf32> to vector<64x48xf32>
    %cst_23 = arith.constant dense<0.000000e+00> : vector<12x48xf32>
    %51 = tpu.matmul %48, %50, %cst_23 {dimension_numbers = #tpu.dot_dimension_numbers<[1], [0], [0], [1], [0, 0, 1, 1], [], []>} : vector<12x64xf32>, vector<64x48xf32>, vector<12x48xf32> -> vector<12x48xf32>
    %52 = vector.shape_cast %51 : vector<12x48xf32> to vector<2x6x48xf32>
    %53 = vector.broadcast %46 : vector<1x6x48xf32> to vector<2x6x48xf32>
    %54 = arith.addf %53, %52 : vector<2x6x48xf32>
    %55 = vector.extract_strided_slice %44 {offsets = [0, 1, 0], sizes = [2, 6, 64], strides = [1, 1, 1]} : vector<2x10x64xf32> to vector<2x6x64xf32>
    %56 = vector.shape_cast %55 : vector<2x6x64xf32> to vector<12x64xf32>
    %c1 = arith.constant 1 : index
    %c0_24 = arith.constant 0 : index
    %c0_25 = arith.constant 0 : index
    %57 = vector.load %arg7[%c1, %c0_24, %c0_25] : memref<5x64x48xf32, #tpu.memory_space<vmem>>, vector<1x64x48xf32>
    %58 = vector.shape_cast %57 : vector<1x64x48xf32> to vector<64x48xf32>
    %cst_26 = arith.constant dense<0.000000e+00> : vector<12x48xf32>
    %59 = tpu.matmul %56, %58, %cst_26 {dimension_numbers = #tpu.dot_dimension_numbers<[1], [0], [0], [1], [0, 0, 1, 1], [], []>} : vector<12x64xf32>, vector<64x48xf32>, vector<12x48xf32> -> vector<12x48xf32>
    %60 = vector.shape_cast %59 : vector<12x48xf32> to vector<2x6x48xf32>
    %61 = arith.addf %54, %60 : vector<2x6x48xf32>
    %62 = vector.extract_strided_slice %44 {offsets = [0, 2, 0], sizes = [2, 6, 64], strides = [1, 1, 1]} : vector<2x10x64xf32> to vector<2x6x64xf32>
    %63 = vector.shape_cast %62 : vector<2x6x64xf32> to vector<12x64xf32>
    %c2 = arith.constant 2 : index
    %c0_27 = arith.constant 0 : index
    %c0_28 = arith.constant 0 : index
    %64 = vector.load %arg7[%c2, %c0_27, %c0_28] : memref<5x64x48xf32, #tpu.memory_space<vmem>>, vector<1x64x48xf32>
    %65 = vector.shape_cast %64 : vector<1x64x48xf32> to vector<64x48xf32>
    %cst_29 = arith.constant dense<0.000000e+00> : vector<12x48xf32>
    %66 = tpu.matmul %63, %65, %cst_29 {dimension_numbers = #tpu.dot_dimension_numbers<[1], [0], [0], [1], [0, 0, 1, 1], [], []>} : vector<12x64xf32>, vector<64x48xf32>, vector<12x48xf32> -> vector<12x48xf32>
    %67 = vector.shape_cast %66 : vector<12x48xf32> to vector<2x6x48xf32>
    %68 = arith.addf %61, %67 : vector<2x6x48xf32>
    %69 = vector.extract_strided_slice %44 {offsets = [0, 3, 0], sizes = [2, 6, 64], strides = [1, 1, 1]} : vector<2x10x64xf32> to vector<2x6x64xf32>
    %70 = vector.shape_cast %69 : vector<2x6x64xf32> to vector<12x64xf32>
    %c3 = arith.constant 3 : index
    %c0_30 = arith.constant 0 : index
    %c0_31 = arith.constant 0 : index
    %71 = vector.load %arg7[%c3, %c0_30, %c0_31] : memref<5x64x48xf32, #tpu.memory_space<vmem>>, vector<1x64x48xf32>
    %72 = vector.shape_cast %71 : vector<1x64x48xf32> to vector<64x48xf32>
    %cst_32 = arith.constant dense<0.000000e+00> : vector<12x48xf32>
    %73 = tpu.matmul %70, %72, %cst_32 {dimension_numbers = #tpu.dot_dimension_numbers<[1], [0], [0], [1], [0, 0, 1, 1], [], []>} : vector<12x64xf32>, vector<64x48xf32>, vector<12x48xf32> -> vector<12x48xf32>
    %74 = vector.shape_cast %73 : vector<12x48xf32> to vector<2x6x48xf32>
    %75 = arith.addf %68, %74 : vector<2x6x48xf32>
    %76 = vector.extract_strided_slice %44 {offsets = [0, 4, 0], sizes = [2, 6, 64], strides = [1, 1, 1]} : vector<2x10x64xf32> to vector<2x6x64xf32>
    %77 = vector.shape_cast %76 : vector<2x6x64xf32> to vector<12x64xf32>
    %c4 = arith.constant 4 : index
    %c0_33 = arith.constant 0 : index
    %c0_34 = arith.constant 0 : index
    %78 = vector.load %arg7[%c4, %c0_33, %c0_34] : memref<5x64x48xf32, #tpu.memory_space<vmem>>, vector<1x64x48xf32>
    %79 = vector.shape_cast %78 : vector<1x64x48xf32> to vector<64x48xf32>
    %cst_35 = arith.constant dense<0.000000e+00> : vector<12x48xf32>
    %80 = tpu.matmul %77, %79, %cst_35 {dimension_numbers = #tpu.dot_dimension_numbers<[1], [0], [0], [1], [0, 0, 1, 1], [], []>} : vector<12x64xf32>, vector<64x48xf32>, vector<12x48xf32> -> vector<12x48xf32>
    %81 = vector.shape_cast %80 : vector<12x48xf32> to vector<2x6x48xf32>
    %82 = arith.addf %75, %81 : vector<2x6x48xf32>
    %cst_36 = arith.constant dense<0xFF800000> : vector<2x48xf32>
    %83 = vector.multi_reduction <maximumf>, %82, %cst_36 [1] : vector<2x6x48xf32> to vector<2x48xf32>
    %c0_37 = arith.constant 0 : index
    %c0_38 = arith.constant 0 : index
    %84 = vector.load %arg9[%c0_37, %c0_38] : memref<48x128xf32, #tpu.memory_space<vmem>>, vector<48x128xf32>
    %cst_39 = arith.constant dense<0.000000e+00> : vector<2x128xf32>
    %85 = tpu.matmul %83, %84, %cst_39 {dimension_numbers = #tpu.dot_dimension_numbers<[1], [0], [0], [1], [0, 0, 1, 1], [], []>} : vector<2x48xf32>, vector<48x128xf32>, vector<2x128xf32> -> vector<2x128xf32>
    %c0_40 = arith.constant 0 : index
    %c0_41 = arith.constant 0 : index
    %86 = vector.load %arg10[%c0_40, %c0_41] : memref<1x128xf32, #tpu.memory_space<vmem>>, vector<1x128xf32>
    %87 = vector.broadcast %86 : vector<1x128xf32> to vector<2x128xf32>
    %88 = arith.addf %85, %87 : vector<2x128xf32>
    %c0_42 = arith.constant 0 : index
    %c0_43 = arith.constant 0 : index
    %c0_44 = arith.constant 0 : index
    %89 = vector.load %arg11[%c0_42, %c0_43, %c0_44] : memref<1x2x128xf32, #tpu.memory_space<vmem>>, vector<1x2x128xf32>
    %90 = vector.shape_cast %89 : vector<1x2x128xf32> to vector<2x128xf32>
    %91 = vector.shape_cast %88 : vector<2x128xf32> to vector<1x2x128xf32>
    tpu.vector_store %arg11[%c0_42, %c0_43, %c0_44], %91 {strides = array<i32>} : memref<1x2x128xf32, #tpu.memory_space<vmem>>, vector<1x2x128xf32>,
    return
  }
  func.func @transform_0(%arg0: i32) -> (i32, i32, i32) {
    %c0_i32 = arith.constant 0 : i32
    %c0_i32_0 = arith.constant 0 : i32
    %c0_i32_1 = arith.constant 0 : i32
    return %arg0, %c0_i32, %c0_i32_0 : i32, i32, i32
  }
  func.func @transform_1(%arg0: i32) -> (i32, i32) {
    %c0_i32 = arith.constant 0 : i32
    %c0_i32_0 = arith.constant 0 : i32
    %c0_i32_1 = arith.constant 0 : i32
    return %c0_i32, %c0_i32_0 : i32, i32
  }
  func.func @transform_2(%arg0: i32) -> (i32, i32) {
    %c0_i32 = arith.constant 0 : i32
    %c0_i32_0 = arith.constant 0 : i32
    %c0_i32_1 = arith.constant 0 : i32
    return %c0_i32, %c0_i32_0 : i32, i32
  }
  func.func @transform_3(%arg0: i32) -> (i32, i32) {
    %c0_i32 = arith.constant 0 : i32
    %c0_i32_0 = arith.constant 0 : i32
    %c0_i32_1 = arith.constant 0 : i32
    return %c0_i32, %c0_i32_0 : i32, i32
  }
  func.func @transform_4(%arg0: i32) -> (i32, i32) {
    %c0_i32 = arith.constant 0 : i32
    %c0_i32_0 = arith.constant 0 : i32
    %c0_i32_1 = arith.constant 0 : i32
    return %c0_i32, %c0_i32_0 : i32, i32
  }
  func.func @transform_5(%arg0: i32) -> (i32, i32) {
    %c0_i32 = arith.constant 0 : i32
    %c0_i32_0 = arith.constant 0 : i32
    %c0_i32_1 = arith.constant 0 : i32
    return %c0_i32, %c0_i32_0 : i32, i32
  }
  func.func @transform_6(%arg0: i32) -> (i32, i32, i32) {
    %c0_i32 = arith.constant 0 : i32
    %c0_i32_0 = arith.constant 0 : i32
    %c0_i32_1 = arith.constant 0 : i32
    %c0_i32_2 = arith.constant 0 : i32
    return %c0_i32, %c0_i32_0, %c0_i32_1 : i32, i32, i32
  }
  func.func @transform_7(%arg0: i32) -> (i32, i32) {
    %c0_i32 = arith.constant 0 : i32
    %c0_i32_0 = arith.constant 0 : i32
    %c0_i32_1 = arith.constant 0 : i32
    return %c0_i32, %c0_i32_0 : i32, i32
  }
  func.func @transform_8(%arg0: i32) -> (i32, i32) {
    %c0_i32 = arith.constant 0 : i32
    %c0_i32_0 = arith.constant 0 : i32
    %c0_i32_1 = arith.constant 0 : i32
    return %c0_i32, %c0_i32_0 : i32, i32
  }
  func.func @transform_9(%arg0: i32) -> (i32, i32) {
    %c0_i32 = arith.constant 0 : i32
    %c0_i32_0 = arith.constant 0 : i32
    %c0_i32_1 = arith.constant 0 : i32
    return %c0_i32, %c0_i32_0 : i32, i32
  }
  func.func @transform_10(%arg0: i32) -> (i32, i32, i32) {
    %c0_i32 = arith.constant 0 : i32
    %c0_i32_0 = arith.constant 0 : i32
    %c0_i32_1 = arith.constant 0 : i32
    return %arg0, %c0_i32, %c0_i32_0 : i32, i32, i32
  }
}

</mosaic_0001>

<bundles_post_ra>
// kernel: tpu_custom_call.1
= control target key start
LH: loop header
LB: loop body
LE: loop exit
PB: predicated region body
PF: predicated region fallthrough
CT: control target
= control target key end

     0   :  { %vm42_vm0 = vcmask 261120   ;;  %s3660_s0 = inlined_call_operand.vmem [shape: f32[2,8,32], index: 0, kind: input, shape index: {}]   ;;  %s3661_s1 = inlined_call_operand.vmem [shape: f32[32,64], index: 1, kind: input, shape index: {}]   ;;  %s3662_s2 = inlined_call_operand.vmem [shape: f32[1,32], index: 2, kind: input, shape index: {}]   ;;  %s3663_s3 = inlined_call_operand.vmem [shape: f32[1,32], index: 3, kind: input, shape index: {}]   ;;  %s3664_s4 = inlined_call_operand.vmem [shape: f32[8,8], index: 4, kind: input, shape index: {}]   ;;  %s3665_s5 = inlined_call_operand.vmem [shape: f32[8,8], index: 5, kind: input, shape index: {}]   ;;  %s3666_s6 = inlined_call_operand.vmem [shape: f32[5,64,48], index: 6, kind: input, shape index: {}]   ;;  %s3667_s7 = inlined_call_operand.vmem [shape: f32[6,48], index: 7, kind: input, shape index: {}]   ;;  %s3668_s8 = inlined_call_operand.vmem [shape: f32[48,128], index: 8, kind: input, shape index: {}]   ;;  %s3669_s9 = inlined_call_operand.vmem [shape: f32[1,128], index: 9, kind: input, shape index: {}]   ;;  %s3670_s10 = inlined_call_operand.hbm [shape: f32[1,2,128], index: 10, kind: output, shape index: {}]  }
   0x1   :  { %v41_v0 = vld [vmem:[%s3661_s1 + $0x18] sm:$0xff]  ;;  %v40_v1 = vld [vmem:[%s3661_s1 + $0x10] sm:$0xff]  ;;  %v36_v2 = vld [vmem:[%s3660_s0] sm:$0xff] }
   0x2   :  { %2619 = vmatprep.subr.mxu0 %v41_v0  ;;  %v39_v3 = vld [vmem:[%s3661_s1 + $0x8] sm:$0xff]  ;;  %2627 = vmatprep.mubr.msk.f32.mxu0 %vm42_vm0, %v36_v2 }
   0x3   :  { %2620 = vmatpush3.msra.mxu0 %v41_v0 }
   0x4   :  { %15 = vsyncpa [#allocation3], 0  ;;  %2621 = vmatprep.subr.mxu0 %v40_v1  ;;  %v38_v4 = vld [vmem:[%s3661_s1] sm:$0xff]  ;;  %v37_v5 = vld [vmem:[%s3660_s0 + $0x8] sm:$0xff]  ;;  %v142_v6 = vlaneseq  ;;  %v2852_v26 = vmov 1966171168  }
   0x5   :  { %2622 = vmatpush3.msra.mxu0 %v40_v1  ;;  %v134_v11 = vld [vmem:[%s3664_s4] sm:$0xff]  ;;  %v140_v27 = vunpack.c.l.s4 %v2852_v26  ;;  %s2853_s28 = smov 96   ;;  %vm718_vm1 = vcmask 1041409   ;;  %vm720_vm2 = vcmask 1042434   ;;  %vm722_vm3 = vcmask 1043459   ;;  %s2857_s25 = smov 32  }
   0x6   :  { %2623 = vmatprep.subr.mxu0 %v39_v3  ;;  %v2935_v7 = vshrl.u32 %v142_v6, 7  ;;  %v653_v8 = vand.u32 127, %v142_v6  ;;  %v2961_v18 = vld [vmem:[%s3665_s5] sm:$0xff]  ;;  %vm726_vm4 = vcmask 1045509   ;;  %vm724_vm5 = vcmask 1044484   ;;  %s2859_s27 = smov [#allocation2]  }
   0x7   :  { %2624 = vmatpush3.msra.mxu0 %v39_v3  ;;  %v141_v28 = vunpack.c.0.s8 %v140_v27  ;;  %v2501_v29 = vld [vmem:[%s3662_s2] ss:$0 sm:$0xff]  ;;  %vm728_vm6 = vcmask 1046534   ;;  %vm730_vm7 = vcmask 1047559   ;;  %vm741_vm8 = vcmask 64512   ;;  %s2491_s4 = sshll.u32 %s2859_s27, 4  ;;  %s2492_s4 = int_to_ptr.vmem [resolvable:$true] %s2491_s4 }
   0x8   :  { %2625 = vmatprep.subr.mxu0 %v38_v4  ;;  %v2938_v9 = vsub.s32 0, %v2935_v7  ;;  %v2941_v10 = vsub.s32 %v653_v8, %v2935_v7  ;;  %v2947_v12 = vsub.s32 2, %v2935_v7  ;;  %v2952_v15 = vsub.s32 3, %v2935_v7  ;;  %s2830_s5 = scalar_lea.vmem %s2492_s4, 32  ;;  %p2835_p1 = scmp.lt.s32.totalorder %s2492_s4, %s2492_s4 }
   0x9   :  { %2626 = vmatpush3.msra.mxu0 %v38_v4  ;;  %v2956_v17 = vsub.s32 1, %v2935_v7  ;;  %v2970_v22 = vsub.s32 4, %v2935_v7  ;;  %v2975_v24 = vsub.s32 5, %v2935_v7  ;;  %v2983_v30 = vsub.s32 %v141_v28, %v2935_v7  ;;  %p2831_p0 = scmp.ne.s32.totalorder %s2492_s4, %s2830_s5  ;;  %p2836_p2 = scmp.lt.s32.totalorder %s2830_s5, %s2830_s5 }
   0xa   :  { %2628 = vmatmul.mubr.msk.f32.vlgmr.msra.gmra.mxu0 %vm42_vm0, %v37_v5  ;;  %v430_v13 = vrot.slane %v134_v11, %v2938_v9  ;;  %v444_v14 = vrot.slane %v134_v11, %v2947_v12  ;;  %v451_v16 = vrot.slane %v134_v11, %v2952_v15  ;;  %v525_v20 = vrot.slane %v2961_v18, %v2947_v12 }
   0xb   :  { %v518_v19 = vrot.slane %v2961_v18, %v2956_v17  ;;  %v532_v21 = vrot.slane %v2961_v18, %v2952_v15  ;;  %v539_v23 = vrot.slane %v2961_v18, %v2970_v22  ;;  %v546_v25 = vrot.slane %v2961_v18, %v2975_v24  ;;  %p2837_p3 = por %p2836_p2, %p2835_p1 }
   0xc   :  { %432 = vbcast.lane.b32.xlu1 %v430_v13, 256  ;;  %v437_v42 = vrot.slane %v134_v11, %v2956_v17  ;;  %v511_v44 = vrot.slane %v2961_v18, %v2938_v9  ;;  %v458_v45 = vrot.slane %v134_v11, %v2970_v22  ;;  %v465_v46 = vrot.slane %v134_v11, %v2975_v24 }
   0xd   :  { %v2997_v47 = vsub.s32 6, %v2935_v7  ;;  %v3001_v49 = vsub.s32 7, %v2935_v7  ;;  %vm2856_vm9 = vmmov 0   ;;  %vm1639_vm10 = vcmask 1040384   ;;  %p2838_p4 = pnand %p2837_p3, %p2831_p0 }
   0xe   :  { %vm1640_vm11 = vmor %vm1639_vm10, %vm720_vm2  ;;  %vm1494_vm14 = vcmask 523264   ;;  %vm2380_vm15 = vcmask 390144  }
   0xf   :  { %v472_v48 = vrot.slane %v134_v11, %v2997_v47  ;;  %v479_v50 = vrot.slane %v134_v11, %v3001_v49  ;;  %vm1641_vm12 = vmor %vm1640_vm11, %vm724_vm5 }
  0x10   :  { %446 = vbcast.lane.b32.xlu1 %v444_v14, 256  ;;  %vm3437_vm13 = vmor %vm1641_vm12, %vm728_vm6 }
  0x14   :  { %453 = vbcast.lane.b32.xlu1 %v451_v16, 256 }
  0x18   :  { %520 = vbcast.lane.b32.xlu1 %v518_v19, 256 }
  0x1c   :  { %527 = vbcast.lane.b32.xlu1 %v525_v20, 256 }
  0x20   :  { %534 = vbcast.lane.b32.xlu1 %v532_v21, 256 }
  0x24   :  { %541 = vbcast.lane.b32.xlu1 %v539_v23, 256 }
  0x28   :  { %548 = vbcast.lane.b32.xlu1 %v546_v25, 256 }
  0xca   :  { %v2629_v31 = vpop.f32.mrf.mxu0 }
  0xcb   :  { %v132_v32 = vadd.f32 %v2629_v31, %v2501_v29 }
  0xcc   :  { %v115_v33 = vpop.f32.mrf.mxu0 }
  0xcd   :  { %v187_v34 = vcombine.high %v132_v32, %v132_v32  ;;  %v194_v35 = vrot.slane %v132_v32, %v2983_v30  ;;  %318 = vrot.lane.b32.xlu0 %v115_v33, %s2853_s28  ;;  %v131_v51 = vadd.f32 %v2501_v29, %v115_v33  ;;  %v3023_v29 = vld [vmem:[%s3663_s3] ss:$0 sm:$0xff] }
  0xcf   :  { %v201_v36 = vrot.slane %v187_v34, %v2983_v30  ;;  %v202_v37 = vcombine.high %v194_v35, %v194_v35  ;;  %v210_v38 = vrot.slane %v194_v35, %v2983_v30  ;;  %v145_v52 = vrot.slane %v131_v51, %v2983_v30 }
  0xd0   :  { %v138_v25 = vcombine.high %v131_v51, %v131_v51 }
  0xd1   :  { %v203_v39 = vcombine.high %v201_v36, %v201_v36  ;;  %v217_v40 = vrot.slane %v201_v36, %v2983_v30  ;;  %v224_v41 = vrot.slane %v202_v37, %v2983_v30  ;;  %320 = vrot.lane.b32.xlu0 %v2629_v31, %s2853_s28  ;;  %v161_v54 = vrot.slane %v145_v52, %v2983_v30 }
  0xd2   :  { %v232_v57 = vcombine.high %v210_v38, %v210_v38  ;;  %v271_v58 = vrot.slane %v210_v38, %v2938_v9  ;;  %v153_v21 = vcombine.high %v145_v52, %v145_v52  ;;  %v152_v35 = vrot.slane %v138_v25, %v2983_v30 }
  0xd3   :  { %v231_v43 = vrot.slane %v203_v39, %v2983_v30  ;;  %v234_v53 = vcombine.high %v224_v41, %v224_v41  ;;  %v275_v61 = vrot.slane %v224_v41, %v2938_v9  ;;  %v183_v62 = vcombine.high %v161_v54, %v161_v54 }
  0xd4   :  { %v279_v4 = vrot.slane %v232_v57, %v2938_v9  ;;  %v233_v13 = vcombine.high %v217_v40, %v217_v40  ;;  %v287_v14 = vrot.slane %v217_v40, %v2938_v9  ;;  %v175_v26 = vrot.slane %v153_v21, %v2983_v30 }
  0xd5   :  { %439 = vbcast.lane.b32.xlu0 %v437_v42, 256  ;;  %v235_v56 = vcombine.high %v231_v43, %v231_v43  ;;  %v283_v59 = vrot.slane %v234_v53, %v2938_v9  ;;  %v291_v60 = vrot.slane %v231_v43, %v2938_v9  ;;  %v247_v11 = vrot.slane %v183_v62, %v2938_v9 }
  0xd6   :  { %v295_v20 = vrot.slane %v233_v13, %v2938_v9  ;;  %v239_v27 = vrot.slane %v161_v54, %v2938_v9  ;;  %v185_v36 = vcombine.high %v175_v26, %v175_v26  ;;  %v243_v37 = vrot.slane %v175_v26, %v2938_v9 }
  0xd7   :  { %v299_v0 = vrot.slane %v235_v56, %v2938_v9 }
  0xd8   :  { %v251_v51 = vrot.slane %v185_v36, %v2938_v9 }
  0xd9   :  { %513 = vbcast.lane.b32.xlu0 %v511_v44, 256 }
  0xdd   :  { %460 = vbcast.lane.b32.xlu0 %v458_v45, 256 }
  0xe1   :  { %467 = vbcast.lane.b32.xlu0 %v465_v46, 256 }
  0xe5   :  { %474 = vbcast.lane.b32.xlu0 %v472_v48, 256  ;;  %v154_v48 = vcombine.high %v152_v35, %v152_v35 }
  0xe9   :  { %481 = vbcast.lane.b32.xlu0 %v479_v50, 256  ;;  %v168_v50 = vrot.slane %v152_v35, %v2983_v30 }
 0x13f   :  { %v3006_v55 = vpop.permute.xlu0 %318 }
 0x140   :  { %v326_v16 = vadd.f32 %v3006_v55, %v247_v11  ;;  %v324_v31 = vadd.f32 %v3006_v55, %v239_v27  ;;  %v325_v45 = vadd.f32 %v3006_v55, %v243_v37 }
 0x143   :  { %v321_v63 = vpop.permute.xlu0 %320 }
 0x144   :  { %v335_v1 = vadd.f32 %v321_v63, %v283_v59  ;;  %v332_v2 = vadd.f32 %v321_v63, %v271_v58  ;;  %v337_v3 = vadd.f32 %v321_v63, %v291_v60  ;;  %v333_v5 = vadd.f32 %v321_v63, %v275_v61 }
 0x145   :  { %v339_v6 = vadd.f32 %v321_v63, %v299_v0  ;;  %v334_v8 = vadd.f32 %v321_v63, %v279_v4  ;;  %v336_v19 = vadd.f32 %v321_v63, %v287_v14  ;;  %v338_v23 = vadd.f32 %v321_v63, %v295_v20 }
 0x146   :  { %2760 = vtanh.f32 %v335_v1  ;;  %v327_v58 = vadd.f32 %v3006_v55, %v251_v51  ;;  %v182_v60 = vrot.slane %v154_v48, %v2983_v30  ;;  %v255_v61 = vrot.slane %v168_v50, %v2938_v9  ;;  %v433_v51 = vpop.permute.xlu1 %432 }
 0x147   :  { %2762 = vtanh.f32 %v332_v2  ;;  %v184_v4 = vcombine.high %v168_v50, %v168_v50  ;;  %v560_v50 = vrot.slane %v2961_v18, %v3001_v49 }
 0x148   :  { %2764 = vtanh.f32 %v337_v3  ;;  %v328_v2 = vadd.f32 %v3006_v55, %v255_v61  ;;  %v186_v14 = vcombine.high %v182_v60, %v182_v60 }
 0x149   :  { %2766 = vtanh.f32 %v333_v5  ;;  %v259_v5 = vrot.slane %v182_v60, %v2938_v9 }
 0x14a   :  { %2768 = vtanh.f32 %v339_v6  ;;  %v267_v26 = vrot.slane %v186_v14, %v2938_v9 }
 0x14b   :  { %2770 = vtanh.f32 %v334_v8  ;;  %v329_v11 = vadd.f32 %v3006_v55, %v259_v5 }
 0x14c   :  { %2772 = vtanh.f32 %v326_v16  ;;  %v263_v16 = vrot.slane %v184_v4, %v2938_v9 }
 0x14d   :  { %2774 = vtanh.f32 %v336_v19  ;;  %v2854_v19 = vmov 0  }
 0x14e   :  { %2776 = vtanh.f32 %v338_v23  ;;  %2758 = vset.pattern.permute.xlu1 %v2854_v19  ;;  %2759 = vset.pattern.permute.xlu0 %v2854_v19  ;;  %v330_v23 = vadd.f32 %v3006_v55, %v263_v16 }
 0x14f   :  { %2778 = vtanh.f32 %v324_v31  ;;  %v331_v31 = vadd.f32 %v3006_v55, %v267_v26 }
 0x150   :  { %2780 = vtanh.f32 %v325_v45 }
 0x151   :  { %2782 = vtanh.f32 %v327_v58 }
 0x152   :  { %2784 = vtanh.f32 %v328_v2 }
 0x153   :  { %v2761_v28 = vpop.eup %2760  ;;  %2786 = vtanh.f32 %v329_v11 }
 0x154   :  { %v2763_v32 = vpop.eup %2762  ;;  %v373_v33 = vmul.f32 %v2761_v28, %v3023_v29  ;;  %2788 = vtanh.f32 %v330_v23 }
 0x155   :  { %v2765_v34 = vpop.eup %2764  ;;  %v370_v38 = vmul.f32 %v2763_v32, %v3023_v29  ;;  %2790 = vtanh.f32 %v331_v31 }
 0x156   :  { %v2767_v39 = vpop.eup %2766  ;;  %v411_v40 = vsel %vm42_vm0, %v373_v33, 0.0  ;;  %v375_v41 = vmul.f32 %v2765_v34, %v3023_v29 }
 0x157   :  { %v2769_v42 = vpop.eup %2768  ;;  %412 = vadd.xlane.f32.xlu0 %v411_v40  ;;  %v402_v43 = vsel %vm42_vm0, %v370_v38, 0.0  ;;  %v371_v44 = vmul.f32 %v2767_v39, %v3023_v29  ;;  %v553_v39 = vrot.slane %v2961_v18, %v2997_v47 }
 0x158   :  { %v2771_v46 = vpop.eup %2770  ;;  %403 = vadd.xlane.f32.xlu1 %v402_v43  ;;  %v417_v52 = vsel %vm42_vm0, %v375_v41, 0.0  ;;  %v377_v53 = vmul.f32 %v2769_v42, %v3023_v29 }
 0x159   :  { %v2773_v54 = vpop.eup %2772  ;;  %v405_v56 = vsel %vm42_vm0, %v371_v44, 0.0  ;;  %v372_v57 = vmul.f32 %v2771_v46, %v3023_v29 }
 0x15a   :  { %v2775_v59 = vpop.eup %2774  ;;  %v423_v62 = vsel %vm42_vm0, %v377_v53, 0.0  ;;  %v364_v63 = vmul.f32 %v2773_v54, %v3023_v29 }
 0x15b   :  { %418 = vadd.xlane.f32.xlu0 %v417_v52  ;;  %v408_v0 = vsel %vm42_vm0, %v372_v57, 0.0  ;;  %v374_v1 = vmul.f32 %v2775_v59, %v3023_v29  ;;  %v2777_v3 = vpop.eup %2776  ;;  %v447_v52 = vpop.permute.xlu1 %446 }
 0x15c   :  { %406 = vadd.xlane.f32.xlu1 %v405_v56  ;;  %v384_v30 = vsel %vm42_vm0, %v364_v63, 0.0  ;;  %v376_v8 = vmul.f32 %v2777_v3, %v3023_v29  ;;  %v2779_v13 = vpop.eup %2778  ;;  %v440_v56 = vpop.permute.xlu0 %439 }
 0x15d   :  { %v414_v6 = vsel %vm42_vm0, %v374_v1, 0.0  ;;  %v362_v21 = vmul.f32 %v2779_v13, %v3023_v29  ;;  %v2781_v25 = vpop.eup %2780 }
 0x15e   :  { %v420_v20 = vsel %vm42_vm0, %v376_v8, 0.0  ;;  %v363_v28 = vmul.f32 %v2781_v25, %v3023_v29  ;;  %v2783_v32 = vpop.eup %2782 }
 0x15f   :  { %424 = vadd.xlane.f32.xlu0 %v423_v62  ;;  %v378_v27 = vsel %vm42_vm0, %v362_v21, 0.0  ;;  %v365_v34 = vmul.f32 %v2783_v32, %v3023_v29  ;;  %v2785_v35 = vpop.eup %2784  ;;  %v454_v53 = vpop.permute.xlu1 %453 }
 0x160   :  { %409 = vadd.xlane.f32.xlu1 %v408_v0  ;;  %v381_v33 = vsel %vm42_vm0, %v363_v28, 0.0  ;;  %v366_v37 = vmul.f32 %v2785_v35, %v3023_v29  ;;  %v2787_v38 = vpop.eup %2786  ;;  %v514_v58 = vpop.permute.xlu0 %513 }
 0x161   :  { %v387_v36 = vsel %vm42_vm0, %v365_v34, 0.0  ;;  %v367_v40 = vmul.f32 %v2787_v38, %v3023_v29  ;;  %v2789_v41 = vpop.eup %2788 }
 0x162   :  { %v390_v55 = vsel %vm42_vm0, %v366_v37, 0.0  ;;  %v368_v43 = vmul.f32 %v2789_v41, %v3023_v29  ;;  %v2791_v44 = vpop.eup %2790 }
 0x163   :  { %385 = vadd.xlane.f32.xlu0 %v384_v30  ;;  %v393_v42 = vsel %vm42_vm0, %v367_v40, 0.0  ;;  %v369_v46 = vmul.f32 %v2791_v44, %v3023_v29  ;;  %v521_v54 = vpop.permute.xlu1 %520 }
 0x164   :  { %415 = vadd.xlane.f32.xlu1 %v414_v6  ;;  %v396_v45 = vsel %vm42_vm0, %v368_v43, 0.0  ;;  %v461_v60 = vpop.permute.xlu0 %460 }
 0x165   :  { %v399_v48 = vsel %vm42_vm0, %v369_v46, 0.0 }
 0x167   :  { %v528_v57 = vpop.permute.xlu1 %527 }
 0x168   :  { %421 = vadd.xlane.f32.xlu1 %v420_v20  ;;  %v468_v62 = vpop.permute.xlu0 %467 }
 0x16b   :  { %v535_v59 = vpop.permute.xlu1 %534 }
 0x16c   :  { %379 = vadd.xlane.f32.xlu1 %v378_v27  ;;  %v475_v63 = vpop.permute.xlu0 %474 }
 0x16f   :  { %v542_v61 = vpop.permute.xlu1 %541 }
 0x170   :  { %382 = vadd.xlane.f32.xlu1 %v381_v33  ;;  %v482_v2 = vpop.permute.xlu0 %481 }
 0x173   :  { %v549_v29 = vpop.permute.xlu1 %548 }
 0x174   :  { %388 = vadd.xlane.f32.xlu1 %v387_v36 }
 0x178   :  { %391 = vadd.xlane.f32.xlu1 %v390_v55 }
 0x179   :  { %555 = vbcast.lane.b32.xlu0 %v553_v39, 256 }
 0x17c   :  { %394 = vadd.xlane.f32.xlu1 %v393_v42 }
 0x180   :  { %397 = vadd.xlane.f32.xlu1 %v396_v45 }
 0x184   :  { %400 = vadd.xlane.f32.xlu1 %v399_v48 }
 0x195   :  { %562 = vbcast.lane.b32.xlu1 %v560_v50, 256 }
 0x1e0   :  { %v413_v5 = vpop.xlane.xlu0 %412 }
 0x1e1   :  { %v404_v0 = vpop.xlane.xlu1 %403  ;;  %v502_v11 = vmul.f32 %v454_v53, %v413_v5 }
 0x1e2   :  { %v499_v1 = vmul.f32 %v433_v51, %v404_v0 }
 0x1e3   :  { %v3086_v20 = vadd.f32 %v535_v59, %v502_v11 }
 0x1e4   :  { %v3077_v3 = vadd.f32 %v514_v58, %v499_v1  ;;  %v419_v14 = vpop.xlane.xlu0 %418 }
 0x1e5   :  { %v407_v18 = vpop.xlane.xlu1 %406  ;;  %v504_v44 = vmul.f32 %v468_v62, %v419_v14 }
 0x1e6   :  { %v500_v4 = vmul.f32 %v440_v56, %v407_v18  ;;  %629 = vperm.xlu1 %2758, %v3077_v3  }
 0x1e8   :  { %v3080_v30 = vadd.f32 %v521_v54, %v500_v4  ;;  %v425_v25 = vpop.xlane.xlu0 %424 }
 0x1e9   :  { %v410_v6 = vpop.xlane.xlu1 %409 }
 0x1ea   :  { %v501_v8 = vmul.f32 %v447_v52, %v410_v6  ;;  %632 = vperm.xlu0 %2759, %v3080_v30  }
 0x1ec   :  { %v3083_v13 = vadd.f32 %v528_v57, %v501_v8  ;;  %v386_v31 = vpop.xlane.xlu0 %385 }
 0x1ed   :  { %v416_v16 = vpop.xlane.xlu1 %415  ;;  %v493_v34 = vmul.f32 %v447_v52, %v386_v31 }
 0x1ee   :  { %v503_v19 = vmul.f32 %v461_v60, %v416_v16  ;;  %635 = vperm.xlu0 %2759, %v3083_v13  }
 0x1ef   :  { %v3098_v38 = vadd.f32 %v528_v57, %v493_v34 }
 0x1f0   :  { %v3088_v21 = vadd.f32 %v542_v61, %v503_v19  ;;  %v556_v50 = vpop.permute.xlu0 %555 }
 0x1f1   :  { %v422_v23 = vpop.xlane.xlu1 %421 }
 0x1f2   :  { %638 = vperm.xlu0 %2759, %v3086_v20   ;;  %641 = vperm.xlu1 %2758, %v3088_v21  }
 0x1f5   :  { %v380_v26 = vpop.xlane.xlu1 %379 }
 0x1f6   :  { %v491_v27 = vmul.f32 %v433_v51, %v380_v26  ;;  %v3110_v51 = vadd.f32 %v549_v29, %v504_v44 }
 0x1f8   :  { %v3092_v28 = vadd.f32 %v514_v58, %v491_v27  ;;  %v505_v58 = vmul.f32 %v475_v63, %v422_v23 }
 0x1f9   :  { %v383_v32 = vpop.xlane.xlu1 %382 }
 0x1fa   :  { %v492_v33 = vmul.f32 %v440_v56, %v383_v32  ;;  %605 = vperm.xlu0 %2759, %v3092_v28  }
 0x1fc   :  { %v3095_v35 = vadd.f32 %v521_v54, %v492_v33  ;;  %v506_v54 = vmul.f32 %v482_v2, %v425_v25 }
 0x1fd   :  { %v389_v36 = vpop.xlane.xlu1 %388 }
 0x1fe   :  { %v494_v37 = vmul.f32 %v454_v53, %v389_v36  ;;  %608 = vperm.xlu1 %2758, %v3095_v35  }
 0x200   :  { %v3100_v39 = vadd.f32 %v535_v59, %v494_v37 }
 0x201   :  { %v392_v55 = vpop.xlane.xlu1 %391 }
 0x202   :  { %v495_v40 = vmul.f32 %v461_v60, %v392_v55  ;;  %614 = vperm.xlu0 %2759, %v3100_v39   ;;  %611 = vperm.xlu1 %2758, %v3098_v38  }
 0x204   :  { %v3104_v41 = vadd.f32 %v542_v61, %v495_v40  ;;  %v3122_v61 = vadd.f32 %v556_v50, %v505_v58 }
 0x205   :  { %v395_v42 = vpop.xlane.xlu1 %394 }
 0x206   :  { %v496_v43 = vmul.f32 %v468_v62, %v395_v42  ;;  %617 = vperm.xlu1 %2758, %v3104_v41  }
 0x208   :  { %v3107_v45 = vadd.f32 %v549_v29, %v496_v43 }
 0x209   :  { %v398_v46 = vpop.xlane.xlu1 %397 }
 0x20a   :  { %v497_v48 = vmul.f32 %v475_v63, %v398_v46  ;;  %620 = vperm.xlu0 %2759, %v3107_v45  }
 0x20c   :  { %v3112_v52 = vadd.f32 %v556_v50, %v497_v48 }
 0x20d   :  { %v401_v53 = vpop.xlane.xlu1 %400 }
 0x20e   :  { %644 = vperm.xlu0 %2759, %v3110_v51   ;;  %623 = vperm.xlu1 %2758, %v3112_v52   ;;  %v498_v56 = vmul.f32 %v482_v2, %v401_v53 }
 0x211   :  { %v563_v57 = vpop.permute.xlu1 %562 }
 0x212   :  { %v3116_v59 = vadd.f32 %v563_v57, %v498_v56  ;;  %v3118_v60 = vadd.f32 %v563_v57, %v506_v54 }
 0x214   :  { %650 = vperm.xlu0 %2759, %v3118_v60   ;;  %626 = vperm.xlu1 %2758, %v3116_v59  }
 0x218   :  { %647 = vperm.xlu1 %2758, %v3122_v61  }
 0x261   :  { %v630_v29 = vpop.permute.xlu1 %629 }
 0x262   :  { %v689_v34 = vrot.slane %v630_v29, %v2941_v10 }
 0x265   :  { %v633_v62 = vpop.permute.xlu0 %632 }
 0x266   :  { %v693_v26 = vrot.slane %v633_v62, %v2941_v10 }
 0x268   :  { %v732_v42 = vsel %vm718_vm1, %v693_v26, %v689_v34 }
 0x269   :  { %v636_v0 = vpop.permute.xlu0 %635 }
 0x26a   :  { %v697_v32 = vrot.slane %v636_v0, %v2941_v10 }
 0x26c   :  { %v733_v46 = vsel %vm720_vm2, %v697_v32, %v732_v42 }
 0x26d   :  { %v642_v1 = vpop.permute.xlu1 %641  ;;  %v639_v2 = vpop.permute.xlu0 %638 }
 0x26e   :  { %v701_v36 = vrot.slane %v639_v2, %v2941_v10  ;;  %v705_v48 = vrot.slane %v642_v1, %v2941_v10 }
 0x270   :  { %v734_v54 = vsel %vm722_vm3, %v701_v36, %v733_v46 }
 0x275   :  { %v606_v4 = vpop.permute.xlu0 %605 }
 0x276   :  { %v657_v14 = vrot.slane %v606_v4, %v2941_v10 }
 0x279   :  { %v609_v18 = vpop.permute.xlu1 %608 }
 0x27a   :  { %v661_v6 = vrot.slane %v609_v18, %v2941_v10  ;;  %v735_v18 = vsel %vm724_vm5, %v705_v48, %v734_v54 }
 0x27c   :  { %v719_v19 = vsel %vm718_vm1, %v661_v6, %v657_v14 }
 0x27d   :  { %v612_v63 = vpop.permute.xlu1 %611  ;;  %v615_v5 = vpop.permute.xlu0 %614 }
 0x27e   :  { %v665_v11 = vrot.slane %v612_v63, %v2941_v10  ;;  %v669_v23 = vrot.slane %v615_v5, %v2941_v10 }
 0x280   :  { %v721_v27 = vsel %vm720_vm2, %v665_v11, %v719_v19 }
 0x281   :  { %v618_v8 = vpop.permute.xlu1 %617  ;;  %v723_v55 = vsel %vm722_vm3, %v669_v23, %v721_v27 }
 0x282   :  { %v673_v31 = vrot.slane %v618_v8, %v2941_v10 }
 0x284   :  { %v725_v43 = vsel %vm724_vm5, %v673_v31, %v723_v55 }
 0x285   :  { %v621_v16 = vpop.permute.xlu0 %620 }
 0x286   :  { %v677_v33 = vrot.slane %v621_v16, %v2941_v10 }
 0x288   :  { %v727_v50 = vsel %vm726_vm4, %v677_v33, %v725_v43 }
 0x289   :  { %v624_v25 = vpop.permute.xlu1 %623  ;;  %v645_v40 = vpop.permute.xlu0 %644 }
 0x28a   :  { %v681_v37 = vrot.slane %v624_v25, %v2941_v10  ;;  %v709_v56 = vrot.slane %v645_v40, %v2941_v10 }
 0x28c   :  { %v729_v57 = vsel %vm728_vm6, %v681_v37, %v727_v50  ;;  %v736_v2 = vsel %vm726_vm4, %v709_v56, %v735_v18 }
 0x28f   :  { %v627_v44 = vpop.permute.xlu1 %626  ;;  %v651_v58 = vpop.permute.xlu0 %650 }
 0x290   :  { %v685_v53 = vrot.slane %v627_v44, %v2941_v10  ;;  %v717_v4 = vrot.slane %v651_v58, %v2941_v10 }
 0x292   :  { %v731_v62 = vsel %vm730_vm7, %v685_v53, %v729_v57 }
 0x293   :  { %v648_v29 = vpop.permute.xlu1 %647  ;;  %v742_v0 = vsel %vm741_vm8, %v731_v62, -inf }
 0x294   :  { %v713_v1 = vrot.slane %v648_v29, %v2941_v10  ;;  %743 = vmax.xlane.f32.xlu1 %v742_v0 }
 0x296   :  { %v737_v63 = vsel %vm728_vm6, %v713_v1, %v736_v2 }
 0x297   :  { %v738_v5 = vsel %vm730_vm7, %v717_v4, %v737_v63 }
 0x298   :  { %v745_v6 = vsel %vm741_vm8, %v738_v5, -inf }
 0x299   :  { %746 = vmax.xlane.f32.xlu0 %v745_v6 }
 0x31d   :  { %v744_v16 = vpop.xlane.xlu1 %743 }
 0x31e   :  { %v757_v27 = vrot.slane %v744_v16, %v2956_v17  ;;  %v761_v37 = vrot.slane %v744_v16, %v2947_v12  ;;  %v777_v48 = vrot.slane %v744_v16, %v2997_v47  ;;  %v773_v53 = vrot.slane %v744_v16, %v2975_v24 }
 0x320   :  { %v831_v55 = vsub.f32 %v3095_v35, %v757_v27  ;;  %v832_v43 = vsub.f32 %v3098_v38, %v761_v37  ;;  %v781_v38 = vrot.slane %v744_v16, %v3001_v49  ;;  %v836_v57 = vsub.f32 %v3112_v52, %v777_v48 }
 0x321   :  { %v835_v62 = vsub.f32 %v3107_v45, %v773_v53 }
 0x322   :  { %v3157_v8 = vpop.xlane.xlu0 %746  ;;  %v848_v44 = vmul.f32 1.442695, %v831_v55  ;;  %v858_v52 = vmul.f32 1.442695, %v836_v57 }
 0x323   :  { %v785_v11 = vrot.slane %v3157_v8, %v2938_v9  ;;  %v789_v14 = vrot.slane %v3157_v8, %v2956_v17  ;;  %v793_v19 = vrot.slane %v3157_v8, %v2947_v12  ;;  %v801_v23 = vrot.slane %v3157_v8, %v2970_v22 }
 0x324   :  { %v797_v32 = vrot.slane %v3157_v8, %v2952_v15  ;;  %v805_v29 = vrot.slane %v3157_v8, %v2975_v24  ;;  %v809_v18 = vrot.slane %v3157_v8, %v2997_v47  ;;  %v856_v45 = vmul.f32 1.442695, %v835_v62 }
 0x325   :  { %v838_v25 = vsub.f32 %v3077_v3, %v785_v11  ;;  %v839_v26 = vsub.f32 %v3080_v30, %v789_v14  ;;  %v842_v31 = vsub.f32 %v3088_v21, %v801_v23  ;;  %v840_v33 = vsub.f32 %v3083_v13, %v793_v19 }
 0x326   :  { %v753_v3 = vrot.slane %v744_v16, %v2938_v9  ;;  %v841_v30 = vsub.f32 %v3086_v20, %v797_v32  ;;  %v769_v21 = vrot.slane %v744_v16, %v2970_v22  ;;  %v765_v13 = vrot.slane %v744_v16, %v2952_v15 }
 0x327   :  { %v862_v34 = vmul.f32 1.442695, %v838_v25  ;;  %v864_v36 = vmul.f32 1.442695, %v839_v26  ;;  %v870_v40 = vmul.f32 1.442695, %v842_v31  ;;  %v813_v2 = vrot.slane %v3157_v8, %v3001_v49 }
 0x328   :  { %v866_v42 = vmul.f32 1.442695, %v840_v33  ;;  %v830_v46 = vsub.f32 %v3092_v28, %v753_v3  ;;  %v868_v35 = vmul.f32 1.442695, %v841_v30  ;;  %v834_v50 = vsub.f32 %v3104_v41, %v769_v21 }
 0x329   :  { %2792 = vpow2.f32 %v862_v34  ;;  %v850_v20 = vmul.f32 1.442695, %v832_v43  ;;  %v833_v54 = vsub.f32 %v3100_v39, %v765_v13  ;;  %v837_v39 = vsub.f32 %v3116_v59, %v781_v38 }
 0x32a   :  { %2794 = vpow2.f32 %v864_v36  ;;  %v846_v56 = vmul.f32 1.442695, %v830_v46  ;;  %v854_v28 = vmul.f32 1.442695, %v834_v50  ;;  %v843_v4 = vsub.f32 %v3110_v51, %v805_v29 }
 0x32b   :  { %2796 = vpow2.f32 %v870_v40  ;;  %v852_v41 = vmul.f32 1.442695, %v833_v54  ;;  %v860_v59 = vmul.f32 1.442695, %v837_v39  ;;  %v844_v5 = vsub.f32 %v3122_v61, %v809_v18 }
 0x32c   :  { %2798 = vpow2.f32 %v866_v42  ;;  %v845_v11 = vsub.f32 %v3118_v60, %v813_v2  ;;  %v872_v14 = vmul.f32 1.442695, %v843_v4 }
 0x32d   :  { %2800 = vpow2.f32 %v848_v44  ;;  %v874_v51 = vmul.f32 1.442695, %v844_v5 }
 0x32e   :  { %2802 = vpow2.f32 %v868_v35  ;;  %v876_v19 = vmul.f32 1.442695, %v845_v11 }
 0x32f   :  { %2804 = vpow2.f32 %v850_v20 }
 0x330   :  { %2806 = vpow2.f32 %v846_v56 }
 0x331   :  { %2808 = vpow2.f32 %v854_v28 }
 0x332   :  { %2810 = vpow2.f32 %v852_v41 }
 0x333   :  { %2812 = vpow2.f32 %v858_v52 }
 0x334   :  { %2814 = vpow2.f32 %v856_v45 }
 0x335   :  { %2816 = vpow2.f32 %v860_v59 }
 0x336   :  { %v3188_v58 = vpop.eup %2792  ;;  %2818 = vpow2.f32 %v872_v14 }
 0x337   :  { %v3193_v0 = vpop.eup %2794  ;;  %919 = vperm.xlu1 %2758, %v3188_v58   ;;  %2820 = vpow2.f32 %v874_v51 }
 0x338   :  { %922 = vperm.xlu0 %2759, %v3193_v0   ;;  %v3200_v1 = vpop.eup %2796  ;;  %2822 = vpow2.f32 %v876_v19 }
 0x339   :  { %v3205_v63 = vpop.eup %2798 }
 0x33a   :  { %v3210_v6 = vpop.eup %2800 }
 0x33b   :  { %931 = vperm.xlu1 %2758, %v3200_v1   ;;  %v3213_v16 = vpop.eup %2802 }
 0x33c   :  { %925 = vperm.xlu0 %2759, %v3205_v63   ;;  %v3217_v8 = vpop.eup %2804 }
 0x33d   :  { %v3219_v23 = vpop.eup %2806 }
 0x33e   :  { %v3223_v60 = vpop.eup %2808 }
 0x33f   :  { %898 = vperm.xlu1 %2758, %v3210_v6   ;;  %v3225_v61 = vpop.eup %2810 }
 0x340   :  { %928 = vperm.xlu0 %2759, %v3213_v16   ;;  %v3229_v25 = vpop.eup %2812 }
 0x341   :  { %v3231_v26 = vpop.eup %2814 }
 0x342   :  { %v3235_v27 = vpop.eup %2816 }
 0x343   :  { %901 = vperm.xlu1 %2758, %v3217_v8   ;;  %v3237_v31 = vpop.eup %2818 }
 0x344   :  { %895 = vperm.xlu0 %2759, %v3219_v23   ;;  %v3241_v32 = vpop.eup %2820 }
 0x345   :  { %v3243_v33 = vpop.eup %2822 }
 0x347   :  { %907 = vperm.xlu1 %2758, %v3223_v60  }
 0x348   :  { %904 = vperm.xlu0 %2759, %v3225_v61  }
 0x34b   :  { %913 = vperm.xlu1 %2758, %v3229_v25  }
 0x34c   :  { %910 = vperm.xlu0 %2759, %v3231_v26  }
 0x34f   :  { %916 = vperm.xlu1 %2758, %v3235_v27  }
 0x350   :  { %934 = vperm.xlu0 %2759, %v3237_v31  }
 0x353   :  { %937 = vperm.xlu1 %2758, %v3241_v32  }
 0x354   :  { %940 = vperm.xlu0 %2759, %v3243_v33  }
 0x3b2   :  { %v920_v34 = vpop.permute.xlu1 %919 }
 0x3b3   :  { %v923_v36 = vpop.permute.xlu0 %922  ;;  %v977_v54 = vrot.slane %v920_v34, %v2941_v10 }
 0x3b4   :  { %v981_v53 = vrot.slane %v923_v36, %v2941_v10 }
 0x3b6   :  { %v932_v37 = vpop.permute.xlu1 %931  ;;  %v1013_v52 = vsel %vm718_vm1, %v981_v53, %v977_v54 }
 0x3b7   :  { %v926_v55 = vpop.permute.xlu0 %925  ;;  %v993_v51 = vrot.slane %v932_v37, %v2941_v10 }
 0x3b8   :  { %v985_v57 = vrot.slane %v926_v55, %v2941_v10 }
 0x3ba   :  { %v899_v40 = vpop.permute.xlu1 %898  ;;  %v1014_v2 = vsel %vm720_vm2, %v985_v57, %v1013_v52 }
 0x3bb   :  { %v929_v3 = vpop.permute.xlu0 %928  ;;  %v949_v21 = vrot.slane %v899_v40, %v2941_v10 }
 0x3bc   :  { %v989_v62 = vrot.slane %v929_v3, %v2941_v10 }
 0x3be   :  { %v902_v30 = vpop.permute.xlu1 %901  ;;  %v1015_v5 = vsel %vm722_vm3, %v989_v62, %v1014_v2 }
 0x3bf   :  { %v896_v42 = vpop.permute.xlu0 %895  ;;  %v953_v44 = vrot.slane %v902_v30, %v2941_v10  ;;  %v1016_v55 = vsel %vm724_vm5, %v993_v51, %v1015_v5 }
 0x3c0   :  { %v945_v43 = vrot.slane %v896_v42, %v2941_v10 }
 0x3c2   :  { %v1006_v13 = vsel %vm718_vm1, %v949_v21, %v945_v43  ;;  %v908_v46 = vpop.permute.xlu1 %907 }
 0x3c3   :  { %v905_v35 = vpop.permute.xlu0 %904  ;;  %v1007_v50 = vsel %vm720_vm2, %v953_v44, %v1006_v13  ;;  %v961_v20 = vrot.slane %v908_v46, %v2941_v10 }
 0x3c4   :  { %v957_v48 = vrot.slane %v905_v35, %v2941_v10 }
 0x3c6   :  { %v1008_v56 = vsel %vm722_vm3, %v957_v48, %v1007_v50  ;;  %v914_v38 = vpop.permute.xlu1 %913 }
 0x3c7   :  { %v911_v28 = vpop.permute.xlu0 %910  ;;  %v969_v29 = vrot.slane %v914_v38, %v2941_v10  ;;  %v1009_v39 = vsel %vm724_vm5, %v961_v20, %v1008_v56 }
 0x3c8   :  { %v965_v41 = vrot.slane %v911_v28, %v2941_v10 }
 0x3ca   :  { %v1010_v18 = vsel %vm726_vm4, %v965_v41, %v1009_v39  ;;  %v917_v45 = vpop.permute.xlu1 %916 }
 0x3cb   :  { %v935_v4 = vpop.permute.xlu0 %934  ;;  %v973_v59 = vrot.slane %v917_v45, %v2941_v10  ;;  %v1011_v14 = vsel %vm728_vm6, %v969_v29, %v1010_v18  ;;  %v2855_v45 = vmov 0.0  }
 0x3cc   :  { %v997_v11 = vrot.slane %v935_v4, %v2941_v10  ;;  %2630 = vmatprep.subr.mxu1 %v2855_v45  ;;  %2632 = vmatprep.mubr.msk.f32.mxu1 %vm2856_vm9, %v2855_v45 }
 0x3cd   :  { %v1012_v19 = vsel %vm730_vm7, %v973_v59, %v1011_v14 }
 0x3ce   :  { %v938_v34 = vpop.permute.xlu1 %937  ;;  %v1022_v36 = vsel %vm741_vm8, %v1012_v19, 0.0  ;;  %v1017_v30 = vsel %vm726_vm4, %v997_v11, %v1016_v55 }
 0x3cf   :  { %v941_v40 = vpop.permute.xlu0 %940  ;;  %v1001_v3 = vrot.slane %v938_v34, %v2941_v10  ;;  %1023 = vadd.xlane.f32.xlu1 %v1022_v36 }
 0x3d0   :  { %v1005_v42 = vrot.slane %v941_v40, %v2941_v10 }
 0x3d1   :  { %v1018_v21 = vsel %vm728_vm6, %v1001_v3, %v1017_v30 }
 0x3d2   :  { %v1019_v43 = vsel %vm730_vm7, %v1005_v42, %v1018_v21 }
 0x3d3   :  { %v1025_v37 = vsel %vm741_vm8, %v1019_v43, 0.0 }
 0x3d4   :  { %1026 = vadd.xlane.f32.xlu0 %v1025_v37 }
 0x458   :  { %v1024_v13 = vpop.xlane.xlu1 %1023 }
 0x45d   :  { %v1027_v44 = vpop.xlane.xlu0 %1026 }
 0x45e   :  { %2824 = vrcp.f32 %v1027_v44 }
 0x45f   :  { %2826 = vrcp.f32 %v1024_v13 }
 0x46b   :  { %v2825_v46 = vpop.eup %2824 }
 0x46c   :  { %v1073_v35 = vrot.slane %v2825_v46, %v2956_v17  ;;  %v1069_v48 = vrot.slane %v2825_v46, %v2938_v9  ;;  %v1077_v53 = vrot.slane %v2825_v46, %v2947_v12  ;;  %v1085_v54 = vrot.slane %v2825_v46, %v2970_v22  ;;  %v2827_v56 = vpop.eup %2826 }
 0x46d   :  { %v1081_v28 = vrot.slane %v2825_v46, %v2952_v15  ;;  %v1041_v62 = vrot.slane %v2827_v56, %v2956_v17  ;;  %v1045_v41 = vrot.slane %v2827_v56, %v2947_v12  ;;  %v1037_v29 = vrot.slane %v2827_v56, %v2938_v9 }
 0x46e   :  { %v1123_v50 = vmul.f32 %v3193_v0, %v1073_v35  ;;  %v1122_v20 = vmul.f32 %v3188_v58, %v1069_v48  ;;  %v1124_v38 = vmul.f32 %v3205_v63, %v1077_v53  ;;  %v1126_v57 = vmul.f32 %v3200_v1, %v1085_v54 }
 0x46f   :  { %v1125_v0 = vmul.f32 %v3213_v16, %v1081_v28  ;;  %v1115_v58 = vmul.f32 %v3210_v6, %v1041_v62  ;;  %v1116_v63 = vmul.f32 %v3217_v8, %v1045_v41  ;;  %v1114_v1 = vmul.f32 %v3219_v23, %v1037_v29 }
 0x470   :  { %1285 = vperm.xlu0 %2759, %v1123_v50   ;;  %1282 = vperm.xlu1 %2758, %v1122_v20   ;;  %v1053_v39 = vrot.slane %v2827_v56, %v2970_v22  ;;  %v1049_v17 = vrot.slane %v2827_v56, %v2952_v15  ;;  %v1061_v12 = vrot.slane %v2827_v56, %v2997_v47 }
 0x471   :  { %v1057_v9 = vrot.slane %v2827_v56, %v2975_v24  ;;  %v1065_v8 = vrot.slane %v2827_v56, %v3001_v49  ;;  %v1089_v15 = vrot.slane %v2825_v46, %v2975_v24  ;;  %v1097_v18 = vrot.slane %v2825_v46, %v3001_v49  ;;  %v3315_v24 = vld [vmem:[%s3660_s0] sm:$0xff] }
 0x472   :  { %v1118_v16 = vmul.f32 %v3223_v60, %v1053_v39  ;;  %v1117_v6 = vmul.f32 %v3225_v61, %v1049_v17  ;;  %v1120_v23 = vmul.f32 %v3229_v25, %v1061_v12  ;;  %v1093_v61 = vrot.slane %v2825_v46, %v2997_v47  ;;  %2631 = vmatpush3.msra.mxu1 %v3315_v24  ;;  %v1466_v12 = vld [vmem:[%s3666_s6 + $0x28] sm:$0xff] }
 0x473   :  { %v1119_v22 = vmul.f32 %v3231_v26, %v1057_v9  ;;  %v1121_v60 = vmul.f32 %v3235_v27, %v1065_v8  ;;  %v1127_v52 = vmul.f32 %v3237_v31, %v1089_v15  ;;  %v1129_v49 = vmul.f32 %v3243_v33, %v1097_v18  ;;  %2635 = vmatprep.subr.mxu1 %v2855_v45  ;;  %v2516_v9 = vld [vmem:[%s3666_s6 + $0x78] sm:$0xff]  ;;  %v1465_v8 = vld [vmem:[%s3666_s6 + $0x20] sm:$0xff] }
 0x474   :  { %1288 = vperm.xlu0 %2759, %v1124_v38   ;;  %1294 = vperm.xlu1 %2758, %v1126_v57   ;;  %v1128_v47 = vmul.f32 %v3241_v32, %v1093_v61  ;;  %v1464_v15 = vld [vmem:[%s3666_s6 + $0x18] sm:$0xff]  ;;  %v1463_v61 = vld [vmem:[%s3666_s6 + $0x10] sm:$0xff]  ;;  %v2513_v18 = vld [vmem:[%s3666_s6 + $0x60] sm:$0xff] }
 0x475   :  { %2659 = vmatprep.subr.mxu0 %v2516_v9 }
 0x476   :  { %2660 = vmatpush3.msra.mxu0 %v2516_v9 }
 0x478   :  { %1291 = vperm.xlu0 %2759, %v1125_v0   ;;  %1142 = vperm.xlu1 %2758, %v1115_v58  }
 0x47c   :  { %1145 = vperm.xlu1 %2758, %v1116_v63   ;;  %1139 = vperm.xlu0 %2759, %v1114_v1   ;;  %v3352_v1 = vld [vmem:[%s3660_s0 + $0x8] sm:$0xff] }
 0x480   :  { %1151 = vperm.xlu1 %2758, %v1118_v16   ;;  %1148 = vperm.xlu0 %2759, %v1117_v6   ;;  %v1467_v6 = vld [vmem:[%s3666_s6 + $0x30] sm:$0xff] }
 0x484   :  { %1157 = vperm.xlu1 %2758, %v1120_v23   ;;  %1154 = vperm.xlu0 %2759, %v1119_v22   ;;  %v2515_v22 = vld [vmem:[%s3666_s6 + $0x70] sm:$0xff] }
 0x485   :  { %2661 = vmatprep.subr.mxu0 %v2515_v22 }
 0x486   :  { %2662 = vmatpush3.msra.mxu0 %v2515_v22 }
 0x488   :  { %1160 = vperm.xlu1 %2758, %v1121_v60   ;;  %1297 = vperm.xlu0 %2759, %v1127_v52   ;;  %v2514_v60 = vld [vmem:[%s3666_s6 + $0x68] sm:$0xff] }
 0x489   :  { %2663 = vmatprep.subr.mxu0 %v2514_v60 }
 0x48a   :  { %2664 = vmatpush3.msra.mxu0 %v2514_v60 }
 0x48b   :  { %2665 = vmatprep.subr.mxu0 %v2513_v18 }
 0x48c   :  { %1300 = vperm.xlu1 %2758, %v1128_v47   ;;  %1303 = vperm.xlu0 %2759, %v1129_v49   ;;  %v1462_v47 = vld [vmem:[%s3666_s6 + $0x8] sm:$0xff] }
 0x48d   :  { %2666 = vmatpush3.msra.mxu0 %v2513_v18  ;;  %v2525_v18 = vld [vmem:[%s3666_s6 + $0xb0] sm:$0xff] }
 0x4eb   :  { %v1286_v25 = vpop.permute.xlu0 %1285  ;;  %v1283_v26 = vpop.permute.xlu1 %1282 }
 0x4ec   :  { %v1312_v3 = vrot.slane %v1286_v25, %v2941_v10  ;;  %v1308_v30 = vrot.slane %v1283_v26, %v2941_v10  ;;  %v2512_v25 = vld [vmem:[%s3666_s6 + $0x58] sm:$0xff]  ;;  %v1461_v26 = vld [vmem:[%s3666_s6] sm:$0xff] }
 0x4ed   :  { %2667 = vmatprep.subr.mxu0 %v2512_v25 }
 0x4ee   :  { %v1337_v48 = vsel %vm718_vm1, %v1312_v3, %v1308_v30  ;;  %2668 = vmatpush3.msra.mxu0 %v2512_v25 }
 0x4ef   :  { %v1289_v27 = vpop.permute.xlu0 %1288  ;;  %v1295_v31 = vpop.permute.xlu1 %1294 }
 0x4f0   :  { %v1316_v43 = vrot.slane %v1289_v27, %v2941_v10  ;;  %v1324_v28 = vrot.slane %v1295_v31, %v2941_v10  ;;  %v2511_v31 = vld [vmem:[%s3666_s6 + $0x50] sm:$0xff] }
 0x4f1   :  { %2669 = vmatprep.subr.mxu0 %v2511_v31 }
 0x4f2   :  { %v1338_v53 = vsel %vm720_vm2, %v1316_v43, %v1337_v48  ;;  %2670 = vmatpush3.msra.mxu0 %v2511_v31 }
 0x4f3   :  { %v1292_v2 = vpop.permute.xlu0 %1291  ;;  %v1143_v4 = vpop.permute.xlu1 %1142 }
 0x4f4   :  { %v1169_v11 = vrot.slane %v1143_v4, %v2941_v10  ;;  %v1320_v44 = vrot.slane %v1292_v2, %v2941_v10  ;;  %v3406_v2 = vld [vmem:[%s3666_s6 + $0xb8] sm:$0xff]  ;;  %v2510_v4 = vld [vmem:[%s3666_s6 + $0x48] sm:$0xff] }
 0x4f5   :  { %2671 = vmatprep.subr.mxu0 %v2510_v4 }
 0x4f6   :  { %v1339_v56 = vsel %vm722_vm3, %v1320_v44, %v1338_v53  ;;  %2672 = vmatpush3.msra.mxu0 %v2510_v4  ;;  %v2524_v4 = vld [vmem:[%s3666_s6 + $0xa8] sm:$0xff] }
 0x4f7   :  { %v1140_v59 = vpop.permute.xlu0 %1139  ;;  %v1146_v5 = vpop.permute.xlu1 %1145  ;;  %v1340_v41 = vsel %vm724_vm5, %v1324_v28, %v1339_v56 }
 0x4f8   :  { %v1165_v14 = vrot.slane %v1140_v59, %v2941_v10  ;;  %v1173_v32 = vrot.slane %v1146_v5, %v2941_v10  ;;  %v2509_v59 = vld [vmem:[%s3666_s6 + $0x40] sm:$0xff]  ;;  %v3418_v5 = vld [vmem:[%s3666_s6 + $0xf8] sm:$0xff] }
 0x4f9   :  { %2673 = vmatprep.subr.mxu0 %v2509_v59 }
 0x4fa   :  { %v1194_v33 = vsel %vm718_vm1, %v1169_v11, %v1165_v14  ;;  %2674 = vmatpush3.msra.mxu0 %v2509_v59  ;;  %v2858_v11 = vmov 1983009808  }
 0x4fb   :  { %v1149_v51 = vpop.permute.xlu0 %1148  ;;  %v1152_v19 = vpop.permute.xlu1 %1151  ;;  %v1195_v36 = vsel %vm720_vm2, %v1173_v32, %v1194_v33  ;;  %2697 = vmatprep.subr.mxu0 %v3418_v5  ;;  %v1431_v14 = vunpack.c.l.s4 %v2858_v11 }
 0x4fc   :  { %v1177_v34 = vrot.slane %v1149_v51, %v2941_v10  ;;  %v1181_v55 = vrot.slane %v1152_v19, %v2941_v10 }
 0x4fd   :  { %v1432_v32 = vunpack.c.0.s8 %v1431_v14 }
 0x4fe   :  { %v1196_v40 = vsel %vm722_vm3, %v1177_v34, %v1195_v36 }
 0x4ff   :  { %v1155_v42 = vpop.permute.xlu0 %1154  ;;  %v1158_v21 = vpop.permute.xlu1 %1157  ;;  %v1197_v13 = vsel %vm724_vm5, %v1181_v55, %v1196_v40  ;;  %v3422_v33 = vsub.s32 %v1432_v32, %v2935_v7 }
 0x500   :  { %v1185_v37 = vrot.slane %v1155_v42, %v2941_v10  ;;  %v1189_v46 = vrot.slane %v1158_v21, %v2941_v10 }
 0x501   :  { %v3429_v34 = vrot.slane %v2855_v45, %v3422_v33 }
 0x502   :  { %v1198_v35 = vsel %vm726_vm4, %v1185_v37, %v1197_v13 }
 0x503   :  { %v1298_v50 = vpop.permute.xlu0 %1297  ;;  %v1161_v20 = vpop.permute.xlu1 %1160  ;;  %v1199_v38 = vsel %vm728_vm6, %v1189_v46, %v1198_v35 }
 0x504   :  { %v1193_v54 = vrot.slane %v1161_v20, %v2941_v10  ;;  %v1328_v57 = vrot.slane %v1298_v50, %v2941_v10 }
 0x506   :  { %v1200_v62 = vsel %vm730_vm7, %v1193_v54, %v1199_v38  ;;  %v1341_v39 = vsel %vm726_vm4, %v1328_v57, %v1340_v41 }
 0x507   :  { %v1304_v0 = vpop.permute.xlu0 %1303  ;;  %2633 = vmatmul.mubr.msk.f32.vlgmr.msra.gmra.mxu1 %vm741_vm8, %v1200_v62  ;;  %v1301_v58 = vpop.permute.xlu1 %1300 }
 0x508   :  { %v1336_v29 = vrot.slane %v1304_v0, %v2941_v10  ;;  %v1332_v63 = vrot.slane %v1301_v58, %v2941_v10  ;;  %2636 = vmatpush3.msra.mxu1 %v3352_v1  ;;  %2637 = vmatprep.mubr.msk.f32.mxu1 %vm2856_vm9, %v2855_v45  ;;  %v1468_v10 = vld [vmem:[%s3666_s6 + $0x38] sm:$0xff] }
 0x509   :  { %2640 = vmatprep.subr.mxu1 %v1468_v10 }
 0x50a   :  { %v1342_v17 = vsel %vm728_vm6, %v1332_v63, %v1341_v39 }
 0x50b   :  { %v1343_v16 = vsel %vm730_vm7, %v1336_v29, %v1342_v17 }
 0x50c   :  { %2638 = vmatmul.mubr.msk.f32.vlgmr.msra.gmra.mxu1 %vm741_vm8, %v1343_v16 }
 0x50d   :  { %2641 = vmatpush3.msra.mxu1 %v1468_v10 }
 0x50e   :  { %2642 = vmatprep.subr.mxu1 %v1467_v6 }
 0x50f   :  { %2643 = vmatpush3.msra.mxu1 %v1467_v6 }
 0x510   :  { %2644 = vmatprep.subr.mxu1 %v1466_v12 }
 0x511   :  { %2645 = vmatpush3.msra.mxu1 %v1466_v12 }
 0x512   :  { %2646 = vmatprep.subr.mxu1 %v1465_v8 }
 0x513   :  { %2647 = vmatpush3.msra.mxu1 %v1465_v8 }
 0x514   :  { %2648 = vmatprep.subr.mxu1 %v1464_v15 }
 0x515   :  { %2649 = vmatpush3.msra.mxu1 %v1464_v15 }
 0x516   :  { %2650 = vmatprep.subr.mxu1 %v1463_v61 }
 0x517   :  { %2651 = vmatpush3.msra.mxu1 %v1463_v61 }
 0x518   :  { %2652 = vmatprep.subr.mxu1 %v1462_v47 }
 0x519   :  { %2653 = vmatpush3.msra.mxu1 %v1462_v47 }
 0x51a   :  { %2654 = vmatprep.subr.mxu1 %v1461_v26 }
 0x51b   :  { %2655 = vmatpush3.msra.mxu1 %v1461_v26 }
 0x51c   :  { %2678 = vmatprep.subr.mxu1 %v3406_v2 }
 0x5c7   :  { %v1269_v23 = vpop.f32.mrf.mxu1 }
 0x5c8   :  { %1418 = vrot.lane.b32.xlu1 %v1269_v23, %s2857_s25 }
 0x5c9   :  { %v2634_v52 = vpop.f32.mrf.mxu1 }
 0x5cc   :  { %v1412_v49 = vpop.f32.mrf.mxu1 }
 0x5cd   :  { %1420 = vrot.lane.b32.xlu0 %v1412_v49, %s2857_s25 }
 0x5ce   :  { %v2639_v27 = vpop.f32.mrf.mxu1 }
 0x63a   :  { %v1419_v51 = vpop.permute.xlu1 %1418 }
 0x63b   :  { %v1424_v19 = vsel %vm42_vm0, %v3315_v24, %v1419_v51  ;;  %v2024_v24 = vrot.slane %v3429_v34, 7 }
 0x63c   :  { %v1429_v36 = vcombine.high %v1424_v19, %v1424_v19  ;;  %v1436_v55 = vrot.slane %v1424_v19, %v3422_v33 }
 0x63e   :  { %v3434_v40 = vrot.slane %v1429_v36, %v3422_v33  ;;  %v1444_v7 = vcombine.high %v1436_v55, %v1436_v55  ;;  %v2507_v21 = vrot.slane %v1436_v55, 9  ;;  %v2536_v36 = vld [vmem:[%s3666_s6 + $0xf0] sm:$0xff] }
 0x63f   :  { %v1421_v30 = vpop.permute.xlu0 %1420 }
 0x640   :  { %v1469_v42 = vcombine.low %v1436_v55, %v1444_v7  ;;  %v1645_v43 = vrot.slane %v1444_v7, 7  ;;  %v1425_v37 = vsel %vm42_vm0, %v3352_v1, %v1421_v30  ;;  %v3447_v46 = vcombine.high %v3434_v40, %v3434_v40  ;;  %v2535_v30 = vld [vmem:[%s3666_s6 + $0xe8] sm:$0xff] }
 0x641   :  { %v1445_v44 = vcombine.high %v1425_v37, %v1425_v37  ;;  %v1452_v13 = vrot.slane %v1425_v37, %v3422_v33  ;;  %v1648_v35 = vrot.slane %v3434_v40, 7  ;;  %v1848_v53 = vcombine.low %v1444_v7, %v3434_v40  ;;  %v2522_v7 = vld [vmem:[%s3666_s6 + $0x98] sm:$0xff] }
 0x642   :  { %v1477_v48 = vrot.slane %v1469_v42, %v3422_v33  ;;  %v1646_v50 = vsel %vm3437_vm13, %v2507_v21, %v1645_v43  ;;  %v1647_v20 = vrot.slane %v1645_v43, 2  ;;  %v1651_v58 = vrot.slane %v3447_v46, 7  ;;  %v2521_v42 = vld [vmem:[%s3666_s6 + $0x90] sm:$0xff]  ;;  %v2534_v21 = vld [vmem:[%s3666_s6 + $0xe0] sm:$0xff] }
 0x643   :  { %v3455_v54 = vrot.slane %v1445_v44, %v3422_v33  ;;  %v1460_v56 = vcombine.high %v1452_v13, %v1452_v13  ;;  %v1470_v38 = vcombine.low %v3434_v40, %v1452_v13  ;;  %v2508_v57 = vrot.slane %v1452_v13, 9 }
 0x644   :  { %v2527_v28 = vcombine.high %v3434_v40, %v1452_v13  ;;  %v1649_v62 = vsel %vm3437_vm13, %v1647_v20, %v1648_v35  ;;  %v1650_v0 = vrot.slane %v1648_v35, 2  ;;  %v1856_v22 = vrot.slane %v1848_v53, %v3422_v33  ;;  %v2533_v13 = vld [vmem:[%s3666_s6 + $0xd8] sm:$0xff]  ;;  %v2519_v35 = vld [vmem:[%s3666_s6 + $0x80] sm:$0xff] }
 0x645   :  { %v1486_v41 = vcombine.low %v1460_v56, %v3455_v54  ;;  %v3465_v29 = vcombine.high %v3455_v54, %v3455_v54  ;;  %v1655_v63 = vrot.slane %v1460_v56, 7  ;;  %v1658_v1 = vrot.slane %v3455_v54, 7 }
 0x646   :  { %v1484_v39 = vrot.slane %v1470_v38, %v3422_v33  ;;  %v1863_v17 = vrot.slane %v2527_v28, %v3422_v33  ;;  %v1652_v16 = vsel %vm3437_vm13, %v1650_v0, %v1651_v58  ;;  %v1672_v10 = vcombine.low %v1646_v50, %v1649_v62  ;;  %v2532_v50 = vld [vmem:[%s3666_s6 + $0xd0] sm:$0xff]  ;;  %v2545_v28 = vld [vmem:[%s3666_s6 + $0x128] sm:$0xff]  ;;  %v2544_v0 = vld [vmem:[%s3666_s6 + $0x120] sm:$0xff] }
 0x647   :  { %v1657_v6 = vrot.slane %v1655_v63, 2  ;;  %v1660_v12 = vrot.slane %v1658_v1, 2  ;;  %v1493_v9 = vrot.slane %v1486_v41, %v3422_v33  ;;  %v1656_v8 = vsel %vm3437_vm13, %v2508_v57, %v1655_v63  ;;  %v2546_v38 = vld [vmem:[%s3666_s6 + $0x130] sm:$0xff]  ;;  %v2530_v57 = vld [vmem:[%s3666_s6 + $0xc0] sm:$0xff]  ;;  %v2541_v63 = vld [vmem:[%s3666_s6 + $0x108] sm:$0xff] }
 0x648   :  { %v1485_v23 = vcombine.low %v1477_v48, %v1484_v39  ;;  %v1673_v15 = vcombine.low %v1652_v16, %v1656_v8  ;;  %v1661_v61 = vrot.slane %v3465_v29, 7  ;;  %v2023_v52 = vrot.slane %v1651_v58, 2  ;;  %v2543_v58 = vld [vmem:[%s3666_s6 + $0x118] sm:$0xff]  ;;  %v2542_v41 = vld [vmem:[%s3666_s6 + $0x110] sm:$0xff]  ;;  %v2540_v39 = vld [vmem:[%s3666_s6 + $0x100] sm:$0xff] }
 0x649   :  { %v1659_v60 = vsel %vm3437_vm13, %v1657_v6, %v1658_v1  ;;  %v1864_v47 = vcombine.low %v1856_v22, %v1863_v17  ;;  %v1680_v49 = vrot.slane %v1672_v10, %v3422_v33  ;;  %v2037_v26 = vcombine.low %v1649_v62, %v1652_v16  ;;  %v2400_v16 = vld [vmem:[%s3668_s8 + $0x28] sm:$0xff]  ;;  %v2397_v10 = vld [vmem:[%s3668_s8 + $0x10] sm:$0xff] }
 0x64a   :  { %2656 = vmatprep.mubr.msk.f32.mxu1 %vm1494_vm14, %v1485_v23  ;;  %v1687_v25 = vrot.slane %v1673_v15, %v3422_v33  ;;  %v3488_v27 = vsel %vm3437_vm13, %v1660_v12, %v1661_v61  ;;  %v2025_v31 = vsel %vm3437_vm13, %v2023_v52, %v2024_v24  ;;  %v2214_v43 = vcombine.low %v3429_v34, %v3455_v54  ;;  %v2396_v6 = vld [vmem:[%s3668_s8 + $0x8] sm:$0xff]  ;;  %v2395_v12 = vld [vmem:[%s3668_s8] sm:$0xff] }
 0x64b   :  { %2657 = vmatmul.mubr.msk.f32.vlgmr.msra.gmra.mxu1 %vm1494_vm14, %v1493_v9  ;;  %v1689_v11 = vcombine.low %v1659_v60, %v3488_v27  ;;  %v2038_v14 = vcombine.low %v2025_v31, %v1659_v60  ;;  %v2045_v51 = vrot.slane %v2037_v26, %v3422_v33  ;;  %v2026_v37 = vrot.slane %v1661_v61, 2 }
 0x64c   :  { %2679 = vmatpush3.msra.mxu1 %v3406_v2  ;;  %2694 = vmatprep.mubr.msk.f32.mxu1 %vm1494_vm14, %v1864_v47  ;;  %v1688_v59 = vcombine.low %v1680_v49, %v1687_v25  ;;  %v2523_v2 = vld [vmem:[%s3666_s6 + $0xa0] sm:$0xff]  ;;  %v1865_v44 = vcombine.low %v3455_v54, %v3465_v29  ;;  %v2213_v48 = vcombine.low %v3434_v40, %v3447_v46  ;;  %v2547_v40 = vld [vmem:[%s3666_s6 + $0x138] sm:$0xff]  ;;  %v2531_v46 = vld [vmem:[%s3666_s6 + $0xc8] sm:$0xff]  ;;  %vm2411_vm0 = vcmask 392192  }
 0x64d   :  { %2680 = vmatprep.subr.mxu1 %v2525_v18  ;;  %v1696_v32 = vrot.slane %v1689_v11, %v3422_v33  ;;  %v2052_v19 = vrot.slane %v2038_v14, %v3422_v33  ;;  %v2228_v20 = vrot.slane %v2214_v43, %v3422_v33  ;;  %v2027_v53 = vsel %vm3437_vm13, %v2026_v37, %v2024_v24 }
 0x64e   :  { %2681 = vmatpush3.msra.mxu1 %v2525_v18  ;;  %2675 = vmatprep.mubr.msk.f32.mxu0 %vm1494_vm14, %v1688_v59  ;;  %v1872_v54 = vrot.slane %v1865_v44, %v3422_v33  ;;  %v2221_v56 = vrot.slane %v2213_v48, %v3422_v33  ;;  %v2054_v3 = vcombine.low %v3488_v27, %v2027_v53 }
 0x64f   :  { %2682 = vmatprep.subr.mxu1 %v2524_v4  ;;  %2676 = vmatmul.mubr.msk.f32.vlgmr.msra.gmra.mxu0 %vm1494_vm14, %v1696_v32  ;;  %v2053_v55 = vcombine.low %v2045_v51, %v2052_v19  ;;  %v2230_v1 = vcombine.low %v3465_v29, %v3429_v34  ;;  %v2399_v34 = vld [vmem:[%s3668_s8 + $0x20] sm:$0xff]  ;;  %v2398_v29 = vld [vmem:[%s3668_s8 + $0x18] sm:$0xff] }
 0x650   :  { %2683 = vmatpush3.msra.mxu1 %v2524_v4  ;;  %2698 = vmatpush3.msra.mxu0 %v3418_v5  ;;  %v2520_v5 = vld [vmem:[%s3666_s6 + $0x88] sm:$0xff]  ;;  %v2229_v24 = vcombine.low %v2221_v56, %v2228_v20  ;;  %v2061_v62 = vrot.slane %v2054_v3, %v3422_v33 }
 0x651   :  { %2684 = vmatprep.subr.mxu1 %v2523_v2  ;;  %2699 = vmatprep.subr.mxu0 %v2536_v36  ;;  %v2237_v17 = vrot.slane %v2230_v1, %v3422_v33 }
 0x652   :  { %2685 = vmatpush3.msra.mxu1 %v2523_v2  ;;  %2713 = vmatprep.mubr.msk.f32.mxu0 %vm1494_vm14, %v2053_v55 }
 0x653   :  { %2686 = vmatprep.subr.mxu1 %v2522_v7  ;;  %2700 = vmatpush3.msra.mxu0 %v2536_v36 }
 0x654   :  { %2687 = vmatpush3.msra.mxu1 %v2522_v7  ;;  %2701 = vmatprep.subr.mxu0 %v2535_v30 }
 0x655   :  { %2688 = vmatprep.subr.mxu1 %v2521_v42  ;;  %2702 = vmatpush3.msra.mxu0 %v2535_v30 }
 0x656   :  { %2689 = vmatpush3.msra.mxu1 %v2521_v42  ;;  %2703 = vmatprep.subr.mxu0 %v2534_v21 }
 0x657   :  { %2690 = vmatprep.subr.mxu1 %v2520_v5  ;;  %2704 = vmatpush3.msra.mxu0 %v2534_v21 }
 0x658   :  { %2691 = vmatpush3.msra.mxu1 %v2520_v5  ;;  %2705 = vmatprep.subr.mxu0 %v2533_v13 }
 0x659   :  { %2692 = vmatprep.subr.mxu1 %v2519_v35  ;;  %2706 = vmatpush3.msra.mxu0 %v2533_v13 }
 0x65a   :  { %2693 = vmatpush3.msra.mxu1 %v2519_v35  ;;  %2707 = vmatprep.subr.mxu0 %v2532_v50 }
 0x65b   :  { %2695 = vmatmul.mubr.msk.f32.vlgmr.msra.gmra.mxu1 %vm1494_vm14, %v1872_v54  ;;  %2708 = vmatpush3.msra.mxu0 %v2532_v50 }
 0x65c   :  { %2716 = vmatprep.subr.mxu1 %v2547_v40  ;;  %2709 = vmatprep.subr.mxu0 %v2531_v46 }
 0x65d   :  { %2717 = vmatpush3.msra.mxu1 %v2547_v40  ;;  %2732 = vmatprep.mubr.msk.f32.mxu1 %vm1494_vm14, %v2229_v24 }
 0x65e   :  { %2710 = vmatpush3.msra.mxu0 %v2531_v46  ;;  %2718 = vmatprep.subr.mxu1 %v2546_v38 }
 0x65f   :  { %2711 = vmatprep.subr.mxu0 %v2530_v57  ;;  %2719 = vmatpush3.msra.mxu1 %v2546_v38 }
 0x660   :  { %2712 = vmatpush3.msra.mxu0 %v2530_v57  ;;  %2720 = vmatprep.subr.mxu1 %v2545_v28 }
 0x661   :  { %2714 = vmatmul.mubr.msk.f32.vlgmr.msra.gmra.mxu0 %vm1494_vm14, %v2061_v62  ;;  %2721 = vmatpush3.msra.mxu1 %v2545_v28 }
 0x662   :  { %2735 = vmatprep.subr.mxu0 %v2855_v45  ;;  %2722 = vmatprep.subr.mxu1 %v2544_v0 }
 0x663   :  { %2747 = vmatprep.mubr.msk.f32.mxu0 %vm2856_vm9, %v2855_v45  ;;  %2723 = vmatpush3.msra.mxu1 %v2544_v0 }
 0x664   :  { %2724 = vmatprep.subr.mxu1 %v2543_v58  ;;  %2736 = vmatpush3.msra.mxu0 %v2400_v16 }
 0x665   :  { %2725 = vmatpush3.msra.mxu1 %v2543_v58  ;;  %2737 = vmatprep.subr.mxu0 %v2855_v45 }
 0x666   :  { %2726 = vmatprep.subr.mxu1 %v2542_v41  ;;  %2738 = vmatpush3.msra.mxu0 %v2399_v34 }
 0x667   :  { %2727 = vmatpush3.msra.mxu1 %v2542_v41  ;;  %2739 = vmatprep.subr.mxu0 %v2855_v45  ;;  %v1426_v41 = vld [vmem:[%s3667_s7] sm:$0x3f] }
 0x668   :  { %2728 = vmatprep.subr.mxu1 %v2541_v63  ;;  %2740 = vmatpush3.msra.mxu0 %v2398_v29 }
 0x669   :  { %2729 = vmatpush3.msra.mxu1 %v2541_v63  ;;  %2741 = vmatprep.subr.mxu0 %v2855_v45 }
 0x66a   :  { %2730 = vmatprep.subr.mxu1 %v2540_v39  ;;  %2742 = vmatpush3.msra.mxu0 %v2397_v10 }
 0x66b   :  { %2731 = vmatpush3.msra.mxu1 %v2540_v39  ;;  %2743 = vmatprep.subr.mxu0 %v2855_v45 }
 0x66c   :  { %2733 = vmatmul.mubr.msk.f32.vlgmr.msra.gmra.mxu1 %vm1494_vm14, %v2237_v17  ;;  %2744 = vmatpush3.msra.mxu0 %v2396_v6 }
 0x66d   :  { %2745 = vmatprep.subr.mxu0 %v2855_v45 }
 0x66e   :  { %2746 = vmatpush3.msra.mxu0 %v2395_v12 }
 0x70b   :  { %v2658_v9 = vpop.f32.mrf.mxu1 }
 0x70c   :  { %v1599_v32 = vrot.slane %v2658_v9, %v3422_v33 }
 0x70d   :  { %v1565_v23 = vpop.f32.mrf.mxu1 }
 0x70e   :  { %v1576_v22 = vcombine.high %v1565_v23, %v1565_v23  ;;  %v1583_v61 = vrot.slane %v1565_v23, %v3422_v33  ;;  %v1600_v43 = vcombine.high %v1599_v32, %v1599_v32 }
 0x70f   :  { %v2677_v8 = vpop.f32.mrf.mxu0 }
 0x710   :  { %v1590_v47 = vrot.slane %v1576_v22, %v3422_v33  ;;  %v1591_v26 = vcombine.high %v1583_v61, %v1583_v61  ;;  %v1801_v30 = vrot.slane %v2677_v8, %v3422_v33  ;;  %v1631_v3 = vrot.slane %v1600_v43, %v3422_v33 }
 0x711   :  { %v1767_v15 = vpop.f32.mrf.mxu0 }
 0x712   :  { %v1778_v52 = vcombine.high %v1767_v15, %v1767_v15  ;;  %v1785_v49 = vrot.slane %v1767_v15, %v3422_v33  ;;  %v1592_v4 = vcombine.high %v1590_v47, %v1590_v47  ;;  %v1601_v2 = vcombine.low %v1583_v61, %v1591_v26 }
 0x713   :  { %v1615_v50 = vrot.slane %v1590_v47, %v3422_v33  ;;  %v1802_v53 = vcombine.high %v1801_v30, %v1801_v30 }
 0x714   :  { %v1792_v27 = vrot.slane %v1778_v52, %v3422_v33  ;;  %v1793_v59 = vcombine.high %v1785_v49, %v1785_v49  ;;  %v1617_v7 = vcombine.low %v1592_v4, %v1599_v32  ;;  %v1608_v37 = vrot.slane %v1601_v2, %v3422_v33 }
 0x715   :  { %v1833_v1 = vrot.slane %v1802_v53, %v3422_v33 }
 0x716   :  { %v1794_v19 = vcombine.high %v1792_v27, %v1792_v27  ;;  %v1803_v21 = vcombine.low %v1785_v49, %v1793_v59  ;;  %v1624_v20 = vrot.slane %v1617_v7, %v3422_v33  ;;  %v1616_v24 = vcombine.low %v1608_v37, %v1615_v50 }
 0x717   :  { %v1817_v57 = vrot.slane %v1792_v27, %v3422_v33 }
 0x718   :  { %v1819_v13 = vcombine.low %v1794_v19, %v1801_v30  ;;  %v1810_v40 = vrot.slane %v1803_v21, %v3422_v33  ;;  %v1632_v63 = vcombine.low %v1624_v20, %v1631_v3  ;;  %v1635_v23 = vadd.f32 %v1616_v24, %v1426_v41 }
 0x71a   :  { %v1826_v28 = vrot.slane %v1819_v13, %v3422_v33  ;;  %v1818_v17 = vcombine.low %v1810_v40, %v1817_v57  ;;  %v1636_v49 = vadd.f32 %v1632_v63, %v1426_v41  ;;  %v2550_v57 = vld [vmem:[%s3669_s9] ss:$0 sm:$0xff] }
 0x71b   :  { %v2696_v60 = vpop.f32.mrf.mxu1 }
 0x71c   :  { %v1977_v35 = vrot.slane %v2696_v60, %v3422_v33  ;;  %v1834_v22 = vcombine.low %v1826_v28, %v1833_v1 }
 0x71d   :  { %v1943_v18 = vpop.f32.mrf.mxu1 }
 0x71e   :  { %v1954_v25 = vcombine.high %v1943_v18, %v1943_v18  ;;  %v1961_v45 = vrot.slane %v1943_v18, %v3422_v33  ;;  %v1978_v62 = vcombine.high %v1977_v35, %v1977_v35 }
 0x720   :  { %v1968_v11 = vrot.slane %v1954_v25, %v3422_v33  ;;  %v1969_v36 = vcombine.high %v1961_v45, %v1961_v45  ;;  %v2009_v15 = vrot.slane %v1978_v62, %v3422_v33  ;;  %v1837_v25 = vadd.f32 %v1818_v17, %v1635_v23 }
 0x721   :  { %v2715_v31 = vpop.f32.mrf.mxu0 }
 0x722   :  { %v1970_v5 = vcombine.high %v1968_v11, %v1968_v11  ;;  %v1979_v48 = vcombine.low %v1961_v45, %v1969_v36  ;;  %v2166_v56 = vrot.slane %v2715_v31, %v3422_v33  ;;  %v1993_v16 = vrot.slane %v1968_v11, %v3422_v33 }
 0x723   :  { %v2132_v14 = vpop.f32.mrf.mxu0  ;;  %v1838_v11 = vadd.f32 %v1834_v22, %v1636_v49 }
 0x724   :  { %v2143_v51 = vcombine.high %v2132_v14, %v2132_v14  ;;  %v2150_v55 = vrot.slane %v2132_v14, %v3422_v33  ;;  %v1995_v46 = vcombine.low %v1970_v5, %v1977_v35  ;;  %v1986_v0 = vrot.slane %v1979_v48, %v3422_v33 }
 0x725   :  { %v2167_v29 = vcombine.high %v2166_v56, %v2166_v56 }
 0x726   :  { %v2157_v42 = vrot.slane %v2143_v51, %v3422_v33  ;;  %v2158_v44 = vcombine.high %v2150_v55, %v2150_v55  ;;  %v2002_v34 = vrot.slane %v1995_v46, %v3422_v33  ;;  %v1994_v60 = vcombine.low %v1986_v0, %v1993_v16 }
 0x727   :  { %v2198_v27 = vrot.slane %v2167_v29, %v3422_v33 }
 0x728   :  { %v2159_v54 = vcombine.high %v2157_v42, %v2157_v42  ;;  %v2168_v38 = vcombine.low %v2150_v55, %v2158_v44  ;;  %v2182_v61 = vrot.slane %v2157_v42, %v3422_v33  ;;  %v2010_v26 = vcombine.low %v2002_v34, %v2009_v15 }
 0x729   :  { %v2013_v14 = vadd.f32 %v1994_v60, %v1837_v25 }
 0x72a   :  { %v2184_v39 = vcombine.low %v2159_v54, %v2166_v56  ;;  %v2175_v6 = vrot.slane %v2168_v38, %v3422_v33  ;;  %v2014_v36 = vadd.f32 %v2010_v26, %v1838_v11 }
 0x72c   :  { %v2734_v58 = vpop.f32.mrf.mxu1  ;;  %v2191_v52 = vrot.slane %v2184_v39, %v3422_v33  ;;  %v2183_v45 = vcombine.low %v2175_v6, %v2182_v61 }
 0x72d   :  { %v2342_v12 = vrot.slane %v2734_v58, %v3422_v33 }
 0x72e   :  { %v2308_v10 = vpop.f32.mrf.mxu1  ;;  %v2199_v32 = vcombine.low %v2191_v52, %v2198_v27  ;;  %v2202_v55 = vadd.f32 %v2183_v45, %v2013_v14 }
 0x72f   :  { %v2319_v9 = vcombine.high %v2308_v10, %v2308_v10  ;;  %v2326_v8 = vrot.slane %v2308_v10, %v3422_v33  ;;  %v2343_v31 = vcombine.high %v2342_v12, %v2342_v12 }
 0x730   :  { %v2203_v21 = vadd.f32 %v2199_v32, %v2014_v36 }
 0x731   :  { %v2333_v18 = vrot.slane %v2319_v9, %v3422_v33  ;;  %v2334_v47 = vcombine.high %v2326_v8, %v2326_v8  ;;  %v2374_v7 = vrot.slane %v2343_v31, %v3422_v33 }
 0x733   :  { %v2335_v4 = vcombine.high %v2333_v18, %v2333_v18  ;;  %v2344_v59 = vcombine.low %v2326_v8, %v2334_v47  ;;  %v2358_v51 = vrot.slane %v2333_v18, %v3422_v33 }
 0x735   :  { %v2351_v2 = vrot.slane %v2344_v59, %v3422_v33  ;;  %v2360_v19 = vcombine.low %v2335_v4, %v2342_v12 }
 0x737   :  { %v2359_v30 = vcombine.low %v2351_v2, %v2358_v51  ;;  %v2367_v42 = vrot.slane %v2360_v19, %v3422_v33 }
 0x739   :  { %v2375_v5 = vcombine.low %v2367_v42, %v2374_v7  ;;  %v2378_v43 = vadd.f32 %v2359_v30, %v2202_v55 }
 0x73b   :  { %v2379_v37 = vadd.f32 %v2375_v5, %v2203_v21  ;;  %v2381_v44 = vsel %vm2380_vm15, %v2378_v43, -inf }
 0x73c   :  { %v2382_v13 = vrot.slane %v2381_v44, 4 }
 0x73d   :  { %v2388_v35 = vsel %vm2380_vm15, %v2379_v37, -inf }
 0x73e   :  { %v2383_v48 = vmax.f32 %v2381_v44, %v2382_v13  ;;  %v2389_v50 = vrot.slane %v2388_v35, 4 }
 0x740   :  { %v2384_v20 = vrot.slane %v2383_v48, 2  ;;  %v2390_v53 = vmax.f32 %v2388_v35, %v2389_v50 }
 0x742   :  { %v2385_v54 = vmax.f32 %v2383_v48, %v2384_v20  ;;  %v2391_v40 = vrot.slane %v2390_v53, 2 }
 0x744   :  { %v2386_v46 = vrot.slane %v2385_v54, 1  ;;  %v2392_v56 = vmax.f32 %v2390_v53, %v2391_v40 }
 0x746   :  { %v2393_v3 = vrot.slane %v2392_v56, 1  ;;  %v2387_v24 = vmax.f32 %v2385_v54, %v2386_v46 }
 0x748   :  { %v2394_v38 = vmax.f32 %v2392_v56, %v2393_v3 }
 0x74a   :  { %v2410_v33 = vsel %vm718_vm1, %v2394_v38, %v2387_v24 }
 0x74b   :  { %2748 = vmatmul.mubr.msk.f32.vlgmr.msra.gmra.mxu0 %vm2411_vm0, %v2410_v33 }
 0x80b   :  { %v2480_v28 = vpop.f32.mrf.mxu0 }
 0x80c   :  { %v2481_v62 = vadd.f32 %v2550_v57, %v2480_v28 }
 0x80d   :  { %v2749_v0 = vpop.f32.mrf.mxu0 }
 0x80e   :  { %2484 = vst [vmem:[#allocation2] sm:$0x3] %v2481_v62 }
 0x80f   :  { %2841 = shalt.err (!%p2838_p4)
}
 0x810   :  { %2494 = dma.vmem_to_hbm [thread:$0]  %s2492_s4, 32, %s3670_s10, [#allocation3]  }
 0x811   :  { %2850 = dma.done.wait [#allocation3], 32  }
 0x812   :  { %2851 = vsyncadd [#allocation3], 4294967264 }
 0x813   :  { %2498 = vsyncpa [#allocation3], 1 }

// kernel: tpu_custom_call.1
= control target key start
LH: loop header
LB: loop body
LE: loop exit
PB: predicated region body
PF: predicated region fallthrough
CT: control target
= control target key end

     0   :  { %vm42_vm0 = vcmask 261120   ;;  %s3660_s0 = inlined_call_operand.vmem [shape: f32[2,8,32], index: 0, kind: input, shape index: {}]   ;;  %s3661_s1 = inlined_call_operand.vmem [shape: f32[32,64], index: 1, kind: input, shape index: {}]   ;;  %s3662_s2 = inlined_call_operand.vmem [shape: f32[1,32], index: 2, kind: input, shape index: {}]   ;;  %s3663_s3 = inlined_call_operand.vmem [shape: f32[1,32], index: 3, kind: input, shape index: {}]   ;;  %s3664_s4 = inlined_call_operand.vmem [shape: f32[8,8], index: 4, kind: input, shape index: {}]   ;;  %s3665_s5 = inlined_call_operand.vmem [shape: f32[8,8], index: 5, kind: input, shape index: {}]   ;;  %s3666_s6 = inlined_call_operand.vmem [shape: f32[5,64,48], index: 6, kind: input, shape index: {}]   ;;  %s3667_s7 = inlined_call_operand.vmem [shape: f32[6,48], index: 7, kind: input, shape index: {}]   ;;  %s3668_s8 = inlined_call_operand.vmem [shape: f32[48,128], index: 8, kind: input, shape index: {}]   ;;  %s3669_s9 = inlined_call_operand.vmem [shape: f32[1,128], index: 9, kind: input, shape index: {}]   ;;  %s3670_s10 = inlined_call_operand.hbm [shape: f32[1,2,128], index: 10, kind: output, shape index: {}]  }
   0x1   :  { %v41_v0 = vld [vmem:[%s3661_s1 + $0x18] sm:$0xff]  ;;  %v40_v1 = vld [vmem:[%s3661_s1 + $0x10] sm:$0xff]  ;;  %v36_v2 = vld [vmem:[%s3660_s0] sm:$0xff] }
   0x2   :  { %2619 = vmatprep.subr.mxu0 %v41_v0  ;;  %v39_v3 = vld [vmem:[%s3661_s1 + $0x8] sm:$0xff]  ;;  %2627 = vmatprep.mubr.msk.f32.mxu0 %vm42_vm0, %v36_v2 }
   0x3   :  { %2620 = vmatpush3.msra.mxu0 %v41_v0 }
   0x4   :  { %15 = vsyncpa [#allocation3], 0  ;;  %2621 = vmatprep.subr.mxu0 %v40_v1  ;;  %v38_v4 = vld [vmem:[%s3661_s1] sm:$0xff]  ;;  %v37_v5 = vld [vmem:[%s3660_s0 + $0x8] sm:$0xff]  ;;  %v142_v6 = vlaneseq  ;;  %v2852_v26 = vmov 1966171168  }
   0x5   :  { %2622 = vmatpush3.msra.mxu0 %v40_v1  ;;  %v134_v11 = vld [vmem:[%s3664_s4] sm:$0xff]  ;;  %v140_v27 = vunpack.c.l.s4 %v2852_v26  ;;  %s2853_s28 = smov 96   ;;  %vm718_vm1 = vcmask 1041409   ;;  %vm720_vm2 = vcmask 1042434   ;;  %vm722_vm3 = vcmask 1043459   ;;  %s2857_s25 = smov 32  }
   0x6   :  { %2623 = vmatprep.subr.mxu0 %v39_v3  ;;  %v2935_v7 = vshrl.u32 %v142_v6, 7  ;;  %v653_v8 = vand.u32 127, %v142_v6  ;;  %v2961_v18 = vld [vmem:[%s3665_s5] sm:$0xff]  ;;  %vm726_vm4 = vcmask 1045509   ;;  %vm724_vm5 = vcmask 1044484   ;;  %s2859_s27 = smov [#allocation2]  }
   0x7   :  { %2624 = vmatpush3.msra.mxu0 %v39_v3  ;;  %v141_v28 = vunpack.c.0.s8 %v140_v27  ;;  %v2501_v29 = vld [vmem:[%s3662_s2] ss:$0 sm:$0xff]  ;;  %vm728_vm6 = vcmask 1046534   ;;  %vm730_vm7 = vcmask 1047559   ;;  %vm741_vm8 = vcmask 64512   ;;  %s2491_s4 = sshll.u32 %s2859_s27, 4  ;;  %s2492_s4 = int_to_ptr.vmem [resolvable:$true] %s2491_s4 }
   0x8   :  { %2625 = vmatprep.subr.mxu0 %v38_v4  ;;  %v2938_v9 = vsub.s32 0, %v2935_v7  ;;  %v2941_v10 = vsub.s32 %v653_v8, %v2935_v7  ;;  %v2947_v12 = vsub.s32 2, %v2935_v7  ;;  %v2952_v15 = vsub.s32 3, %v2935_v7  ;;  %s2830_s5 = scalar_lea.vmem %s2492_s4, 32  ;;  %p2835_p1 = scmp.lt.s32.totalorder %s2492_s4, %s2492_s4 }
   0x9   :  { %2626 = vmatpush3.msra.mxu0 %v38_v4  ;;  %v2956_v17 = vsub.s32 1, %v2935_v7  ;;  %v2970_v22 = vsub.s32 4, %v2935_v7  ;;  %v2975_v24 = vsub.s32 5, %v2935_v7  ;;  %v2983_v30 = vsub.s32 %v141_v28, %v2935_v7  ;;  %p2831_p0 = scmp.ne.s32.totalorder %s2492_s4, %s2830_s5  ;;  %p2836_p2 = scmp.lt.s32.totalorder %s2830_s5, %s2830_s5 }
   0xa   :  { %2628 = vmatmul.mubr.msk.f32.vlgmr.msra.gmra.mxu0 %vm42_vm0, %v37_v5  ;;  %v430_v13 = vrot.slane %v134_v11, %v2938_v9  ;;  %v444_v14 = vrot.slane %v134_v11, %v2947_v12  ;;  %v451_v16 = vrot.slane %v134_v11, %v2952_v15  ;;  %v525_v20 = vrot.slane %v2961_v18, %v2947_v12 }
   0xb   :  { %v518_v19 = vrot.slane %v2961_v18, %v2956_v17  ;;  %v532_v21 = vrot.slane %v2961_v18, %v2952_v15  ;;  %v539_v23 = vrot.slane %v2961_v18, %v2970_v22  ;;  %v546_v25 = vrot.slane %v2961_v18, %v2975_v24  ;;  %p2837_p3 = por %p2836_p2, %p2835_p1 }
   0xc   :  { %432 = vbcast.lane.b32.xlu1 %v430_v13, 256  ;;  %v437_v42 = vrot.slane %v134_v11, %v2956_v17  ;;  %v511_v44 = vrot.slane %v2961_v18, %v2938_v9  ;;  %v458_v45 = vrot.slane %v134_v11, %v2970_v22  ;;  %v465_v46 = vrot.slane %v134_v11, %v2975_v24 }
   0xd   :  { %v2997_v47 = vsub.s32 6, %v2935_v7  ;;  %v3001_v49 = vsub.s32 7, %v2935_v7  ;;  %vm2856_vm9 = vmmov 0   ;;  %vm1639_vm10 = vcmask 1040384   ;;  %p2838_p4 = pnand %p2837_p3, %p2831_p0 }
   0xe   :  { %vm1640_vm11 = vmor %vm1639_vm10, %vm720_vm2  ;;  %vm1494_vm14 = vcmask 523264   ;;  %vm2380_vm15 = vcmask 390144  }
   0xf   :  { %v472_v48 = vrot.slane %v134_v11, %v2997_v47  ;;  %v479_v50 = vrot.slane %v134_v11, %v3001_v49  ;;  %vm1641_vm12 = vmor %vm1640_vm11, %vm724_vm5 }
  0x10   :  { %446 = vbcast.lane.b32.xlu1 %v444_v14, 256  ;;  %vm3437_vm13 = vmor %vm1641_vm12, %vm728_vm6 }
  0x14   :  { %453 = vbcast.lane.b32.xlu1 %v451_v16, 256 }
  0x18   :  { %520 = vbcast.lane.b32.xlu1 %v518_v19, 256 }
  0x1c   :  { %527 = vbcast.lane.b32.xlu1 %v525_v20, 256 }
  0x20   :  { %534 = vbcast.lane.b32.xlu1 %v532_v21, 256 }
  0x24   :  { %541 = vbcast.lane.b32.xlu1 %v539_v23, 256 }
  0x28   :  { %548 = vbcast.lane.b32.xlu1 %v546_v25, 256 }
  0xca   :  { %v2629_v31 = vpop.f32.mrf.mxu0 }
  0xcb   :  { %v132_v32 = vadd.f32 %v2629_v31, %v2501_v29 }
  0xcc   :  { %v115_v33 = vpop.f32.mrf.mxu0 }
  0xcd   :  { %v187_v34 = vcombine.high %v132_v32, %v132_v32  ;;  %v194_v35 = vrot.slane %v132_v32, %v2983_v30  ;;  %318 = vrot.lane.b32.xlu0 %v115_v33, %s2853_s28  ;;  %v131_v51 = vadd.f32 %v2501_v29, %v115_v33  ;;  %v3023_v29 = vld [vmem:[%s3663_s3] ss:$0 sm:$0xff] }
  0xcf   :  { %v201_v36 = vrot.slane %v187_v34, %v2983_v30  ;;  %v202_v37 = vcombine.high %v194_v35, %v194_v35  ;;  %v210_v38 = vrot.slane %v194_v35, %v2983_v30  ;;  %v145_v52 = vrot.slane %v131_v51, %v2983_v30 }
  0xd0   :  { %v138_v25 = vcombine.high %v131_v51, %v131_v51 }
  0xd1   :  { %v203_v39 = vcombine.high %v201_v36, %v201_v36  ;;  %v217_v40 = vrot.slane %v201_v36, %v2983_v30  ;;  %v224_v41 = vrot.slane %v202_v37, %v2983_v30  ;;  %320 = vrot.lane.b32.xlu0 %v2629_v31, %s2853_s28  ;;  %v161_v54 = vrot.slane %v145_v52, %v2983_v30 }
  0xd2   :  { %v232_v57 = vcombine.high %v210_v38, %v210_v38  ;;  %v271_v58 = vrot.slane %v210_v38, %v2938_v9  ;;  %v153_v21 = vcombine.high %v145_v52, %v145_v52  ;;  %v152_v35 = vrot.slane %v138_v25, %v2983_v30 }
  0xd3   :  { %v231_v43 = vrot.slane %v203_v39, %v2983_v30  ;;  %v234_v53 = vcombine.high %v224_v41, %v224_v41  ;;  %v275_v61 = vrot.slane %v224_v41, %v2938_v9  ;;  %v183_v62 = vcombine.high %v161_v54, %v161_v54 }
  0xd4   :  { %v279_v4 = vrot.slane %v232_v57, %v2938_v9  ;;  %v233_v13 = vcombine.high %v217_v40, %v217_v40  ;;  %v287_v14 = vrot.slane %v217_v40, %v2938_v9  ;;  %v175_v26 = vrot.slane %v153_v21, %v2983_v30 }
  0xd5   :  { %439 = vbcast.lane.b32.xlu0 %v437_v42, 256  ;;  %v235_v56 = vcombine.high %v231_v43, %v231_v43  ;;  %v283_v59 = vrot.slane %v234_v53, %v2938_v9  ;;  %v291_v60 = vrot.slane %v231_v43, %v2938_v9  ;;  %v247_v11 = vrot.slane %v183_v62, %v2938_v9 }
  0xd6   :  { %v295_v20 = vrot.slane %v233_v13, %v2938_v9  ;;  %v239_v27 = vrot.slane %v161_v54, %v2938_v9  ;;  %v185_v36 = vcombine.high %v175_v26, %v175_v26  ;;  %v243_v37 = vrot.slane %v175_v26, %v2938_v9 }
  0xd7   :  { %v299_v0 = vrot.slane %v235_v56, %v2938_v9 }
  0xd8   :  { %v251_v51 = vrot.slane %v185_v36, %v2938_v9 }
  0xd9   :  { %513 = vbcast.lane.b32.xlu0 %v511_v44, 256 }
  0xdd   :  { %460 = vbcast.lane.b32.xlu0 %v458_v45, 256 }
  0xe1   :  { %467 = vbcast.lane.b32.xlu0 %v465_v46, 256 }
  0xe5   :  { %474 = vbcast.lane.b32.xlu0 %v472_v48, 256  ;;  %v154_v48 = vcombine.high %v152_v35, %v152_v35 }
  0xe9   :  { %481 = vbcast.lane.b32.xlu0 %v479_v50, 256  ;;  %v168_v50 = vrot.slane %v152_v35, %v2983_v30 }
 0x13f   :  { %v3006_v55 = vpop.permute.xlu0 %318 }
 0x140   :  { %v326_v16 = vadd.f32 %v3006_v55, %v247_v11  ;;  %v324_v31 = vadd.f32 %v3006_v55, %v239_v27  ;;  %v325_v45 = vadd.f32 %v3006_v55, %v243_v37 }
 0x143   :  { %v321_v63 = vpop.permute.xlu0 %320 }
 0x144   :  { %v335_v1 = vadd.f32 %v321_v63, %v283_v59  ;;  %v332_v2 = vadd.f32 %v321_v63, %v271_v58  ;;  %v337_v3 = vadd.f32 %v321_v63, %v291_v60  ;;  %v333_v5 = vadd.f32 %v321_v63, %v275_v61 }
 0x145   :  { %v339_v6 = vadd.f32 %v321_v63, %v299_v0  ;;  %v334_v8 = vadd.f32 %v321_v63, %v279_v4  ;;  %v336_v19 = vadd.f32 %v321_v63, %v287_v14  ;;  %v338_v23 = vadd.f32 %v321_v63, %v295_v20 }
 0x146   :  { %2760 = vtanh.f32 %v335_v1  ;;  %v327_v58 = vadd.f32 %v3006_v55, %v251_v51  ;;  %v182_v60 = vrot.slane %v154_v48, %v2983_v30  ;;  %v255_v61 = vrot.slane %v168_v50, %v2938_v9  ;;  %v433_v51 = vpop.permute.xlu1 %432 }
 0x147   :  { %2762 = vtanh.f32 %v332_v2  ;;  %v184_v4 = vcombine.high %v168_v50, %v168_v50  ;;  %v560_v50 = vrot.slane %v2961_v18, %v3001_v49 }
 0x148   :  { %2764 = vtanh.f32 %v337_v3  ;;  %v328_v2 = vadd.f32 %v3006_v55, %v255_v61  ;;  %v186_v14 = vcombine.high %v182_v60, %v182_v60 }
 0x149   :  { %2766 = vtanh.f32 %v333_v5  ;;  %v259_v5 = vrot.slane %v182_v60, %v2938_v9 }
 0x14a   :  { %2768 = vtanh.f32 %v339_v6  ;;  %v267_v26 = vrot.slane %v186_v14, %v2938_v9 }
 0x14b   :  { %2770 = vtanh.f32 %v334_v8  ;;  %v329_v11 = vadd.f32 %v3006_v55, %v259_v5 }
 0x14c   :  { %2772 = vtanh.f32 %v326_v16  ;;  %v263_v16 = vrot.slane %v184_v4, %v2938_v9 }
 0x14d   :  { %2774 = vtanh.f32 %v336_v19  ;;  %v2854_v19 = vmov 0  }
 0x14e   :  { %2776 = vtanh.f32 %v338_v23  ;;  %2758 = vset.pattern.permute.xlu1 %v2854_v19  ;;  %2759 = vset.pattern.permute.xlu0 %v2854_v19  ;;  %v330_v23 = vadd.f32 %v3006_v55, %v263_v16 }
 0x14f   :  { %2778 = vtanh.f32 %v324_v31  ;;  %v331_v31 = vadd.f32 %v3006_v55, %v267_v26 }
 0x150   :  { %2780 = vtanh.f32 %v325_v45 }
 0x151   :  { %2782 = vtanh.f32 %v327_v58 }
 0x152   :  { %2784 = vtanh.f32 %v328_v2 }
 0x153   :  { %v2761_v28 = vpop.eup %2760  ;;  %2786 = vtanh.f32 %v329_v11 }
 0x154   :  { %v2763_v32 = vpop.eup %2762  ;;  %v373_v33 = vmul.f32 %v2761_v28, %v3023_v29  ;;  %2788 = vtanh.f32 %v330_v23 }
 0x155   :  { %v2765_v34 = vpop.eup %2764  ;;  %v370_v38 = vmul.f32 %v2763_v32, %v3023_v29  ;;  %2790 = vtanh.f32 %v331_v31 }
 0x156   :  { %v2767_v39 = vpop.eup %2766  ;;  %v411_v40 = vsel %vm42_vm0, %v373_v33, 0.0  ;;  %v375_v41 = vmul.f32 %v2765_v34, %v3023_v29 }
 0x157   :  { %v2769_v42 = vpop.eup %2768  ;;  %412 = vadd.xlane.f32.xlu0 %v411_v40  ;;  %v402_v43 = vsel %vm42_vm0, %v370_v38, 0.0  ;;  %v371_v44 = vmul.f32 %v2767_v39, %v3023_v29  ;;  %v553_v39 = vrot.slane %v2961_v18, %v2997_v47 }
 0x158   :  { %v2771_v46 = vpop.eup %2770  ;;  %403 = vadd.xlane.f32.xlu1 %v402_v43  ;;  %v417_v52 = vsel %vm42_vm0, %v375_v41, 0.0  ;;  %v377_v53 = vmul.f32 %v2769_v42, %v3023_v29 }
 0x159   :  { %v2773_v54 = vpop.eup %2772  ;;  %v405_v56 = vsel %vm42_vm0, %v371_v44, 0.0  ;;  %v372_v57 = vmul.f32 %v2771_v46, %v3023_v29 }
 0x15a   :  { %v2775_v59 = vpop.eup %2774  ;;  %v423_v62 = vsel %vm42_vm0, %v377_v53, 0.0  ;;  %v364_v63 = vmul.f32 %v2773_v54, %v3023_v29 }
 0x15b   :  { %418 = vadd.xlane.f32.xlu0 %v417_v52  ;;  %v408_v0 = vsel %vm42_vm0, %v372_v57, 0.0  ;;  %v374_v1 = vmul.f32 %v2775_v59, %v3023_v29  ;;  %v2777_v3 = vpop.eup %2776  ;;  %v447_v52 = vpop.permute.xlu1 %446 }
 0x15c   :  { %406 = vadd.xlane.f32.xlu1 %v405_v56  ;;  %v384_v30 = vsel %vm42_vm0, %v364_v63, 0.0  ;;  %v376_v8 = vmul.f32 %v2777_v3, %v3023_v29  ;;  %v2779_v13 = vpop.eup %2778  ;;  %v440_v56 = vpop.permute.xlu0 %439 }
 0x15d   :  { %v414_v6 = vsel %vm42_vm0, %v374_v1, 0.0  ;;  %v362_v21 = vmul.f32 %v2779_v13, %v3023_v29  ;;  %v2781_v25 = vpop.eup %2780 }
 0x15e   :  { %v420_v20 = vsel %vm42_vm0, %v376_v8, 0.0  ;;  %v363_v28 = vmul.f32 %v2781_v25, %v3023_v29  ;;  %v2783_v32 = vpop.eup %2782 }
 0x15f   :  { %424 = vadd.xlane.f32.xlu0 %v423_v62  ;;  %v378_v27 = vsel %vm42_vm0, %v362_v21, 0.0  ;;  %v365_v34 = vmul.f32 %v2783_v32, %v3023_v29  ;;  %v2785_v35 = vpop.eup %2784  ;;  %v454_v53 = vpop.permute.xlu1 %453 }
 0x160   :  { %409 = vadd.xlane.f32.xlu1 %v408_v0  ;;  %v381_v33 = vsel %vm42_vm0, %v363_v28, 0.0  ;;  %v366_v37 = vmul.f32 %v2785_v35, %v3023_v29  ;;  %v2787_v38 = vpop.eup %2786  ;;  %v514_v58 = vpop.permute.xlu0 %513 }
 0x161   :  { %v387_v36 = vsel %vm42_vm0, %v365_v34, 0.0  ;;  %v367_v40 = vmul.f32 %v2787_v38, %v3023_v29  ;;  %v2789_v41 = vpop.eup %2788 }
 0x162   :  { %v390_v55 = vsel %vm42_vm0, %v366_v37, 0.0  ;;  %v368_v43 = vmul.f32 %v2789_v41, %v3023_v29  ;;  %v2791_v44 = vpop.eup %2790 }
 0x163   :  { %385 = vadd.xlane.f32.xlu0 %v384_v30  ;;  %v393_v42 = vsel %vm42_vm0, %v367_v40, 0.0  ;;  %v369_v46 = vmul.f32 %v2791_v44, %v3023_v29  ;;  %v521_v54 = vpop.permute.xlu1 %520 }
 0x164   :  { %415 = vadd.xlane.f32.xlu1 %v414_v6  ;;  %v396_v45 = vsel %vm42_vm0, %v368_v43, 0.0  ;;  %v461_v60 = vpop.permute.xlu0 %460 }
 0x165   :  { %v399_v48 = vsel %vm42_vm0, %v369_v46, 0.0 }
 0x167   :  { %v528_v57 = vpop.permute.xlu1 %527 }
 0x168   :  { %421 = vadd.xlane.f32.xlu1 %v420_v20  ;;  %v468_v62 = vpop.permute.xlu0 %467 }
 0x16b   :  { %v535_v59 = vpop.permute.xlu1 %534 }
 0x16c   :  { %379 = vadd.xlane.f32.xlu1 %v378_v27  ;;  %v475_v63 = vpop.permute.xlu0 %474 }
 0x16f   :  { %v542_v61 = vpop.permute.xlu1 %541 }
 0x170   :  { %382 = vadd.xlane.f32.xlu1 %v381_v33  ;;  %v482_v2 = vpop.permute.xlu0 %481 }
 0x173   :  { %v549_v29 = vpop.permute.xlu1 %548 }
 0x174   :  { %388 = vadd.xlane.f32.xlu1 %v387_v36 }
 0x178   :  { %391 = vadd.xlane.f32.xlu1 %v390_v55 }
 0x179   :  { %555 = vbcast.lane.b32.xlu0 %v553_v39, 256 }
 0x17c   :  { %394 = vadd.xlane.f32.xlu1 %v393_v42 }
 0x180   :  { %397 = vadd.xlane.f32.xlu1 %v396_v45 }
 0x184   :  { %400 = vadd.xlane.f32.xlu1 %v399_v48 }
 0x195   :  { %562 = vbcast.lane.b32.xlu1 %v560_v50, 256 }
 0x1e0   :  { %v413_v5 = vpop.xlane.xlu0 %412 }
 0x1e1   :  { %v404_v0 = vpop.xlane.xlu1 %403  ;;  %v502_v11 = vmul.f32 %v454_v53, %v413_v5 }
 0x1e2   :  { %v499_v1 = vmul.f32 %v433_v51, %v404_v0 }
 0x1e3   :  { %v3086_v20 = vadd.f32 %v535_v59, %v502_v11 }
 0x1e4   :  { %v3077_v3 = vadd.f32 %v514_v58, %v499_v1  ;;  %v419_v14 = vpop.xlane.xlu0 %418 }
 0x1e5   :  { %v407_v18 = vpop.xlane.xlu1 %406  ;;  %v504_v44 = vmul.f32 %v468_v62, %v419_v14 }
 0x1e6   :  { %v500_v4 = vmul.f32 %v440_v56, %v407_v18  ;;  %629 = vperm.xlu1 %2758, %v3077_v3  }
 0x1e8   :  { %v3080_v30 = vadd.f32 %v521_v54, %v500_v4  ;;  %v425_v25 = vpop.xlane.xlu0 %424 }
 0x1e9   :  { %v410_v6 = vpop.xlane.xlu1 %409 }
 0x1ea   :  { %v501_v8 = vmul.f32 %v447_v52, %v410_v6  ;;  %632 = vperm.xlu0 %2759, %v3080_v30  }
 0x1ec   :  { %v3083_v13 = vadd.f32 %v528_v57, %v501_v8  ;;  %v386_v31 = vpop.xlane.xlu0 %385 }
 0x1ed   :  { %v416_v16 = vpop.xlane.xlu1 %415  ;;  %v493_v34 = vmul.f32 %v447_v52, %v386_v31 }
 0x1ee   :  { %v503_v19 = vmul.f32 %v461_v60, %v416_v16  ;;  %635 = vperm.xlu0 %2759, %v3083_v13  }
 0x1ef   :  { %v3098_v38 = vadd.f32 %v528_v57, %v493_v34 }
 0x1f0   :  { %v3088_v21 = vadd.f32 %v542_v61, %v503_v19  ;;  %v556_v50 = vpop.permute.xlu0 %555 }
 0x1f1   :  { %v422_v23 = vpop.xlane.xlu1 %421 }
 0x1f2   :  { %638 = vperm.xlu0 %2759, %v3086_v20   ;;  %641 = vperm.xlu1 %2758, %v3088_v21  }
 0x1f5   :  { %v380_v26 = vpop.xlane.xlu1 %379 }
 0x1f6   :  { %v491_v27 = vmul.f32 %v433_v51, %v380_v26  ;;  %v3110_v51 = vadd.f32 %v549_v29, %v504_v44 }
 0x1f8   :  { %v3092_v28 = vadd.f32 %v514_v58, %v491_v27  ;;  %v505_v58 = vmul.f32 %v475_v63, %v422_v23 }
 0x1f9   :  { %v383_v32 = vpop.xlane.xlu1 %382 }
 0x1fa   :  { %v492_v33 = vmul.f32 %v440_v56, %v383_v32  ;;  %605 = vperm.xlu0 %2759, %v3092_v28  }
 0x1fc   :  { %v3095_v35 = vadd.f32 %v521_v54, %v492_v33  ;;  %v506_v54 = vmul.f32 %v482_v2, %v425_v25 }
 0x1fd   :  { %v389_v36 = vpop.xlane.xlu1 %388 }
 0x1fe   :  { %v494_v37 = vmul.f32 %v454_v53, %v389_v36  ;;  %608 = vperm.xlu1 %2758, %v3095_v35  }
 0x200   :  { %v3100_v39 = vadd.f32 %v535_v59, %v494_v37 }
 0x201   :  { %v392_v55 = vpop.xlane.xlu1 %391 }
 0x202   :  { %v495_v40 = vmul.f32 %v461_v60, %v392_v55  ;;  %614 = vperm.xlu0 %2759, %v3100_v39   ;;  %611 = vperm.xlu1 %2758, %v3098_v38  }
 0x204   :  { %v3104_v41 = vadd.f32 %v542_v61, %v495_v40  ;;  %v3122_v61 = vadd.f32 %v556_v50, %v505_v58 }
 0x205   :  { %v395_v42 = vpop.xlane.xlu1 %394 }
 0x206   :  { %v496_v43 = vmul.f32 %v468_v62, %v395_v42  ;;  %617 = vperm.xlu1 %2758, %v3104_v41  }
 0x208   :  { %v3107_v45 = vadd.f32 %v549_v29, %v496_v43 }
 0x209   :  { %v398_v46 = vpop.xlane.xlu1 %397 }
 0x20a   :  { %v497_v48 = vmul.f32 %v475_v63, %v398_v46  ;;  %620 = vperm.xlu0 %2759, %v3107_v45  }
 0x20c   :  { %v3112_v52 = vadd.f32 %v556_v50, %v497_v48 }
 0x20d   :  { %v401_v53 = vpop.xlane.xlu1 %400 }
 0x20e   :  { %644 = vperm.xlu0 %2759, %v3110_v51   ;;  %623 = vperm.xlu1 %2758, %v3112_v52   ;;  %v498_v56 = vmul.f32 %v482_v2, %v401_v53 }
 0x211   :  { %v563_v57 = vpop.permute.xlu1 %562 }
 0x212   :  { %v3116_v59 = vadd.f32 %v563_v57, %v498_v56  ;;  %v3118_v60 = vadd.f32 %v563_v57, %v506_v54 }
 0x214   :  { %650 = vperm.xlu0 %2759, %v3118_v60   ;;  %626 = vperm.xlu1 %2758, %v3116_v59  }
 0x218   :  { %647 = vperm.xlu1 %2758, %v3122_v61  }
 0x261   :  { %v630_v29 = vpop.permute.xlu1 %629 }
 0x262   :  { %v689_v34 = vrot.slane %v630_v29, %v2941_v10 }
 0x265   :  { %v633_v62 = vpop.permute.xlu0 %632 }
 0x266   :  { %v693_v26 = vrot.slane %v633_v62, %v2941_v10 }
 0x268   :  { %v732_v42 = vsel %vm718_vm1, %v693_v26, %v689_v34 }
 0x269   :  { %v636_v0 = vpop.permute.xlu0 %635 }
 0x26a   :  { %v697_v32 = vrot.slane %v636_v0, %v2941_v10 }
 0x26c   :  { %v733_v46 = vsel %vm720_vm2, %v697_v32, %v732_v42 }
 0x26d   :  { %v642_v1 = vpop.permute.xlu1 %641  ;;  %v639_v2 = vpop.permute.xlu0 %638 }
 0x26e   :  { %v701_v36 = vrot.slane %v639_v2, %v2941_v10  ;;  %v705_v48 = vrot.slane %v642_v1, %v2941_v10 }
 0x270   :  { %v734_v54 = vsel %vm722_vm3, %v701_v36, %v733_v46 }
 0x275   :  { %v606_v4 = vpop.permute.xlu0 %605 }
 0x276   :  { %v657_v14 = vrot.slane %v606_v4, %v2941_v10 }
 0x279   :  { %v609_v18 = vpop.permute.xlu1 %608 }
 0x27a   :  { %v661_v6 = vrot.slane %v609_v18, %v2941_v10  ;;  %v735_v18 = vsel %vm724_vm5, %v705_v48, %v734_v54 }
 0x27c   :  { %v719_v19 = vsel %vm718_vm1, %v661_v6, %v657_v14 }
 0x27d   :  { %v612_v63 = vpop.permute.xlu1 %611  ;;  %v615_v5 = vpop.permute.xlu0 %614 }
 0x27e   :  { %v665_v11 = vrot.slane %v612_v63, %v2941_v10  ;;  %v669_v23 = vrot.slane %v615_v5, %v2941_v10 }
 0x280   :  { %v721_v27 = vsel %vm720_vm2, %v665_v11, %v719_v19 }
 0x281   :  { %v618_v8 = vpop.permute.xlu1 %617  ;;  %v723_v55 = vsel %vm722_vm3, %v669_v23, %v721_v27 }
 0x282   :  { %v673_v31 = vrot.slane %v618_v8, %v2941_v10 }
 0x284   :  { %v725_v43 = vsel %vm724_vm5, %v673_v31, %v723_v55 }
 0x285   :  { %v621_v16 = vpop.permute.xlu0 %620 }
 0x286   :  { %v677_v33 = vrot.slane %v621_v16, %v2941_v10 }
 0x288   :  { %v727_v50 = vsel %vm726_vm4, %v677_v33, %v725_v43 }
 0x289   :  { %v624_v25 = vpop.permute.xlu1 %623  ;;  %v645_v40 = vpop.permute.xlu0 %644 }
 0x28a   :  { %v681_v37 = vrot.slane %v624_v25, %v2941_v10  ;;  %v709_v56 = vrot.slane %v645_v40, %v2941_v10 }
 0x28c   :  { %v729_v57 = vsel %vm728_vm6, %v681_v37, %v727_v50  ;;  %v736_v2 = vsel %vm726_vm4, %v709_v56, %v735_v18 }
 0x28f   :  { %v627_v44 = vpop.permute.xlu1 %626  ;;  %v651_v58 = vpop.permute.xlu0 %650 }
 0x290   :  { %v685_v53 = vrot.slane %v627_v44, %v2941_v10  ;;  %v717_v4 = vrot.slane %v651_v58, %v2941_v10 }
 0x292   :  { %v731_v62 = vsel %vm730_vm7, %v685_v53, %v729_v57 }
 0x293   :  { %v648_v29 = vpop.permute.xlu1 %647  ;;  %v742_v0 = vsel %vm741_vm8, %v731_v62, -inf }
 0x294   :  { %v713_v1 = vrot.slane %v648_v29, %v2941_v10  ;;  %743 = vmax.xlane.f32.xlu1 %v742_v0 }
 0x296   :  { %v737_v63 = vsel %vm728_vm6, %v713_v1, %v736_v2 }
 0x297   :  { %v738_v5 = vsel %vm730_vm7, %v717_v4, %v737_v63 }
 0x298   :  { %v745_v6 = vsel %vm741_vm8, %v738_v5, -inf }
 0x299   :  { %746 = vmax.xlane.f32.xlu0 %v745_v6 }
 0x31d   :  { %v744_v16 = vpop.xlane.xlu1 %743 }
 0x31e   :  { %v757_v27 = vrot.slane %v744_v16, %v2956_v17  ;;  %v761_v37 = vrot.slane %v744_v16, %v2947_v12  ;;  %v777_v48 = vrot.slane %v744_v16, %v2997_v47  ;;  %v773_v53 = vrot.slane %v744_v16, %v2975_v24 }
 0x320   :  { %v831_v55 = vsub.f32 %v3095_v35, %v757_v27  ;;  %v832_v43 = vsub.f32 %v3098_v38, %v761_v37  ;;  %v781_v38 = vrot.slane %v744_v16, %v3001_v49  ;;  %v836_v57 = vsub.f32 %v3112_v52, %v777_v48 }
 0x321   :  { %v835_v62 = vsub.f32 %v3107_v45, %v773_v53 }
 0x322   :  { %v3157_v8 = vpop.xlane.xlu0 %746  ;;  %v848_v44 = vmul.f32 1.442695, %v831_v55  ;;  %v858_v52 = vmul.f32 1.442695, %v836_v57 }
 0x323   :  { %v785_v11 = vrot.slane %v3157_v8, %v2938_v9  ;;  %v789_v14 = vrot.slane %v3157_v8, %v2956_v17  ;;  %v793_v19 = vrot.slane %v3157_v8, %v2947_v12  ;;  %v801_v23 = vrot.slane %v3157_v8, %v2970_v22 }
 0x324   :  { %v797_v32 = vrot.slane %v3157_v8, %v2952_v15  ;;  %v805_v29 = vrot.slane %v3157_v8, %v2975_v24  ;;  %v809_v18 = vrot.slane %v3157_v8, %v2997_v47  ;;  %v856_v45 = vmul.f32 1.442695, %v835_v62 }
 0x325   :  { %v838_v25 = vsub.f32 %v3077_v3, %v785_v11  ;;  %v839_v26 = vsub.f32 %v3080_v30, %v789_v14  ;;  %v842_v31 = vsub.f32 %v3088_v21, %v801_v23  ;;  %v840_v33 = vsub.f32 %v3083_v13, %v793_v19 }
 0x326   :  { %v753_v3 = vrot.slane %v744_v16, %v2938_v9  ;;  %v841_v30 = vsub.f32 %v3086_v20, %v797_v32  ;;  %v769_v21 = vrot.slane %v744_v16, %v2970_v22  ;;  %v765_v13 = vrot.slane %v744_v16, %v2952_v15 }
 0x327   :  { %v862_v34 = vmul.f32 1.442695, %v838_v25  ;;  %v864_v36 = vmul.f32 1.442695, %v839_v26  ;;  %v870_v40 = vmul.f32 1.442695, %v842_v31  ;;  %v813_v2 = vrot.slane %v3157_v8, %v3001_v49 }
 0x328   :  { %v866_v42 = vmul.f32 1.442695, %v840_v33  ;;  %v830_v46 = vsub.f32 %v3092_v28, %v753_v3  ;;  %v868_v35 = vmul.f32 1.442695, %v841_v30  ;;  %v834_v50 = vsub.f32 %v3104_v41, %v769_v21 }
 0x329   :  { %2792 = vpow2.f32 %v862_v34  ;;  %v850_v20 = vmul.f32 1.442695, %v832_v43  ;;  %v833_v54 = vsub.f32 %v3100_v39, %v765_v13  ;;  %v837_v39 = vsub.f32 %v3116_v59, %v781_v38 }
 0x32a   :  { %2794 = vpow2.f32 %v864_v36  ;;  %v846_v56 = vmul.f32 1.442695, %v830_v46  ;;  %v854_v28 = vmul.f32 1.442695, %v834_v50  ;;  %v843_v4 = vsub.f32 %v3110_v51, %v805_v29 }
 0x32b   :  { %2796 = vpow2.f32 %v870_v40  ;;  %v852_v41 = vmul.f32 1.442695, %v833_v54  ;;  %v860_v59 = vmul.f32 1.442695, %v837_v39  ;;  %v844_v5 = vsub.f32 %v3122_v61, %v809_v18 }
 0x32c   :  { %2798 = vpow2.f32 %v866_v42  ;;  %v845_v11 = vsub.f32 %v3118_v60, %v813_v2  ;;  %v872_v14 = vmul.f32 1.442695, %v843_v4 }
 0x32d   :  { %2800 = vpow2.f32 %v848_v44  ;;  %v874_v51 = vmul.f32 1.442695, %v844_v5 }
 0x32e   :  { %2802 = vpow2.f32 %v868_v35  ;;  %v876_v19 = vmul.f32 1.442695, %v845_v11 }
 0x32f   :  { %2804 = vpow2.f32 %v850_v20 }
 0x330   :  { %2806 = vpow2.f32 %v846_v56 }
 0x331   :  { %2808 = vpow2.f32 %v854_v28 }
 0x332   :  { %2810 = vpow2.f32 %v852_v41 }
 0x333   :  { %2812 = vpow2.f32 %v858_v52 }
 0x334   :  { %2814 = vpow2.f32 %v856_v45 }
 0x335   :  { %2816 = vpow2.f32 %v860_v59 }
 0x336   :  { %v3188_v58 = vpop.eup %2792  ;;  %2818 = vpow2.f32 %v872_v14 }
 0x337   :  { %v3193_v0 = vpop.eup %2794  ;;  %919 = vperm.xlu1 %2758, %v3188_v58   ;;  %2820 = vpow2.f32 %v874_v51 }
 0x338   :  { %922 = vperm.xlu0 %2759, %v3193_v0   ;;  %v3200_v1 = vpop.eup %2796  ;;  %2822 = vpow2.f32 %v876_v19 }
 0x339   :  { %v3205_v63 = vpop.eup %2798 }
 0x33a   :  { %v3210_v6 = vpop.eup %2800 }
 0x33b   :  { %931 = vperm.xlu1 %2758, %v3200_v1   ;;  %v3213_v16 = vpop.eup %2802 }
 0x33c   :  { %925 = vperm.xlu0 %2759, %v3205_v63   ;;  %v3217_v8 = vpop.eup %2804 }
 0x33d   :  { %v3219_v23 = vpop.eup %2806 }
 0x33e   :  { %v3223_v60 = vpop.eup %2808 }
 0x33f   :  { %898 = vperm.xlu1 %2758, %v3210_v6   ;;  %v3225_v61 = vpop.eup %2810 }
 0x340   :  { %928 = vperm.xlu0 %2759, %v3213_v16   ;;  %v3229_v25 = vpop.eup %2812 }
 0x341   :  { %v3231_v26 = vpop.eup %2814 }
 0x342   :  { %v3235_v27 = vpop.eup %2816 }
 0x343   :  { %901 = vperm.xlu1 %2758, %v3217_v8   ;;  %v3237_v31 = vpop.eup %2818 }
 0x344   :  { %895 = vperm.xlu0 %2759, %v3219_v23   ;;  %v3241_v32 = vpop.eup %2820 }
 0x345   :  { %v3243_v33 = vpop.eup %2822 }
 0x347   :  { %907 = vperm.xlu1 %2758, %v3223_v60  }
 0x348   :  { %904 = vperm.xlu0 %2759, %v3225_v61  }
 0x34b   :  { %913 = vperm.xlu1 %2758, %v3229_v25  }
 0x34c   :  { %910 = vperm.xlu0 %2759, %v3231_v26  }
 0x34f   :  { %916 = vperm.xlu1 %2758, %v3235_v27  }
 0x350   :  { %934 = vperm.xlu0 %2759, %v3237_v31  }
 0x353   :  { %937 = vperm.xlu1 %2758, %v3241_v32  }
 0x354   :  { %940 = vperm.xlu0 %2759, %v3243_v33  }
 0x3b2   :  { %v920_v34 = vpop.permute.xlu1 %919 }
 0x3b3   :  { %v923_v36 = vpop.permute.xlu0 %922  ;;  %v977_v54 = vrot.slane %v920_v34, %v2941_v10 }
 0x3b4   :  { %v981_v53 = vrot.slane %v923_v36, %v2941_v10 }
 0x3b6   :  { %v932_v37 = vpop.permute.xlu1 %931  ;;  %v1013_v52 = vsel %vm718_vm1, %v981_v53, %v977_v54 }
 0x3b7   :  { %v926_v55 = vpop.permute.xlu0 %925  ;;  %v993_v51 = vrot.slane %v932_v37, %v2941_v10 }
 0x3b8   :  { %v985_v57 = vrot.slane %v926_v55, %v2941_v10 }
 0x3ba   :  { %v899_v40 = vpop.permute.xlu1 %898  ;;  %v1014_v2 = vsel %vm720_vm2, %v985_v57, %v1013_v52 }
 0x3bb   :  { %v929_v3 = vpop.permute.xlu0 %928  ;;  %v949_v21 = vrot.slane %v899_v40, %v2941_v10 }
 0x3bc   :  { %v989_v62 = vrot.slane %v929_v3, %v2941_v10 }
 0x3be   :  { %v902_v30 = vpop.permute.xlu1 %901  ;;  %v1015_v5 = vsel %vm722_vm3, %v989_v62, %v1014_v2 }
 0x3bf   :  { %v896_v42 = vpop.permute.xlu0 %895  ;;  %v953_v44 = vrot.slane %v902_v30, %v2941_v10  ;;  %v1016_v55 = vsel %vm724_vm5, %v993_v51, %v1015_v5 }
 0x3c0   :  { %v945_v43 = vrot.slane %v896_v42, %v2941_v10 }
 0x3c2   :  { %v1006_v13 = vsel %vm718_vm1, %v949_v21, %v945_v43  ;;  %v908_v46 = vpop.permute.xlu1 %907 }
 0x3c3   :  { %v905_v35 = vpop.permute.xlu0 %904  ;;  %v1007_v50 = vsel %vm720_vm2, %v953_v44, %v1006_v13  ;;  %v961_v20 = vrot.slane %v908_v46, %v2941_v10 }
 0x3c4   :  { %v957_v48 = vrot.slane %v905_v35, %v2941_v10 }
 0x3c6   :  { %v1008_v56 = vsel %vm722_vm3, %v957_v48, %v1007_v50  ;;  %v914_v38 = vpop.permute.xlu1 %913 }
 0x3c7   :  { %v911_v28 = vpop.permute.xlu0 %910  ;;  %v969_v29 = vrot.slane %v914_v38, %v2941_v10  ;;  %v1009_v39 = vsel %vm724_vm5, %v961_v20, %v1008_v56 }
 0x3c8   :  { %v965_v41 = vrot.slane %v911_v28, %v2941_v10 }
 0x3ca   :  { %v1010_v18 = vsel %vm726_vm4, %v965_v41, %v1009_v39  ;;  %v917_v45 = vpop.permute.xlu1 %916 }
 0x3cb   :  { %v935_v4 = vpop.permute.xlu0 %934  ;;  %v973_v59 = vrot.slane %v917_v45, %v2941_v10  ;;  %v1011_v14 = vsel %vm728_vm6, %v969_v29, %v1010_v18  ;;  %v2855_v45 = vmov 0.0  }
 0x3cc   :  { %v997_v11 = vrot.slane %v935_v4, %v2941_v10  ;;  %2630 = vmatprep.subr.mxu1 %v2855_v45  ;;  %2632 = vmatprep.mubr.msk.f32.mxu1 %vm2856_vm9, %v2855_v45 }
 0x3cd   :  { %v1012_v19 = vsel %vm730_vm7, %v973_v59, %v1011_v14 }
 0x3ce   :  { %v938_v34 = vpop.permute.xlu1 %937  ;;  %v1022_v36 = vsel %vm741_vm8, %v1012_v19, 0.0  ;;  %v1017_v30 = vsel %vm726_vm4, %v997_v11, %v1016_v55 }
 0x3cf   :  { %v941_v40 = vpop.permute.xlu0 %940  ;;  %v1001_v3 = vrot.slane %v938_v34, %v2941_v10  ;;  %1023 = vadd.xlane.f32.xlu1 %v1022_v36 }
 0x3d0   :  { %v1005_v42 = vrot.slane %v941_v40, %v2941_v10 }
 0x3d1   :  { %v1018_v21 = vsel %vm728_vm6, %v1001_v3, %v1017_v30 }
 0x3d2   :  { %v1019_v43 = vsel %vm730_vm7, %v1005_v42, %v1018_v21 }
 0x3d3   :  { %v1025_v37 = vsel %vm741_vm8, %v1019_v43, 0.0 }
 0x3d4   :  { %1026 = vadd.xlane.f32.xlu0 %v1025_v37 }
 0x458   :  { %v1024_v13 = vpop.xlane.xlu1 %1023 }
 0x45d   :  { %v1027_v44 = vpop.xlane.xlu0 %1026 }
 0x45e   :  { %2824 = vrcp.f32 %v1027_v44 }
 0x45f   :  { %2826 = vrcp.f32 %v1024_v13 }
 0x46b   :  { %v2825_v46 = vpop.eup %2824 }
 0x46c   :  { %v1073_v35 = vrot.slane %v2825_v46, %v2956_v17  ;;  %v1069_v48 = vrot.slane %v2825_v46, %v2938_v9  ;;  %v1077_v53 = vrot.slane %v2825_v46, %v2947_v12  ;;  %v1085_v54 = vrot.slane %v2825_v46, %v2970_v22  ;;  %v2827_v56 = vpop.eup %2826 }
 0x46d   :  { %v1081_v28 = vrot.slane %v2825_v46, %v2952_v15  ;;  %v1041_v62 = vrot.slane %v2827_v56, %v2956_v17  ;;  %v1045_v41 = vrot.slane %v2827_v56, %v2947_v12  ;;  %v1037_v29 = vrot.slane %v2827_v56, %v2938_v9 }
 0x46e   :  { %v1123_v50 = vmul.f32 %v3193_v0, %v1073_v35  ;;  %v1122_v20 = vmul.f32 %v3188_v58, %v1069_v48  ;;  %v1124_v38 = vmul.f32 %v3205_v63, %v1077_v53  ;;  %v1126_v57 = vmul.f32 %v3200_v1, %v1085_v54 }
 0x46f   :  { %v1125_v0 = vmul.f32 %v3213_v16, %v1081_v28  ;;  %v1115_v58 = vmul.f32 %v3210_v6, %v1041_v62  ;;  %v1116_v63 = vmul.f32 %v3217_v8, %v1045_v41  ;;  %v1114_v1 = vmul.f32 %v3219_v23, %v1037_v29 }
 0x470   :  { %1285 = vperm.xlu0 %2759, %v1123_v50   ;;  %1282 = vperm.xlu1 %2758, %v1122_v20   ;;  %v1053_v39 = vrot.slane %v2827_v56, %v2970_v22  ;;  %v1049_v17 = vrot.slane %v2827_v56, %v2952_v15  ;;  %v1061_v12 = vrot.slane %v2827_v56, %v2997_v47 }
 0x471   :  { %v1057_v9 = vrot.slane %v2827_v56, %v2975_v24  ;;  %v1065_v8 = vrot.slane %v2827_v56, %v3001_v49  ;;  %v1089_v15 = vrot.slane %v2825_v46, %v2975_v24  ;;  %v1097_v18 = vrot.slane %v2825_v46, %v3001_v49  ;;  %v3315_v24 = vld [vmem:[%s3660_s0] sm:$0xff] }
 0x472   :  { %v1118_v16 = vmul.f32 %v3223_v60, %v1053_v39  ;;  %v1117_v6 = vmul.f32 %v3225_v61, %v1049_v17  ;;  %v1120_v23 = vmul.f32 %v3229_v25, %v1061_v12  ;;  %v1093_v61 = vrot.slane %v2825_v46, %v2997_v47  ;;  %2631 = vmatpush3.msra.mxu1 %v3315_v24  ;;  %v1466_v12 = vld [vmem:[%s3666_s6 + $0x28] sm:$0xff] }
 0x473   :  { %v1119_v22 = vmul.f32 %v3231_v26, %v1057_v9  ;;  %v1121_v60 = vmul.f32 %v3235_v27, %v1065_v8  ;;  %v1127_v52 = vmul.f32 %v3237_v31, %v1089_v15  ;;  %v1129_v49 = vmul.f32 %v3243_v33, %v1097_v18  ;;  %2635 = vmatprep.subr.mxu1 %v2855_v45  ;;  %v2516_v9 = vld [vmem:[%s3666_s6 + $0x78] sm:$0xff]  ;;  %v1465_v8 = vld [vmem:[%s3666_s6 + $0x20] sm:$0xff] }
 0x474   :  { %1288 = vperm.xlu0 %2759, %v1124_v38   ;;  %1294 = vperm.xlu1 %2758, %v1126_v57   ;;  %v1128_v47 = vmul.f32 %v3241_v32, %v1093_v61  ;;  %v1464_v15 = vld [vmem:[%s3666_s6 + $0x18] sm:$0xff]  ;;  %v1463_v61 = vld [vmem:[%s3666_s6 + $0x10] sm:$0xff]  ;;  %v2513_v18 = vld [vmem:[%s3666_s6 + $0x60] sm:$0xff] }
 0x475   :  { %2659 = vmatprep.subr.mxu0 %v2516_v9 }
 0x476   :  { %2660 = vmatpush3.msra.mxu0 %v2516_v9 }
 0x478   :  { %1291 = vperm.xlu0 %2759, %v1125_v0   ;;  %1142 = vperm.xlu1 %2758, %v1115_v58  }
 0x47c   :  { %1145 = vperm.xlu1 %2758, %v1116_v63   ;;  %1139 = vperm.xlu0 %2759, %v1114_v1   ;;  %v3352_v1 = vld [vmem:[%s3660_s0 + $0x8] sm:$0xff] }
 0x480   :  { %1151 = vperm.xlu1 %2758, %v1118_v16   ;;  %1148 = vperm.xlu0 %2759, %v1117_v6   ;;  %v1467_v6 = vld [vmem:[%s3666_s6 + $0x30] sm:$0xff] }
 0x484   :  { %1157 = vperm.xlu1 %2758, %v1120_v23   ;;  %1154 = vperm.xlu0 %2759, %v1119_v22   ;;  %v2515_v22 = vld [vmem:[%s3666_s6 + $0x70] sm:$0xff] }
 0x485   :  { %2661 = vmatprep.subr.mxu0 %v2515_v22 }
 0x486   :  { %2662 = vmatpush3.msra.mxu0 %v2515_v22 }
 0x488   :  { %1160 = vperm.xlu1 %2758, %v1121_v60   ;;  %1297 = vperm.xlu0 %2759, %v1127_v52   ;;  %v2514_v60 = vld [vmem:[%s3666_s6 + $0x68] sm:$0xff] }
 0x489   :  { %2663 = vmatprep.subr.mxu0 %v2514_v60 }
 0x48a   :  { %2664 = vmatpush3.msra.mxu0 %v2514_v60 }
 0x48b   :  { %2665 = vmatprep.subr.mxu0 %v2513_v18 }
 0x48c   :  { %1300 = vperm.xlu1 %2758, %v1128_v47   ;;  %1303 = vperm.xlu0 %2759, %v1129_v49   ;;  %v1462_v47 = vld [vmem:[%s3666_s6 + $0x8] sm:$0xff] }
 0x48d   :  { %2666 = vmatpush3.msra.mxu0 %v2513_v18  ;;  %v2525_v18 = vld [vmem:[%s3666_s6 + $0xb0] sm:$0xff] }
 0x4eb   :  { %v1286_v25 = vpop.permute.xlu0 %1285  ;;  %v1283_v26 = vpop.permute.xlu1 %1282 }
 0x4ec   :  { %v1312_v3 = vrot.slane %v1286_v25, %v2941_v10  ;;  %v1308_v30 = vrot.slane %v1283_v26, %v2941_v10  ;;  %v2512_v25 = vld [vmem:[%s3666_s6 + $0x58] sm:$0xff]  ;;  %v1461_v26 = vld [vmem:[%s3666_s6] sm:$0xff] }
 0x4ed   :  { %2667 = vmatprep.subr.mxu0 %v2512_v25 }
 0x4ee   :  { %v1337_v48 = vsel %vm718_vm1, %v1312_v3, %v1308_v30  ;;  %2668 = vmatpush3.msra.mxu0 %v2512_v25 }
 0x4ef   :  { %v1289_v27 = vpop.permute.xlu0 %1288  ;;  %v1295_v31 = vpop.permute.xlu1 %1294 }
 0x4f0   :  { %v1316_v43 = vrot.slane %v1289_v27, %v2941_v10  ;;  %v1324_v28 = vrot.slane %v1295_v31, %v2941_v10  ;;  %v2511_v31 = vld [vmem:[%s3666_s6 + $0x50] sm:$0xff] }
 0x4f1   :  { %2669 = vmatprep.subr.mxu0 %v2511_v31 }
 0x4f2   :  { %v1338_v53 = vsel %vm720_vm2, %v1316_v43, %v1337_v48  ;;  %2670 = vmatpush3.msra.mxu0 %v2511_v31 }
 0x4f3   :  { %v1292_v2 = vpop.permute.xlu0 %1291  ;;  %v1143_v4 = vpop.permute.xlu1 %1142 }
 0x4f4   :  { %v1169_v11 = vrot.slane %v1143_v4, %v2941_v10  ;;  %v1320_v44 = vrot.slane %v1292_v2, %v2941_v10  ;;  %v3406_v2 = vld [vmem:[%s3666_s6 + $0xb8] sm:$0xff]  ;;  %v2510_v4 = vld [vmem:[%s3666_s6 + $0x48] sm:$0xff] }
 0x4f5   :  { %2671 = vmatprep.subr.mxu0 %v2510_v4 }
 0x4f6   :  { %v1339_v56 = vsel %vm722_vm3, %v1320_v44, %v1338_v53  ;;  %2672 = vmatpush3.msra.mxu0 %v2510_v4  ;;  %v2524_v4 = vld [vmem:[%s3666_s6 + $0xa8] sm:$0xff] }
 0x4f7   :  { %v1140_v59 = vpop.permute.xlu0 %1139  ;;  %v1146_v5 = vpop.permute.xlu1 %1145  ;;  %v1340_v41 = vsel %vm724_vm5, %v1324_v28, %v1339_v56 }
 0x4f8   :  { %v1165_v14 = vrot.slane %v1140_v59, %v2941_v10  ;;  %v1173_v32 = vrot.slane %v1146_v5, %v2941_v10  ;;  %v2509_v59 = vld [vmem:[%s3666_s6 + $0x40] sm:$0xff]  ;;  %v3418_v5 = vld [vmem:[%s3666_s6 + $0xf8] sm:$0xff] }
 0x4f9   :  { %2673 = vmatprep.subr.mxu0 %v2509_v59 }
 0x4fa   :  { %v1194_v33 = vsel %vm718_vm1, %v1169_v11, %v1165_v14  ;;  %2674 = vmatpush3.msra.mxu0 %v2509_v59  ;;  %v2858_v11 = vmov 1983009808  }
 0x4fb   :  { %v1149_v51 = vpop.permute.xlu0 %1148  ;;  %v1152_v19 = vpop.permute.xlu1 %1151  ;;  %v1195_v36 = vsel %vm720_vm2, %v1173_v32, %v1194_v33  ;;  %2697 = vmatprep.subr.mxu0 %v3418_v5  ;;  %v1431_v14 = vunpack.c.l.s4 %v2858_v11 }
 0x4fc   :  { %v1177_v34 = vrot.slane %v1149_v51, %v2941_v10  ;;  %v1181_v55 = vrot.slane %v1152_v19, %v2941_v10 }
 0x4fd   :  { %v1432_v32 = vunpack.c.0.s8 %v1431_v14 }
 0x4fe   :  { %v1196_v40 = vsel %vm722_vm3, %v1177_v34, %v1195_v36 }
 0x4ff   :  { %v1155_v42 = vpop.permute.xlu0 %1154  ;;  %v1158_v21 = vpop.permute.xlu1 %1157  ;;  %v1197_v13 = vsel %vm724_vm5, %v1181_v55, %v1196_v40  ;;  %v3422_v33 = vsub.s32 %v1432_v32, %v2935_v7 }
 0x500   :  { %v1185_v37 = vrot.slane %v1155_v42, %v2941_v10  ;;  %v1189_v46 = vrot.slane %v1158_v21, %v2941_v10 }
 0x501   :  { %v3429_v34 = vrot.slane %v2855_v45, %v3422_v33 }
 0x502   :  { %v1198_v35 = vsel %vm726_vm4, %v1185_v37, %v1197_v13 }
 0x503   :  { %v1298_v50 = vpop.permute.xlu0 %1297  ;;  %v1161_v20 = vpop.permute.xlu1 %1160  ;;  %v1199_v38 = vsel %vm728_vm6, %v1189_v46, %v1198_v35 }
 0x504   :  { %v1193_v54 = vrot.slane %v1161_v20, %v2941_v10  ;;  %v1328_v57 = vrot.slane %v1298_v50, %v2941_v10 }
 0x506   :  { %v1200_v62 = vsel %vm730_vm7, %v1193_v54, %v1199_v38  ;;  %v1341_v39 = vsel %vm726_vm4, %v1328_v57, %v1340_v41 }
 0x507   :  { %v1304_v0 = vpop.permute.xlu0 %1303  ;;  %2633 = vmatmul.mubr.msk.f32.vlgmr.msra.gmra.mxu1 %vm741_vm8, %v1200_v62  ;;  %v1301_v58 = vpop.permute.xlu1 %1300 }
 0x508   :  { %v1336_v29 = vrot.slane %v1304_v0, %v2941_v10  ;;  %v1332_v63 = vrot.slane %v1301_v58, %v2941_v10  ;;  %2636 = vmatpush3.msra.mxu1 %v3352_v1  ;;  %2637 = vmatprep.mubr.msk.f32.mxu1 %vm2856_vm9, %v2855_v45  ;;  %v1468_v10 = vld [vmem:[%s3666_s6 + $0x38] sm:$0xff] }
 0x509   :  { %2640 = vmatprep.subr.mxu1 %v1468_v10 }
 0x50a   :  { %v1342_v17 = vsel %vm728_vm6, %v1332_v63, %v1341_v39 }
 0x50b   :  { %v1343_v16 = vsel %vm730_vm7, %v1336_v29, %v1342_v17 }
 0x50c   :  { %2638 = vmatmul.mubr.msk.f32.vlgmr.msra.gmra.mxu1 %vm741_vm8, %v1343_v16 }
 0x50d   :  { %2641 = vmatpush3.msra.mxu1 %v1468_v10 }
 0x50e   :  { %2642 = vmatprep.subr.mxu1 %v1467_v6 }
 0x50f   :  { %2643 = vmatpush3.msra.mxu1 %v1467_v6 }
 0x510   :  { %2644 = vmatprep.subr.mxu1 %v1466_v12 }
 0x511   :  { %2645 = vmatpush3.msra.mxu1 %v1466_v12 }
 0x512   :  { %2646 = vmatprep.subr.mxu1 %v1465_v8 }
 0x513   :  { %2647 = vmatpush3.msra.mxu1 %v1465_v8 }
 0x514   :  { %2648 = vmatprep.subr.mxu1 %v1464_v15 }
 0x515   :  { %2649 = vmatpush3.msra.mxu1 %v1464_v15 }
 0x516   :  { %2650 = vmatprep.subr.mxu1 %v1463_v61 }
 0x517   :  { %2651 = vmatpush3.msra.mxu1 %v1463_v61 }
 0x518   :  { %2652 = vmatprep.subr.mxu1 %v1462_v47 }
 0x519   :  { %2653 = vmatpush3.msra.mxu1 %v1462_v47 }
 0x51a   :  { %2654 = vmatprep.subr.mxu1 %v1461_v26 }
 0x51b   :  { %2655 = vmatpush3.msra.mxu1 %v1461_v26 }
 0x51c   :  { %2678 = vmatprep.subr.mxu1 %v3406_v2 }
 0x5c7   :  { %v1269_v23 = vpop.f32.mrf.mxu1 }
 0x5c8   :  { %1418 = vrot.lane.b32.xlu1 %v1269_v23, %s2857_s25 }
 0x5c9   :  { %v2634_v52 = vpop.f32.mrf.mxu1 }
 0x5cc   :  { %v1412_v49 = vpop.f32.mrf.mxu1 }
 0x5cd   :  { %1420 = vrot.lane.b32.xlu0 %v1412_v49, %s2857_s25 }
 0x5ce   :  { %v2639_v27 = vpop.f32.mrf.mxu1 }
 0x63a   :  { %v1419_v51 = vpop.permute.xlu1 %1418 }
 0x63b   :  { %v1424_v19 = vsel %vm42_vm0, %v3315_v24, %v1419_v51  ;;  %v2024_v24 = vrot.slane %v3429_v34, 7 }
 0x63c   :  { %v1429_v36 = vcombine.high %v1424_v19, %v1424_v19  ;;  %v1436_v55 = vrot.slane %v1424_v19, %v3422_v33 }
 0x63e   :  { %v3434_v40 = vrot.slane %v1429_v36, %v3422_v33  ;;  %v1444_v7 = vcombine.high %v1436_v55, %v1436_v55  ;;  %v2507_v21 = vrot.slane %v1436_v55, 9  ;;  %v2536_v36 = vld [vmem:[%s3666_s6 + $0xf0] sm:$0xff] }
 0x63f   :  { %v1421_v30 = vpop.permute.xlu0 %1420 }
 0x640   :  { %v1469_v42 = vcombine.low %v1436_v55, %v1444_v7  ;;  %v1645_v43 = vrot.slane %v1444_v7, 7  ;;  %v1425_v37 = vsel %vm42_vm0, %v3352_v1, %v1421_v30  ;;  %v3447_v46 = vcombine.high %v3434_v40, %v3434_v40  ;;  %v2535_v30 = vld [vmem:[%s3666_s6 + $0xe8] sm:$0xff] }
 0x641   :  { %v1445_v44 = vcombine.high %v1425_v37, %v1425_v37  ;;  %v1452_v13 = vrot.slane %v1425_v37, %v3422_v33  ;;  %v1648_v35 = vrot.slane %v3434_v40, 7  ;;  %v1848_v53 = vcombine.low %v1444_v7, %v3434_v40  ;;  %v2522_v7 = vld [vmem:[%s3666_s6 + $0x98] sm:$0xff] }
 0x642   :  { %v1477_v48 = vrot.slane %v1469_v42, %v3422_v33  ;;  %v1646_v50 = vsel %vm3437_vm13, %v2507_v21, %v1645_v43  ;;  %v1647_v20 = vrot.slane %v1645_v43, 2  ;;  %v1651_v58 = vrot.slane %v3447_v46, 7  ;;  %v2521_v42 = vld [vmem:[%s3666_s6 + $0x90] sm:$0xff]  ;;  %v2534_v21 = vld [vmem:[%s3666_s6 + $0xe0] sm:$0xff] }
 0x643   :  { %v3455_v54 = vrot.slane %v1445_v44, %v3422_v33  ;;  %v1460_v56 = vcombine.high %v1452_v13, %v1452_v13  ;;  %v1470_v38 = vcombine.low %v3434_v40, %v1452_v13  ;;  %v2508_v57 = vrot.slane %v1452_v13, 9 }
 0x644   :  { %v2527_v28 = vcombine.high %v3434_v40, %v1452_v13  ;;  %v1649_v62 = vsel %vm3437_vm13, %v1647_v20, %v1648_v35  ;;  %v1650_v0 = vrot.slane %v1648_v35, 2  ;;  %v1856_v22 = vrot.slane %v1848_v53, %v3422_v33  ;;  %v2533_v13 = vld [vmem:[%s3666_s6 + $0xd8] sm:$0xff]  ;;  %v2519_v35 = vld [vmem:[%s3666_s6 + $0x80] sm:$0xff] }
 0x645   :  { %v1486_v41 = vcombine.low %v1460_v56, %v3455_v54  ;;  %v3465_v29 = vcombine.high %v3455_v54, %v3455_v54  ;;  %v1655_v63 = vrot.slane %v1460_v56, 7  ;;  %v1658_v1 = vrot.slane %v3455_v54, 7 }
 0x646   :  { %v1484_v39 = vrot.slane %v1470_v38, %v3422_v33  ;;  %v1863_v17 = vrot.slane %v2527_v28, %v3422_v33  ;;  %v1652_v16 = vsel %vm3437_vm13, %v1650_v0, %v1651_v58  ;;  %v1672_v10 = vcombine.low %v1646_v50, %v1649_v62  ;;  %v2532_v50 = vld [vmem:[%s3666_s6 + $0xd0] sm:$0xff]  ;;  %v2545_v28 = vld [vmem:[%s3666_s6 + $0x128] sm:$0xff]  ;;  %v2544_v0 = vld [vmem:[%s3666_s6 + $0x120] sm:$0xff] }
 0x647   :  { %v1657_v6 = vrot.slane %v1655_v63, 2  ;;  %v1660_v12 = vrot.slane %v1658_v1, 2  ;;  %v1493_v9 = vrot.slane %v1486_v41, %v3422_v33  ;;  %v1656_v8 = vsel %vm3437_vm13, %v2508_v57, %v1655_v63  ;;  %v2546_v38 = vld [vmem:[%s3666_s6 + $0x130] sm:$0xff]  ;;  %v2530_v57 = vld [vmem:[%s3666_s6 + $0xc0] sm:$0xff]  ;;  %v2541_v63 = vld [vmem:[%s3666_s6 + $0x108] sm:$0xff] }
 0x648   :  { %v1485_v23 = vcombine.low %v1477_v48, %v1484_v39  ;;  %v1673_v15 = vcombine.low %v1652_v16, %v1656_v8  ;;  %v1661_v61 = vrot.slane %v3465_v29, 7  ;;  %v2023_v52 = vrot.slane %v1651_v58, 2  ;;  %v2543_v58 = vld [vmem:[%s3666_s6 + $0x118] sm:$0xff]  ;;  %v2542_v41 = vld [vmem:[%s3666_s6 + $0x110] sm:$0xff]  ;;  %v2540_v39 = vld [vmem:[%s3666_s6 + $0x100] sm:$0xff] }
 0x649   :  { %v1659_v60 = vsel %vm3437_vm13, %v1657_v6, %v1658_v1  ;;  %v1864_v47 = vcombine.low %v1856_v22, %v1863_v17  ;;  %v1680_v49 = vrot.slane %v1672_v10, %v3422_v33  ;;  %v2037_v26 = vcombine.low %v1649_v62, %v1652_v16  ;;  %v2400_v16 = vld [vmem:[%s3668_s8 + $0x28] sm:$0xff]  ;;  %v2397_v10 = vld [vmem:[%s3668_s8 + $0x10] sm:$0xff] }
 0x64a   :  { %2656 = vmatprep.mubr.msk.f32.mxu1 %vm1494_vm14, %v1485_v23  ;;  %v1687_v25 = vrot.slane %v1673_v15, %v3422_v33  ;;  %v3488_v27 = vsel %vm3437_vm13, %v1660_v12, %v1661_v61  ;;  %v2025_v31 = vsel %vm3437_vm13, %v2023_v52, %v2024_v24  ;;  %v2214_v43 = vcombine.low %v3429_v34, %v3455_v54  ;;  %v2396_v6 = vld [vmem:[%s3668_s8 + $0x8] sm:$0xff]  ;;  %v2395_v12 = vld [vmem:[%s3668_s8] sm:$0xff] }
 0x64b   :  { %2657 = vmatmul.mubr.msk.f32.vlgmr.msra.gmra.mxu1 %vm1494_vm14, %v1493_v9  ;;  %v1689_v11 = vcombine.low %v1659_v60, %v3488_v27  ;;  %v2038_v14 = vcombine.low %v2025_v31, %v1659_v60  ;;  %v2045_v51 = vrot.slane %v2037_v26, %v3422_v33  ;;  %v2026_v37 = vrot.slane %v1661_v61, 2 }
 0x64c   :  { %2679 = vmatpush3.msra.mxu1 %v3406_v2  ;;  %2694 = vmatprep.mubr.msk.f32.mxu1 %vm1494_vm14, %v1864_v47  ;;  %v1688_v59 = vcombine.low %v1680_v49, %v1687_v25  ;;  %v2523_v2 = vld [vmem:[%s3666_s6 + $0xa0] sm:$0xff]  ;;  %v1865_v44 = vcombine.low %v3455_v54, %v3465_v29  ;;  %v2213_v48 = vcombine.low %v3434_v40, %v3447_v46  ;;  %v2547_v40 = vld [vmem:[%s3666_s6 + $0x138] sm:$0xff]  ;;  %v2531_v46 = vld [vmem:[%s3666_s6 + $0xc8] sm:$0xff]  ;;  %vm2411_vm0 = vcmask 392192  }
 0x64d   :  { %2680 = vmatprep.subr.mxu1 %v2525_v18  ;;  %v1696_v32 = vrot.slane %v1689_v11, %v3422_v33  ;;  %v2052_v19 = vrot.slane %v2038_v14, %v3422_v33  ;;  %v2228_v20 = vrot.slane %v2214_v43, %v3422_v33  ;;  %v2027_v53 = vsel %vm3437_vm13, %v2026_v37, %v2024_v24 }
 0x64e   :  { %2681 = vmatpush3.msra.mxu1 %v2525_v18  ;;  %2675 = vmatprep.mubr.msk.f32.mxu0 %vm1494_vm14, %v1688_v59  ;;  %v1872_v54 = vrot.slane %v1865_v44, %v3422_v33  ;;  %v2221_v56 = vrot.slane %v2213_v48, %v3422_v33  ;;  %v2054_v3 = vcombine.low %v3488_v27, %v2027_v53 }
 0x64f   :  { %2682 = vmatprep.subr.mxu1 %v2524_v4  ;;  %2676 = vmatmul.mubr.msk.f32.vlgmr.msra.gmra.mxu0 %vm1494_vm14, %v1696_v32  ;;  %v2053_v55 = vcombine.low %v2045_v51, %v2052_v19  ;;  %v2230_v1 = vcombine.low %v3465_v29, %v3429_v34  ;;  %v2399_v34 = vld [vmem:[%s3668_s8 + $0x20] sm:$0xff]  ;;  %v2398_v29 = vld [vmem:[%s3668_s8 + $0x18] sm:$0xff] }
 0x650   :  { %2683 = vmatpush3.msra.mxu1 %v2524_v4  ;;  %2698 = vmatpush3.msra.mxu0 %v3418_v5  ;;  %v2520_v5 = vld [vmem:[%s3666_s6 + $0x88] sm:$0xff]  ;;  %v2229_v24 = vcombine.low %v2221_v56, %v2228_v20  ;;  %v2061_v62 = vrot.slane %v2054_v3, %v3422_v33 }
 0x651   :  { %2684 = vmatprep.subr.mxu1 %v2523_v2  ;;  %2699 = vmatprep.subr.mxu0 %v2536_v36  ;;  %v2237_v17 = vrot.slane %v2230_v1, %v3422_v33 }
 0x652   :  { %2685 = vmatpush3.msra.mxu1 %v2523_v2  ;;  %2713 = vmatprep.mubr.msk.f32.mxu0 %vm1494_vm14, %v2053_v55 }
 0x653   :  { %2686 = vmatprep.subr.mxu1 %v2522_v7  ;;  %2700 = vmatpush3.msra.mxu0 %v2536_v36 }
 0x654   :  { %2687 = vmatpush3.msra.mxu1 %v2522_v7  ;;  %2701 = vmatprep.subr.mxu0 %v2535_v30 }
 0x655   :  { %2688 = vmatprep.subr.mxu1 %v2521_v42  ;;  %2702 = vmatpush3.msra.mxu0 %v2535_v30 }
 0x656   :  { %2689 = vmatpush3.msra.mxu1 %v2521_v42  ;;  %2703 = vmatprep.subr.mxu0 %v2534_v21 }
 0x657   :  { %2690 = vmatprep.subr.mxu1 %v2520_v5  ;;  %2704 = vmatpush3.msra.mxu0 %v2534_v21 }
 0x658   :  { %2691 = vmatpush3.msra.mxu1 %v2520_v5  ;;  %2705 = vmatprep.subr.mxu0 %v2533_v13 }
 0x659   :  { %2692 = vmatprep.subr.mxu1 %v2519_v35  ;;  %2706 = vmatpush3.msra.mxu0 %v2533_v13 }
 0x65a   :  { %2693 = vmatpush3.msra.mxu1 %v2519_v35  ;;  %2707 = vmatprep.subr.mxu0 %v2532_v50 }
 0x65b   :  { %2695 = vmatmul.mubr.msk.f32.vlgmr.msra.gmra.mxu1 %vm1494_vm14, %v1872_v54  ;;  %2708 = vmatpush3.msra.mxu0 %v2532_v50 }
 0x65c   :  { %2716 = vmatprep.subr.mxu1 %v2547_v40  ;;  %2709 = vmatprep.subr.mxu0 %v2531_v46 }
 0x65d   :  { %2717 = vmatpush3.msra.mxu1 %v2547_v40  ;;  %2732 = vmatprep.mubr.msk.f32.mxu1 %vm1494_vm14, %v2229_v24 }
 0x65e   :  { %2710 = vmatpush3.msra.mxu0 %v2531_v46  ;;  %2718 = vmatprep.subr.mxu1 %v2546_v38 }
 0x65f   :  { %2711 = vmatprep.subr.mxu0 %v2530_v57  ;;  %2719 = vmatpush3.msra.mxu1 %v2546_v38 }
 0x660   :  { %2712 = vmatpush3.msra.mxu0 %v2530_v57  ;;  %2720 = vmatprep.subr.mxu1 %v2545_v28 }
 0x661   :  { %2714 = vmatmul.mubr.msk.f32.vlgmr.msra.gmra.mxu0 %vm1494_vm14, %v2061_v62  ;;  %2721 = vmatpush3.msra.mxu1 %v2545_v28 }
 0x662   :  { %2735 = vmatprep.subr.mxu0 %v2855_v45  ;;  %2722 = vmatprep.subr.mxu1 %v2544_v0 }
 0x663   :  { %2747 = vmatprep.mubr.msk.f32.mxu0 %vm2856_vm9, %v2855_v45  ;;  %2723 = vmatpush3.msra.mxu1 %v2544_v0 }
 0x664   :  { %2724 = vmatprep.subr.mxu1 %v2543_v58  ;;  %2736 = vmatpush3.msra.mxu0 %v2400_v16 }
 0x665   :  { %2725 = vmatpush3.msra.mxu1 %v2543_v58  ;;  %2737 = vmatprep.subr.mxu0 %v2855_v45 }
 0x666   :  { %2726 = vmatprep.subr.mxu1 %v2542_v41  ;;  %2738 = vmatpush3.msra.mxu0 %v2399_v34 }
 0x667   :  { %2727 = vmatpush3.msra.mxu1 %v2542_v41  ;;  %2739 = vmatprep.subr.mxu0 %v2855_v45  ;;  %v1426_v41 = vld [vmem:[%s3667_s7] sm:$0x3f] }
 0x668   :  { %2728 = vmatprep.subr.mxu1 %v2541_v63  ;;  %2740 = vmatpush3.msra.mxu0 %v2398_v29 }
 0x669   :  { %2729 = vmatpush3.msra.mxu1 %v2541_v63  ;;  %2741 = vmatprep.subr.mxu0 %v2855_v45 }
 0x66a   :  { %2730 = vmatprep.subr.mxu1 %v2540_v39  ;;  %2742 = vmatpush3.msra.mxu0 %v2397_v10 }
 0x66b   :  { %2731 = vmatpush3.msra.mxu1 %v2540_v39  ;;  %2743 = vmatprep.subr.mxu0 %v2855_v45 }
 0x66c   :  { %2733 = vmatmul.mubr.msk.f32.vlgmr.msra.gmra.mxu1 %vm1494_vm14, %v2237_v17  ;;  %2744 = vmatpush3.msra.mxu0 %v2396_v6 }
 0x66d   :  { %2745 = vmatprep.subr.mxu0 %v2855_v45 }
 0x66e   :  { %2746 = vmatpush3.msra.mxu0 %v2395_v12 }
 0x70b   :  { %v2658_v9 = vpop.f32.mrf.mxu1 }
 0x70c   :  { %v1599_v32 = vrot.slane %v2658_v9, %v3422_v33 }
 0x70d   :  { %v1565_v23 = vpop.f32.mrf.mxu1 }
 0x70e   :  { %v1576_v22 = vcombine.high %v1565_v23, %v1565_v23  ;;  %v1583_v61 = vrot.slane %v1565_v23, %v3422_v33  ;;  %v1600_v43 = vcombine.high %v1599_v32, %v1599_v32 }
 0x70f   :  { %v2677_v8 = vpop.f32.mrf.mxu0 }
 0x710   :  { %v1590_v47 = vrot.slane %v1576_v22, %v3422_v33  ;;  %v1591_v26 = vcombine.high %v1583_v61, %v1583_v61  ;;  %v1801_v30 = vrot.slane %v2677_v8, %v3422_v33  ;;  %v1631_v3 = vrot.slane %v1600_v43, %v3422_v33 }
 0x711   :  { %v1767_v15 = vpop.f32.mrf.mxu0 }
 0x712   :  { %v1778_v52 = vcombine.high %v1767_v15, %v1767_v15  ;;  %v1785_v49 = vrot.slane %v1767_v15, %v3422_v33  ;;  %v1592_v4 = vcombine.high %v1590_v47, %v1590_v47  ;;  %v1601_v2 = vcombine.low %v1583_v61, %v1591_v26 }
 0x713   :  { %v1615_v50 = vrot.slane %v1590_v47, %v3422_v33  ;;  %v1802_v53 = vcombine.high %v1801_v30, %v1801_v30 }
 0x714   :  { %v1792_v27 = vrot.slane %v1778_v52, %v3422_v33  ;;  %v1793_v59 = vcombine.high %v1785_v49, %v1785_v49  ;;  %v1617_v7 = vcombine.low %v1592_v4, %v1599_v32  ;;  %v1608_v37 = vrot.slane %v1601_v2, %v3422_v33 }
 0x715   :  { %v1833_v1 = vrot.slane %v1802_v53, %v3422_v33 }
 0x716   :  { %v1794_v19 = vcombine.high %v1792_v27, %v1792_v27  ;;  %v1803_v21 = vcombine.low %v1785_v49, %v1793_v59  ;;  %v1624_v20 = vrot.slane %v1617_v7, %v3422_v33  ;;  %v1616_v24 = vcombine.low %v1608_v37, %v1615_v50 }
 0x717   :  { %v1817_v57 = vrot.slane %v1792_v27, %v3422_v33 }
 0x718   :  { %v1819_v13 = vcombine.low %v1794_v19, %v1801_v30  ;;  %v1810_v40 = vrot.slane %v1803_v21, %v3422_v33  ;;  %v1632_v63 = vcombine.low %v1624_v20, %v1631_v3  ;;  %v1635_v23 = vadd.f32 %v1616_v24, %v1426_v41 }
 0x71a   :  { %v1826_v28 = vrot.slane %v1819_v13, %v3422_v33  ;;  %v1818_v17 = vcombine.low %v1810_v40, %v1817_v57  ;;  %v1636_v49 = vadd.f32 %v1632_v63, %v1426_v41  ;;  %v2550_v57 = vld [vmem:[%s3669_s9] ss:$0 sm:$0xff] }
 0x71b   :  { %v2696_v60 = vpop.f32.mrf.mxu1 }
 0x71c   :  { %v1977_v35 = vrot.slane %v2696_v60, %v3422_v33  ;;  %v1834_v22 = vcombine.low %v1826_v28, %v1833_v1 }
 0x71d   :  { %v1943_v18 = vpop.f32.mrf.mxu1 }
 0x71e   :  { %v1954_v25 = vcombine.high %v1943_v18, %v1943_v18  ;;  %v1961_v45 = vrot.slane %v1943_v18, %v3422_v33  ;;  %v1978_v62 = vcombine.high %v1977_v35, %v1977_v35 }
 0x720   :  { %v1968_v11 = vrot.slane %v1954_v25, %v3422_v33  ;;  %v1969_v36 = vcombine.high %v1961_v45, %v1961_v45  ;;  %v2009_v15 = vrot.slane %v1978_v62, %v3422_v33  ;;  %v1837_v25 = vadd.f32 %v1818_v17, %v1635_v23 }
 0x721   :  { %v2715_v31 = vpop.f32.mrf.mxu0 }
 0x722   :  { %v1970_v5 = vcombine.high %v1968_v11, %v1968_v11  ;;  %v1979_v48 = vcombine.low %v1961_v45, %v1969_v36  ;;  %v2166_v56 = vrot.slane %v2715_v31, %v3422_v33  ;;  %v1993_v16 = vrot.slane %v1968_v11, %v3422_v33 }
 0x723   :  { %v2132_v14 = vpop.f32.mrf.mxu0  ;;  %v1838_v11 = vadd.f32 %v1834_v22, %v1636_v49 }
 0x724   :  { %v2143_v51 = vcombine.high %v2132_v14, %v2132_v14  ;;  %v2150_v55 = vrot.slane %v2132_v14, %v3422_v33  ;;  %v1995_v46 = vcombine.low %v1970_v5, %v1977_v35  ;;  %v1986_v0 = vrot.slane %v1979_v48, %v3422_v33 }
 0x725   :  { %v2167_v29 = vcombine.high %v2166_v56, %v2166_v56 }
 0x726   :  { %v2157_v42 = vrot.slane %v2143_v51, %v3422_v33  ;;  %v2158_v44 = vcombine.high %v2150_v55, %v2150_v55  ;;  %v2002_v34 = vrot.slane %v1995_v46, %v3422_v33  ;;  %v1994_v60 = vcombine.low %v1986_v0, %v1993_v16 }
 0x727   :  { %v2198_v27 = vrot.slane %v2167_v29, %v3422_v33 }
 0x728   :  { %v2159_v54 = vcombine.high %v2157_v42, %v2157_v42  ;;  %v2168_v38 = vcombine.low %v2150_v55, %v2158_v44  ;;  %v2182_v61 = vrot.slane %v2157_v42, %v3422_v33  ;;  %v2010_v26 = vcombine.low %v2002_v34, %v2009_v15 }
 0x729   :  { %v2013_v14 = vadd.f32 %v1994_v60, %v1837_v25 }
 0x72a   :  { %v2184_v39 = vcombine.low %v2159_v54, %v2166_v56  ;;  %v2175_v6 = vrot.slane %v2168_v38, %v3422_v33  ;;  %v2014_v36 = vadd.f32 %v2010_v26, %v1838_v11 }
 0x72c   :  { %v2734_v58 = vpop.f32.mrf.mxu1  ;;  %v2191_v52 = vrot.slane %v2184_v39, %v3422_v33  ;;  %v2183_v45 = vcombine.low %v2175_v6, %v2182_v61 }
 0x72d   :  { %v2342_v12 = vrot.slane %v2734_v58, %v3422_v33 }
 0x72e   :  { %v2308_v10 = vpop.f32.mrf.mxu1  ;;  %v2199_v32 = vcombine.low %v2191_v52, %v2198_v27  ;;  %v2202_v55 = vadd.f32 %v2183_v45, %v2013_v14 }
 0x72f   :  { %v2319_v9 = vcombine.high %v2308_v10, %v2308_v10  ;;  %v2326_v8 = vrot.slane %v2308_v10, %v3422_v33  ;;  %v2343_v31 = vcombine.high %v2342_v12, %v2342_v12 }
 0x730   :  { %v2203_v21 = vadd.f32 %v2199_v32, %v2014_v36 }
 0x731   :  { %v2333_v18 = vrot.slane %v2319_v9, %v3422_v33  ;;  %v2334_v47 = vcombine.high %v2326_v8, %v2326_v8  ;;  %v2374_v7 = vrot.slane %v2343_v31, %v3422_v33 }
 0x733   :  { %v2335_v4 = vcombine.high %v2333_v18, %v2333_v18  ;;  %v2344_v59 = vcombine.low %v2326_v8, %v2334_v47  ;;  %v2358_v51 = vrot.slane %v2333_v18, %v3422_v33 }
 0x735   :  { %v2351_v2 = vrot.slane %v2344_v59, %v3422_v33  ;;  %v2360_v19 = vcombine.low %v2335_v4, %v2342_v12 }
 0x737   :  { %v2359_v30 = vcombine.low %v2351_v2, %v2358_v51  ;;  %v2367_v42 = vrot.slane %v2360_v19, %v3422_v33 }
 0x739   :  { %v2375_v5 = vcombine.low %v2367_v42, %v2374_v7  ;;  %v2378_v43 = vadd.f32 %v2359_v30, %v2202_v55 }
 0x73b   :  { %v2379_v37 = vadd.f32 %v2375_v5, %v2203_v21  ;;  %v2381_v44 = vsel %vm2380_vm15, %v2378_v43, -inf }
 0x73c   :  { %v2382_v13 = vrot.slane %v2381_v44, 4 }
 0x73d   :  { %v2388_v35 = vsel %vm2380_vm15, %v2379_v37, -inf }
 0x73e   :  { %v2383_v48 = vmax.f32 %v2381_v44, %v2382_v13  ;;  %v2389_v50 = vrot.slane %v2388_v35, 4 }
 0x740   :  { %v2384_v20 = vrot.slane %v2383_v48, 2  ;;  %v2390_v53 = vmax.f32 %v2388_v35, %v2389_v50 }
 0x742   :  { %v2385_v54 = vmax.f32 %v2383_v48, %v2384_v20  ;;  %v2391_v40 = vrot.slane %v2390_v53, 2 }
 0x744   :  { %v2386_v46 = vrot.slane %v2385_v54, 1  ;;  %v2392_v56 = vmax.f32 %v2390_v53, %v2391_v40 }
 0x746   :  { %v2393_v3 = vrot.slane %v2392_v56, 1  ;;  %v2387_v24 = vmax.f32 %v2385_v54, %v2386_v46 }
 0x748   :  { %v2394_v38 = vmax.f32 %v2392_v56, %v2393_v3 }
 0x74a   :  { %v2410_v33 = vsel %vm718_vm1, %v2394_v38, %v2387_v24 }
 0x74b   :  { %2748 = vmatmul.mubr.msk.f32.vlgmr.msra.gmra.mxu0 %vm2411_vm0, %v2410_v33 }
 0x80b   :  { %v2480_v28 = vpop.f32.mrf.mxu0 }
 0x80c   :  { %v2481_v62 = vadd.f32 %v2550_v57, %v2480_v28 }
 0x80d   :  { %v2749_v0 = vpop.f32.mrf.mxu0 }
 0x80e   :  { %2484 = vst [vmem:[#allocation2] sm:$0x3] %v2481_v62 }
 0x80f   :  { %2841 = shalt.err (!%p2838_p4)
}
 0x810   :  { %2494 = dma.vmem_to_hbm [thread:$0]  %s2492_s4, 32, %s3670_s10, [#allocation3]  }
 0x811   :  { %2850 = dma.done.wait [#allocation3], 32  }
 0x812   :  { %2851 = vsyncadd [#allocation3], 4294967264 }
 0x813   :  { %2498 = vsyncpa [#allocation3], 1 }

</bundles_post_ra>
